<compile_context>
chip_gen: v7x
topology: tpu7x:2x2x1
jax: 0.10.0
libtpu: 0.0.40
codegen_flags: <defaults>
</compile_context>

<pallas_src>
import math

import jax
import jax.numpy as jnp
from jax.experimental import pallas as pl
from jax.experimental.pallas import tpu as pltpu

# ----------------------------- model config (small, synthetic) ---------------
BATCH = 2
SEQ = 8
HIDDEN = 32
NUM_HEADS = 2
HEAD_DIM = HIDDEN // NUM_HEADS
VOCAB = 64
INTERMEDIATE = 64
PINYIN_LEN = 8          # module does pinyin_ids.view(bs, length, 8)
PINYIN_VOCAB = 32
PINYIN_EMB = 16
GLYPH_DIM = 24
NUM_LAYERS = 2
LN_EPS = 1e-12

LANE = 128              # every padded lane dimension
NEG_INF = -1e30

_VMEM = pltpu.MemorySpace.VMEM

# --------------------- packed weight-slab layout (static) --------------------
# bf16 weight slab: WB_TOTAL consecutive (128, 128) blocks.
WB_WORD = 0
WB_GLYPH_TAB = 1
WB_GLYPH_MAP = 2
WB_PIN_CHAR = 3
WB_PIN_CONV_A = 4
WB_PIN_CONV_B = 5
WB_MFC_WORD = 6
WB_MFC_PIN = 7
WB_MFC_GLY = 8
WB_LAYER0 = 9
WL_WO = 0                       # + head
WL_W1 = NUM_HEADS
WL_W2 = NUM_HEADS + 1
WB_PER_LAYER = NUM_HEADS + 2
WB_MLM_DENSE = WB_LAYER0 + NUM_LAYERS * WB_PER_LAYER
WB_DEC = WB_MLM_DENSE + 1
WB_TOTAL = WB_DEC + 1

# f32 slab: one (1, 128) row per bias / LN param, then (m, 128) pos+type rows.
FR_PIN_B = 0
FR_GLYPH_MAP_B = 1
FR_MFC_B = 2
FR_EMB_LN_G = 3
FR_EMB_LN_B = 4
FR_LAYER0 = 5
FL_BQ = 0                       # + head
FL_BK = NUM_HEADS
FL_BV = 2 * NUM_HEADS
FL_BO = 3 * NUM_HEADS
FL_LN1_G = FL_BO + 1
FL_LN1_B = FL_BO + 2
FL_B1 = FL_BO + 3
FL_B2 = FL_BO + 4
FL_LN2_G = FL_BO + 5
FL_LN2_B = FL_BO + 6
FR_PER_LAYER = FL_LN2_B + 1
FR_MLM_DENSE_B = FR_LAYER0 + NUM_LAYERS * FR_PER_LAYER
FR_MLM_LN_G = FR_MLM_DENSE_B + 1
FR_MLM_LN_B = FR_MLM_DENSE_B + 2
FR_DEC_B = FR_MLM_DENSE_B + 3
FR_POS_TYPE = ((FR_DEC_B + 1 + 7) // 8) * 8     # sublane-aligned start of pos rows


# ----------------------------- in-kernel helpers ------------------------------
def _layernorm(x, g, b):
    """LayerNorm over the true HIDDEN width of a 128-lane-padded activation.

    Padded lanes of x are guaranteed zero (weights/biases zero-padded), so the
    raw lane sums equal the true-width sums; padded gamma/beta are zero so the
    padded output lanes stay zero.
    """
    inv_w = 1.0 / HIDDEN
    mu = jnp.sum(x, axis=-1, keepdims=True) * inv_w
    ex2 = jnp.sum(x * x, axis=-1, keepdims=True) * inv_w
    var = jnp.maximum(ex2 - mu * mu, 0.0)
    return (x - mu) * jax.lax.rsqrt(var + LN_EPS) * g + b


def _make_kernel(bs, length):
    m = bs * length
    scale = 1.0 / math.sqrt(HEAD_DIM)
    f32 = jnp.float32
    bf16 = jnp.bfloat16

    def kernel(int_ref, mask_ref, w_ref, qkv_ref, f_ref, logits_ref, loss_ref):
        def W(idx):                                       # (128, 128) bf16 block
            return w_ref[pl.ds(idx * LANE, LANE), :]

        fs = f_ref[...]                                   # (FR_POS_TYPE+m, 128) f32

        def F(row):                                       # (1, 128) f32 row
            return fs[row:row + 1, :]

        def mm(a16, idx):                                 # bf16 matmul, f32 accum
            return jnp.dot(a16, W(idx), preferred_element_type=f32)

        ints = int_ref[...]                               # (10m, 1) int32
        ids = ints[0:m, :]
        labels = ints[m:2 * m, :]
        pin_ids = ints[2 * m:(2 + PINYIN_LEN) * m, :]     # slot-major pinyin ids
        mask_add = mask_ref[...]                          # (bs, 1, length) additive

        # ---- FusionBertEmbeddings (gathers as one-hot MXU matmuls) ----
        lane_iota = jax.lax.broadcasted_iota(jnp.int32, (m, LANE), 1)
        oh_word = (lane_iota == ids).astype(f32).astype(bf16)          # (m, 128)
        word = mm(oh_word, WB_WORD)                                    # (m, 128)
        glyph_feat = mm(oh_word, WB_GLYPH_TAB)
        glyph = mm(glyph_feat.astype(bf16), WB_GLYPH_MAP) + F(FR_GLYPH_MAP_B)

        # pinyin: Conv1d(kernel=2) + max-pool == 2 matmuls + shifted adds + max.
        pin_iota = jax.lax.broadcasted_iota(jnp.int32, (PINYIN_LEN * m, LANE), 1)
        oh_pin = (pin_iota == pin_ids).astype(f32).astype(bf16)        # (8m, 128)
        pchar = mm(oh_pin, WB_PIN_CHAR).astype(bf16)
        conv_a = mm(pchar, WB_PIN_CONV_A)
        conv_b = mm(pchar, WB_PIN_CONV_B)
        pin_b = F(FR_PIN_B)
        pin = None
        for t in range(PINYIN_LEN - 1):            # 7 windows, slot-aligned slices
            win = (conv_a[t * m:(t + 1) * m, :]
                   + conv_b[(t + 1) * m:(t + 2) * m, :] + pin_b)
            pin = win if pin is None else jnp.maximum(pin, win)

        # map_fc over concat(word, pin, glyph): sum of 3 matmuls (no concat copy).
        fused = (mm(word.astype(bf16), WB_MFC_WORD)
                 + mm(pin.astype(bf16), WB_MFC_PIN)
                 + mm(glyph.astype(bf16), WB_MFC_GLY)
                 + F(FR_MFC_B))
        # pos + token-type(=0) embeddings pre-tiled to (m, 128) in the f32 slab.
        # TODO(synk): only token_type_id 0 is supported (single-segment inputs).
        h = fused + fs[FR_POS_TYPE:FR_POS_TYPE + m, :]
        h = _layernorm(h, F(FR_EMB_LN_G), F(FR_EMB_LN_B))

        # ---- transformer encoder (post-LN residual blocks) ----
        for l in range(NUM_LAYERS):
            wb = WB_LAYER0 + l * WB_PER_LAYER
            fb = FR_LAYER0 + l * FR_PER_LAYER
            h16 = h.astype(bf16)
            qkv_w = qkv_ref[pl.ds(l * LANE, LANE), :]      # (128, 6*128) bf16
            qkv = jnp.dot(h16, qkv_w, preferred_element_type=f32)   # (m, 768)
            attn_out = None
            for hd in range(NUM_HEADS):                    # 128-aligned head slices
                c0 = hd * 3 * LANE
                q = qkv[:, c0 + 0 * LANE:c0 + 1 * LANE] + F(fb + FL_BQ + hd)
                k = qkv[:, c0 + 1 * LANE:c0 + 2 * LANE] + F(fb + FL_BK + hd)
                v = qkv[:, c0 + 2 * LANE:c0 + 3 * LANE] + F(fb + FL_BV + hd)
                q3 = q.reshape(bs, length, LANE).astype(bf16)
                k3 = k.reshape(bs, length, LANE).astype(bf16)
                v3 = v.reshape(bs, length, LANE).astype(bf16)
                s = jnp.einsum("bqd,bkd->bqk", q3, k3,
                               preferred_element_type=f32) * scale + mask_add
                s = s - jnp.max(s, axis=-1, keepdims=True)
                p = jnp.exp(s)
                p = p * pl.reciprocal(jnp.sum(p, axis=-1, keepdims=True),
                                      approx=True)
                ctx = jnp.einsum("bqk,bkd->bqd", p.astype(bf16), v3,
                                 preferred_element_type=f32).reshape(m, LANE)
                ho = mm(ctx.astype(bf16), wb + WL_WO + hd)   # per-head out-proj
                attn_out = ho if attn_out is None else attn_out + ho
            attn_out = attn_out + F(fb + FL_BO)
            h = _layernorm(attn_out + h, F(fb + FL_LN1_G), F(fb + FL_LN1_B))

            ffn = mm(h.astype(bf16), wb + WL_W1) + F(fb + FL_B1)
            # TODO(synk): HF BERT uses erf-gelu; tanh approximation differs slightly.
            ffn = jax.nn.gelu(ffn, approximate=True)
            ffn = mm(ffn.astype(bf16), wb + WL_W2) + F(fb + FL_B2)
            h = _layernorm(ffn + h, F(fb + FL_LN2_G), F(fb + FL_LN2_B))

        # ---- MLM head + vocab decoder + cross-entropy (logits stay in VMEM) ----
        mlm = mm(h.astype(bf16), WB_MLM_DENSE) + F(FR_MLM_DENSE_B)
        mlm = jax.nn.gelu(mlm, approximate=True)
        mlm = _layernorm(mlm, F(FR_MLM_LN_G), F(FR_MLM_LN_B))
        logits = mm(mlm.astype(bf16), WB_DEC) + F(FR_DEC_B)   # pad lanes = -1e30
        logits_ref[...] = logits.astype(logits_ref.dtype)     # lane-dense store

        lmax = jnp.max(logits, axis=-1, keepdims=True)
        lse = lmax + jnp.log(jnp.sum(jnp.exp(logits - lmax),
                                     axis=-1, keepdims=True))
        tgt = jnp.sum(jnp.where(lane_iota == labels, logits, 0.0),
                      axis=-1, keepdims=True)
        # TODO(synk): CrossEntropyLoss ignore_index(-100)/padding masking not
        # applied (labels here never contain -100, matching reference behaviour).
        loss_ref[...] = jnp.sum(lse - tgt, axis=0, keepdims=True) * (1.0 / m)

    return kernel


# ----------------------------- parameters ------------------------------------
def init_params(key):
    keys = iter(jax.random.split(key, 128))

    def dense(shape):
        return jax.random.normal(next(keys), shape, jnp.float32) * 0.02

    def zeros(shape):
        return jnp.zeros(shape, jnp.float32)

    def ones(shape):
        return jnp.ones(shape, jnp.float32)

    params = {
        # FusionBertEmbeddings
        "word_emb": dense((VOCAB, HIDDEN)),
        "pos_emb": dense((SEQ, HIDDEN)),
        "type_emb": dense((2, HIDDEN)),
        "pinyin_char_emb": dense((PINYIN_VOCAB, PINYIN_EMB)),
        "pinyin_conv_w": dense((2 * PINYIN_EMB, HIDDEN)),  # Conv1d(k=2) flattened
        "pinyin_conv_b": zeros((HIDDEN,)),
        "glyph_table": dense((VOCAB, GLYPH_DIM)),
        "glyph_map_w": dense((GLYPH_DIM, HIDDEN)),
        "glyph_map_b": zeros((HIDDEN,)),
        "map_fc_w": dense((3 * HIDDEN, HIDDEN)),
        "map_fc_b": zeros((HIDDEN,)),
        "emb_ln_g": ones((HIDDEN,)),
        "emb_ln_b": zeros((HIDDEN,)),
        # MLM head
        "mlm_dense_w": dense((HIDDEN, HIDDEN)),
        "mlm_dense_b": zeros((HIDDEN,)),
        "mlm_ln_g": ones((HIDDEN,)),
        "mlm_ln_b": zeros((HIDDEN,)),
        "dec_w": dense((HIDDEN, VOCAB)),
        "dec_b": zeros((VOCAB,)),
        "layers": [],
    }
    for _ in range(NUM_LAYERS):
        params["layers"].append({
            "wq": dense((HIDDEN, HIDDEN)), "bq": zeros((HIDDEN,)),
            "wk": dense((HIDDEN, HIDDEN)), "bk": zeros((HIDDEN,)),
            "wv": dense((HIDDEN, HIDDEN)), "bv": zeros((HIDDEN,)),
            "wo": dense((HIDDEN, HIDDEN)), "bo": zeros((HIDDEN,)),
            "ln1_g": ones((HIDDEN,)), "ln1_b": zeros((HIDDEN,)),
            "w1": dense((HIDDEN, INTERMEDIATE)), "b1": zeros((INTERMEDIATE,)),
            "w2": dense((INTERMEDIATE, HIDDEN)), "b2": zeros((HIDDEN,)),
            "ln2_g": ones((HIDDEN,)), "ln2_b": zeros((HIDDEN,)),
        })
    return params


# ----------------------------- host-side weight packing -----------------------
def _pad_block(x, fill=0.0):
    x = jnp.asarray(x, jnp.float32)
    r, c = x.shape
    out = jnp.full((LANE, LANE), fill, jnp.float32)
    return out.at[:r, :c].set(x)


def _row(v, fill=0.0):
    v = jnp.asarray(v, jnp.float32).reshape(-1)
    out = jnp.full((LANE,), fill, jnp.float32)
    return out.at[:v.shape[0]].set(v)[None, :]


def pack_params(params, bs, length):
    """Pack all weights into 3 lane-dense slabs (bf16 blocks, bf16 QKV, f32 rows)."""
    m = bs * length

    # bf16 (128,128) weight blocks
    wblocks = [None] * WB_TOTAL
    wblocks[WB_WORD] = _pad_block(params["word_emb"])
    wblocks[WB_GLYPH_TAB] = _pad_block(params["glyph_table"])
    wblocks[WB_GLYPH_MAP] = _pad_block(params["glyph_map_w"])
    wblocks[WB_PIN_CHAR] = _pad_block(params["pinyin_char_emb"])
    wblocks[WB_PIN_CONV_A] = _pad_block(params["pinyin_conv_w"][:PINYIN_EMB])
    wblocks[WB_PIN_CONV_B] = _pad_block(params["pinyin_conv_w"][PINYIN_EMB:])
    mfc = params["map_fc_w"]
    wblocks[WB_MFC_WORD] = _pad_block(mfc[0 * HIDDEN:1 * HIDDEN])
    wblocks[WB_MFC_PIN] = _pad_block(mfc[1 * HIDDEN:2 * HIDDEN])
    wblocks[WB_MFC_GLY] = _pad_block(mfc[2 * HIDDEN:3 * HIDDEN])
    for l, lyr in enumerate(params["layers"]):
        base = WB_LAYER0 + l * WB_PER_LAYER
        for hd in range(NUM_HEADS):
            sl = slice(hd * HEAD_DIM, (hd + 1) * HEAD_DIM)
            wblocks[base + WL_WO + hd] = _pad_block(lyr["wo"][sl, :])
        wblocks[base + WL_W1] = _pad_block(lyr["w1"])
        wblocks[base + WL_W2] = _pad_block(lyr["w2"])
    wblocks[WB_MLM_DENSE] = _pad_block(params["mlm_dense_w"])
    wblocks[WB_DEC] = _pad_block(params["dec_w"])
    wslab = jnp.concatenate(wblocks, axis=0).astype(jnp.bfloat16)

    # fused per-layer QKV slab: each head's Q/K/V starts on a 128-lane boundary.
    qkv_blocks = []
    for lyr in params["layers"]:
        blk = jnp.zeros((LANE, 3 * NUM_HEADS * LANE), jnp.float32)
        for hd in range(NUM_HEADS):
            sl = slice(hd * HEAD_DIM, (hd + 1) * HEAD_DIM)
            for p, wname in enumerate(("wq", "wk", "wv")):
                c0 = (hd * 3 + p) * LANE
                blk = blk.at[:HIDDEN, c0:c0 + HEAD_DIM].set(lyr[wname][:, sl])
        qkv_blocks.append(blk)
    qkvslab = jnp.concatenate(qkv_blocks, axis=0).astype(jnp.bfloat16)

    # f32 row slab (biases / LN params / decoder bias / tiled pos+type)
    zero_row = jnp.zeros((1, LANE), jnp.float32)
    frows = [zero_row] * FR_POS_TYPE
    frows[FR_PIN_B] = _row(params["pinyin_conv_b"])
    frows[FR_GLYPH_MAP_B] = _row(params["glyph_map_b"])
    frows[FR_MFC_B] = _row(params["map_fc_b"])
    frows[FR_EMB_LN_G] = _row(params["emb_ln_g"])
    frows[FR_EMB_LN_B] = _row(params["emb_ln_b"])
    for l, lyr in enumerate(params["layers"]):
        fb = FR_LAYER0 + l * FR_PER_LAYER
        for hd in range(NUM_HEADS):
            sl = slice(hd * HEAD_DIM, (hd + 1) * HEAD_DIM)
            frows[fb + FL_BQ + hd] = _row(lyr["bq"][sl])
            frows[fb + FL_BK + hd] = _row(lyr["bk"][sl])
            frows[fb + FL_BV + hd] = _row(lyr["bv"][sl])
        frows[fb + FL_BO] = _row(lyr["bo"])
        frows[fb + FL_LN1_G] = _row(lyr["ln1_g"])
        frows[fb + FL_LN1_B] = _row(lyr["ln1_b"])
        frows[fb + FL_B1] = _row(lyr["b1"])
        frows[fb + FL_B2] = _row(lyr["b2"])
        frows[fb + FL_LN2_G] = _row(lyr["ln2_g"])
        frows[fb + FL_LN2_B] = _row(lyr["ln2_b"])
    frows[FR_MLM_DENSE_B] = _row(params["mlm_dense_b"])
    frows[FR_MLM_LN_G] = _row(params["mlm_ln_g"])
    frows[FR_MLM_LN_B] = _row(params["mlm_ln_b"])
    frows[FR_DEC_B] = _row(params["dec_b"], fill=NEG_INF)   # keeps lse/argmax exact

    # pos + token-type(0) embeddings, padded to 128 lanes, tiled batch-major.
    pos_type = params["pos_emb"][:length] + params["type_emb"][0:1]   # (length, H)
    pos_type_p = jnp.zeros((length, LANE), jnp.float32).at[:, :HIDDEN].set(pos_type)
    pos_type_tiled = jnp.tile(pos_type_p, (bs, 1))                    # (m, 128)

    fslab = jnp.concatenate(frows + [pos_type_tiled], axis=0)         # (FR_POS_TYPE+m,128)
    assert fslab.shape[0] == FR_POS_TYPE + m
    return {"wslab": wslab, "qkvslab": qkvslab, "fslab": fslab}


# ----------------------------- forward pass -----------------------------------
def forward(packed, error_input_ids, error_pinyin_ids, error_masks,
            correct_input_ids):
    bs, length = error_input_ids.shape
    m = bs * length

    # mirrors: error_pinyin_ids.view(bs, length, 8); re-ordered slot-major so the
    # Conv1d(k=2) window shift is a sublane-aligned row offset inside the kernel.
    pin3 = error_pinyin_ids.reshape(bs, length, PINYIN_LEN)
    pin_slot_major = jnp.transpose(pin3, (2, 0, 1)).reshape(PINYIN_LEN * m, 1)

    ids = error_input_ids.reshape(m, 1)
    labels = correct_input_ids.reshape(m, 1)
    int_ids = jnp.concatenate([ids, labels, pin_slot_major],
                              axis=0).astype(jnp.int32)               # (10m, 1)
    mask_add = (error_masks.reshape(bs, 1, length).astype(jnp.float32)
                - 1.0) * 1e9                                          # additive mask

    logits_pad, loss = pl.pallas_call(
        _make_kernel(bs, length),
        out_shape=(jax.ShapeDtypeStruct((m, LANE), jnp.float32),      # lane-dense
                   jax.ShapeDtypeStruct((1, 1), jnp.float32)),
        in_specs=[pl.BlockSpec(memory_space=_VMEM)] * 5,
        out_specs=(pl.BlockSpec(memory_space=_VMEM),
                   pl.BlockSpec(memory_space=_VMEM)),
    )(int_ids, mask_add, packed["wslab"], packed["qkvslab"], packed["fslab"])

    logits = logits_pad[:, :VOCAB].reshape(bs, length, VOCAB)
    # numerical part of ids_prob_2_str (argmax over vocab)
    predict_ids = jnp.argmax(logits, axis=-1)
    # TODO(synk): tokenizer.convert_ids_to_tokens / string joining is host-side
    # Python with a vocabulary file; no Pallas/JAX equivalent.
    return {"loss": loss[0, 0], "logits": logits, "predict_ids": predict_ids}


# ----------------------------- main -------------------------------------------
if __name__ == "__main__":
    root = jax.random.PRNGKey(0)
    k_params, k_err, k_pin, k_corr = jax.random.split(root, 4)

    params = init_params(k_params)
    packed = pack_params(params, BATCH, SEQ)   # one-time host-side weight packing

    # batch dict analogue (ids already on device)
    error_input_ids = jax.random.randint(k_err, (BATCH, SEQ), 0, VOCAB,
                                         dtype=jnp.int32)
    error_pinyin_ids = jax.random.randint(k_pin, (BATCH, SEQ * PINYIN_LEN), 0,
                                          PINYIN_VOCAB, dtype=jnp.int32)
    error_masks = jnp.ones((BATCH, SEQ), jnp.float32)
    correct_input_ids = jax.random.randint(k_corr, (BATCH, SEQ), 0, VOCAB,
                                           dtype=jnp.int32)

    fwd = jax.jit(forward)
    outputs = fwd(packed, error_input_ids, error_pinyin_ids, error_masks,
                  correct_input_ids)
    jax.block_until_ready(outputs)

    assert outputs["logits"].shape == (BATCH, SEQ, VOCAB)
    assert outputs["predict_ids"].shape == (BATCH, SEQ)
    assert outputs["loss"].shape == ()
    assert bool(jnp.isfinite(outputs["loss"]))
    assert bool(jnp.all(jnp.isfinite(outputs["logits"])))
    print("KERNEL_OK")
</pallas_src>

<mosaic_0001>
module attributes {stable_mosaic.version = 11 : i64} {
  func.func @kernel(%arg0: memref<160x1xi32, #tpu.memory_space<vmem>>, %arg1: memref<2x1x8xf32, #tpu.memory_space<vmem>>, %arg2: memref<2432x128xbf16, #tpu.memory_space<vmem>>, %arg3: memref<256x768xbf16, #tpu.memory_space<vmem>>, %arg4: memref<56x128xf32, #tpu.memory_space<vmem>>, %arg5: memref<16x128xf32, #tpu.memory_space<vmem>>, %arg6: memref<1x1xf32, #tpu.memory_space<vmem>>) attributes {dimension_semantics = [], scalar_prefetch = 0 : i64, scratch_operands = 0 : i64, tpu.core_type = #tpu.core_type<tc>} {
    %c0 = arith.constant 0 : index
    %c0_0 = arith.constant 0 : index
    %0 = vector.load %arg4[%c0, %c0_0] : memref<56x128xf32, #tpu.memory_space<vmem>>, vector<56x128xf32>
    %c0_1 = arith.constant 0 : index
    %c0_2 = arith.constant 0 : index
    %1 = vector.load %arg0[%c0_1, %c0_2] : memref<160x1xi32, #tpu.memory_space<vmem>>, vector<160x1xi32>
    %2 = vector.extract_strided_slice %1 {offsets = [0, 0], sizes = [16, 1], strides = [1, 1]} : vector<160x1xi32> to vector<16x1xi32>
    %3 = vector.extract_strided_slice %1 {offsets = [16, 0], sizes = [16, 1], strides = [1, 1]} : vector<160x1xi32> to vector<16x1xi32>
    %4 = vector.extract_strided_slice %1 {offsets = [32, 0], sizes = [128, 1], strides = [1, 1]} : vector<160x1xi32> to vector<128x1xi32>
    %c0_3 = arith.constant 0 : index
    %c0_4 = arith.constant 0 : index
    %c0_5 = arith.constant 0 : index
    %5 = vector.load %arg1[%c0_3, %c0_4, %c0_5] : memref<2x1x8xf32, #tpu.memory_space<vmem>>, vector<2x1x8xf32>
    %6 = tpu.iota {dimensions = array<i32: 1>} : vector<16x128xi32>
    %7 = vector.broadcast %2 : vector<16x1xi32> to vector<16x128xi32>
    %8 = arith.cmpi eq, %6, %7 : vector<16x128xi32>
    %9 = arith.extui %8 : vector<16x128xi1> to vector<16x128xi32>
    %10 = arith.sitofp %9 : vector<16x128xi32> to vector<16x128xf32>
    %11 = arith.truncf %10 : vector<16x128xf32> to vector<16x128xbf16>
    %c0_6 = arith.constant 0 : index
    %c0_7 = arith.constant 0 : index
    %12 = vector.load %arg2[%c0_6, %c0_7] : memref<2432x128xbf16, #tpu.memory_space<vmem>>, vector<128x128xbf16>
    %cst = arith.constant dense<0.000000e+00> : vector<16x128xf32>
    %13 = tpu.matmul %11, %12, %cst {dimension_numbers = #tpu.dot_dimension_numbers<[1], [0], [0], [1], [0, 0, 1, 1], [], []>} : vector<16x128xbf16>, vector<128x128xbf16>, vector<16x128xf32> -> vector<16x128xf32>
    %c128 = arith.constant 128 : index
    %c0_8 = arith.constant 0 : index
    %14 = vector.load %arg2[%c128, %c0_8] : memref<2432x128xbf16, #tpu.memory_space<vmem>>, vector<128x128xbf16>
    %cst_9 = arith.constant dense<0.000000e+00> : vector<16x128xf32>
    %15 = tpu.matmul %11, %14, %cst_9 {dimension_numbers = #tpu.dot_dimension_numbers<[1], [0], [0], [1], [0, 0, 1, 1], [], []>} : vector<16x128xbf16>, vector<128x128xbf16>, vector<16x128xf32> -> vector<16x128xf32>
    %16 = arith.truncf %15 : vector<16x128xf32> to vector<16x128xbf16>
    %c256 = arith.constant 256 : index
    %c0_10 = arith.constant 0 : index
    %17 = vector.load %arg2[%c256, %c0_10] : memref<2432x128xbf16, #tpu.memory_space<vmem>>, vector<128x128xbf16>
    %cst_11 = arith.constant dense<0.000000e+00> : vector<16x128xf32>
    %18 = tpu.matmul %16, %17, %cst_11 {dimension_numbers = #tpu.dot_dimension_numbers<[1], [0], [0], [1], [0, 0, 1, 1], [], []>} : vector<16x128xbf16>, vector<128x128xbf16>, vector<16x128xf32> -> vector<16x128xf32>
    %19 = vector.extract_strided_slice %0 {offsets = [1, 0], sizes = [1, 128], strides = [1, 1]} : vector<56x128xf32> to vector<1x128xf32>
    %20 = vector.broadcast %19 : vector<1x128xf32> to vector<16x128xf32>
    %21 = arith.addf %18, %20 : vector<16x128xf32>
    %22 = tpu.iota {dimensions = array<i32: 1>} : vector<128x128xi32>
    %23 = vector.broadcast %4 : vector<128x1xi32> to vector<128x128xi32>
    %24 = arith.cmpi eq, %22, %23 : vector<128x128xi32>
    %25 = arith.extui %24 : vector<128x128xi1> to vector<128x128xi32>
    %26 = arith.sitofp %25 : vector<128x128xi32> to vector<128x128xf32>
    %27 = arith.truncf %26 : vector<128x128xf32> to vector<128x128xbf16>
    %c384 = arith.constant 384 : index
    %c0_12 = arith.constant 0 : index
    %28 = vector.load %arg2[%c384, %c0_12] : memref<2432x128xbf16, #tpu.memory_space<vmem>>, vector<128x128xbf16>
    %cst_13 = arith.constant dense<0.000000e+00> : vector<128x128xf32>
    %29 = tpu.matmul %27, %28, %cst_13 {dimension_numbers = #tpu.dot_dimension_numbers<[1], [0], [0], [1], [0, 0, 1, 1], [], []>} : vector<128x128xbf16>, vector<128x128xbf16>, vector<128x128xf32> -> vector<128x128xf32>
    %30 = arith.truncf %29 : vector<128x128xf32> to vector<128x128xbf16>
    %c512 = arith.constant 512 : index
    %c0_14 = arith.constant 0 : index
    %31 = vector.load %arg2[%c512, %c0_14] : memref<2432x128xbf16, #tpu.memory_space<vmem>>, vector<128x128xbf16>
    %cst_15 = arith.constant dense<0.000000e+00> : vector<128x128xf32>
    %32 = tpu.matmul %30, %31, %cst_15 {dimension_numbers = #tpu.dot_dimension_numbers<[1], [0], [0], [1], [0, 0, 1, 1], [], []>} : vector<128x128xbf16>, vector<128x128xbf16>, vector<128x128xf32> -> vector<128x128xf32>
    %c640 = arith.constant 640 : index
    %c0_16 = arith.constant 0 : index
    %33 = vector.load %arg2[%c640, %c0_16] : memref<2432x128xbf16, #tpu.memory_space<vmem>>, vector<128x128xbf16>
    %cst_17 = arith.constant dense<0.000000e+00> : vector<128x128xf32>
    %34 = tpu.matmul %30, %33, %cst_17 {dimension_numbers = #tpu.dot_dimension_numbers<[1], [0], [0], [1], [0, 0, 1, 1], [], []>} : vector<128x128xbf16>, vector<128x128xbf16>, vector<128x128xf32> -> vector<128x128xf32>
    %35 = vector.extract_strided_slice %0 {offsets = [0, 0], sizes = [1, 128], strides = [1, 1]} : vector<56x128xf32> to vector<1x128xf32>
    %36 = vector.extract_strided_slice %32 {offsets = [0, 0], sizes = [16, 128], strides = [1, 1]} : vector<128x128xf32> to vector<16x128xf32>
    %37 = vector.extract_strided_slice %34 {offsets = [16, 0], sizes = [16, 128], strides = [1, 1]} : vector<128x128xf32> to vector<16x128xf32>
    %38 = arith.addf %36, %37 : vector<16x128xf32>
    %39 = vector.broadcast %35 : vector<1x128xf32> to vector<16x128xf32>
    %40 = arith.addf %38, %39 : vector<16x128xf32>
    %41 = vector.extract_strided_slice %32 {offsets = [16, 0], sizes = [16, 128], strides = [1, 1]} : vector<128x128xf32> to vector<16x128xf32>
    %42 = vector.extract_strided_slice %34 {offsets = [32, 0], sizes = [16, 128], strides = [1, 1]} : vector<128x128xf32> to vector<16x128xf32>
    %43 = arith.addf %41, %42 : vector<16x128xf32>
    %44 = vector.broadcast %35 : vector<1x128xf32> to vector<16x128xf32>
    %45 = arith.addf %43, %44 : vector<16x128xf32>
    %46 = arith.maximumf %40, %45 : vector<16x128xf32>
    %47 = vector.extract_strided_slice %32 {offsets = [32, 0], sizes = [16, 128], strides = [1, 1]} : vector<128x128xf32> to vector<16x128xf32>
    %48 = vector.extract_strided_slice %34 {offsets = [48, 0], sizes = [16, 128], strides = [1, 1]} : vector<128x128xf32> to vector<16x128xf32>
    %49 = arith.addf %47, %48 : vector<16x128xf32>
    %50 = vector.broadcast %35 : vector<1x128xf32> to vector<16x128xf32>
    %51 = arith.addf %49, %50 : vector<16x128xf32>
    %52 = arith.maximumf %46, %51 : vector<16x128xf32>
    %53 = vector.extract_strided_slice %32 {offsets = [48, 0], sizes = [16, 128], strides = [1, 1]} : vector<128x128xf32> to vector<16x128xf32>
    %54 = vector.extract_strided_slice %34 {offsets = [64, 0], sizes = [16, 128], strides = [1, 1]} : vector<128x128xf32> to vector<16x128xf32>
    %55 = arith.addf %53, %54 : vector<16x128xf32>
    %56 = vector.broadcast %35 : vector<1x128xf32> to vector<16x128xf32>
    %57 = arith.addf %55, %56 : vector<16x128xf32>
    %58 = arith.maximumf %52, %57 : vector<16x128xf32>
    %59 = vector.extract_strided_slice %32 {offsets = [64, 0], sizes = [16, 128], strides = [1, 1]} : vector<128x128xf32> to vector<16x128xf32>
    %60 = vector.extract_strided_slice %34 {offsets = [80, 0], sizes = [16, 128], strides = [1, 1]} : vector<128x128xf32> to vector<16x128xf32>
    %61 = arith.addf %59, %60 : vector<16x128xf32>
    %62 = vector.broadcast %35 : vector<1x128xf32> to vector<16x128xf32>
    %63 = arith.addf %61, %62 : vector<16x128xf32>
    %64 = arith.maximumf %58, %63 : vector<16x128xf32>
    %65 = vector.extract_strided_slice %32 {offsets = [80, 0], sizes = [16, 128], strides = [1, 1]} : vector<128x128xf32> to vector<16x128xf32>
    %66 = vector.extract_strided_slice %34 {offsets = [96, 0], sizes = [16, 128], strides = [1, 1]} : vector<128x128xf32> to vector<16x128xf32>
    %67 = arith.addf %65, %66 : vector<16x128xf32>
    %68 = vector.broadcast %35 : vector<1x128xf32> to vector<16x128xf32>
    %69 = arith.addf %67, %68 : vector<16x128xf32>
    %70 = arith.maximumf %64, %69 : vector<16x128xf32>
    %71 = vector.extract_strided_slice %32 {offsets = [96, 0], sizes = [16, 128], strides = [1, 1]} : vector<128x128xf32> to vector<16x128xf32>
    %72 = vector.extract_strided_slice %34 {offsets = [112, 0], sizes = [16, 128], strides = [1, 1]} : vector<128x128xf32> to vector<16x128xf32>
    %73 = arith.addf %71, %72 : vector<16x128xf32>
    %74 = vector.broadcast %35 : vector<1x128xf32> to vector<16x128xf32>
    %75 = arith.addf %73, %74 : vector<16x128xf32>
    %76 = arith.maximumf %70, %75 : vector<16x128xf32>
    %77 = arith.truncf %13 : vector<16x128xf32> to vector<16x128xbf16>
    %c768 = arith.constant 768 : index
    %c0_18 = arith.constant 0 : index
    %78 = vector.load %arg2[%c768, %c0_18] : memref<2432x128xbf16, #tpu.memory_space<vmem>>, vector<128x128xbf16>
    %cst_19 = arith.constant dense<0.000000e+00> : vector<16x128xf32>
    %79 = tpu.matmul %77, %78, %cst_19 {dimension_numbers = #tpu.dot_dimension_numbers<[1], [0], [0], [1], [0, 0, 1, 1], [], []>} : vector<16x128xbf16>, vector<128x128xbf16>, vector<16x128xf32> -> vector<16x128xf32>
    %80 = arith.truncf %76 : vector<16x128xf32> to vector<16x128xbf16>
    %c896 = arith.constant 896 : index
    %c0_20 = arith.constant 0 : index
    %81 = vector.load %arg2[%c896, %c0_20] : memref<2432x128xbf16, #tpu.memory_space<vmem>>, vector<128x128xbf16>
    %cst_21 = arith.constant dense<0.000000e+00> : vector<16x128xf32>
    %82 = tpu.matmul %80, %81, %cst_21 {dimension_numbers = #tpu.dot_dimension_numbers<[1], [0], [0], [1], [0, 0, 1, 1], [], []>} : vector<16x128xbf16>, vector<128x128xbf16>, vector<16x128xf32> -> vector<16x128xf32>
    %83 = arith.addf %79, %82 : vector<16x128xf32>
    %84 = arith.truncf %21 : vector<16x128xf32> to vector<16x128xbf16>
    %c1024 = arith.constant 1024 : index
    %c0_22 = arith.constant 0 : index
    %85 = vector.load %arg2[%c1024, %c0_22] : memref<2432x128xbf16, #tpu.memory_space<vmem>>, vector<128x128xbf16>
    %cst_23 = arith.constant dense<0.000000e+00> : vector<16x128xf32>
    %86 = tpu.matmul %84, %85, %cst_23 {dimension_numbers = #tpu.dot_dimension_numbers<[1], [0], [0], [1], [0, 0, 1, 1], [], []>} : vector<16x128xbf16>, vector<128x128xbf16>, vector<16x128xf32> -> vector<16x128xf32>
    %87 = arith.addf %83, %86 : vector<16x128xf32>
    %88 = vector.extract_strided_slice %0 {offsets = [2, 0], sizes = [1, 128], strides = [1, 1]} : vector<56x128xf32> to vector<1x128xf32>
    %89 = vector.broadcast %88 : vector<1x128xf32> to vector<16x128xf32>
    %90 = arith.addf %87, %89 : vector<16x128xf32>
    %91 = vector.extract_strided_slice %0 {offsets = [40, 0], sizes = [16, 128], strides = [1, 1]} : vector<56x128xf32> to vector<16x128xf32>
    %92 = arith.addf %90, %91 : vector<16x128xf32>
    %93 = vector.extract_strided_slice %0 {offsets = [3, 0], sizes = [1, 128], strides = [1, 1]} : vector<56x128xf32> to vector<1x128xf32>
    %94 = vector.extract_strided_slice %0 {offsets = [4, 0], sizes = [1, 128], strides = [1, 1]} : vector<56x128xf32> to vector<1x128xf32>
    %cst_24 = arith.constant dense<0.000000e+00> : vector<16xf32>
    %95 = vector.multi_reduction <add>, %92, %cst_24 [1] : vector<16x128xf32> to vector<16xf32>
    %96 = vector.shape_cast %95 : vector<16xf32> to vector<16x1xf32>
    %cst_25 = arith.constant 3.125000e-02 : f32
    %97 = vector.broadcast %cst_25 : f32 to vector<16x1xf32>
    %98 = arith.mulf %96, %97 : vector<16x1xf32>
    %99 = arith.mulf %92, %92 : vector<16x128xf32>
    %cst_26 = arith.constant dense<0.000000e+00> : vector<16xf32>
    %100 = vector.multi_reduction <add>, %99, %cst_26 [1] : vector<16x128xf32> to vector<16xf32>
    %101 = vector.shape_cast %100 : vector<16xf32> to vector<16x1xf32>
    %cst_27 = arith.constant 3.125000e-02 : f32
    %102 = vector.broadcast %cst_27 : f32 to vector<16x1xf32>
    %103 = arith.mulf %101, %102 : vector<16x1xf32>
    %104 = arith.mulf %98, %98 : vector<16x1xf32>
    %105 = arith.subf %103, %104 : vector<16x1xf32>
    %cst_28 = arith.constant 0.000000e+00 : f32
    %106 = vector.broadcast %cst_28 : f32 to vector<16x1xf32>
    %107 = arith.maximumf %105, %106 : vector<16x1xf32>
    %108 = vector.broadcast %98 : vector<16x1xf32> to vector<16x128xf32>
    %109 = arith.subf %92, %108 : vector<16x128xf32>
    %cst_29 = arith.constant 9.99999996E-13 : f32
    %110 = vector.broadcast %cst_29 : f32 to vector<16x1xf32>
    %111 = arith.addf %107, %110 : vector<16x1xf32>
    %112 = math.rsqrt %111 : vector<16x1xf32>
    %113 = vector.broadcast %112 : vector<16x1xf32> to vector<16x128xf32>
    %114 = arith.mulf %109, %113 : vector<16x128xf32>
    %115 = vector.broadcast %93 : vector<1x128xf32> to vector<16x128xf32>
    %116 = arith.mulf %114, %115 : vector<16x128xf32>
    %117 = vector.broadcast %94 : vector<1x128xf32> to vector<16x128xf32>
    %118 = arith.addf %116, %117 : vector<16x128xf32>
    %119 = arith.truncf %118 : vector<16x128xf32> to vector<16x128xbf16>
    %c0_30 = arith.constant 0 : index
    %c0_31 = arith.constant 0 : index
    %120 = vector.load %arg3[%c0_30, %c0_31] : memref<256x768xbf16, #tpu.memory_space<vmem>>, vector<128x768xbf16>
    %cst_32 = arith.constant dense<0.000000e+00> : vector<16x768xf32>
    %121 = tpu.matmul %119, %120, %cst_32 {dimension_numbers = #tpu.dot_dimension_numbers<[1], [0], [0], [1], [0, 0, 1, 1], [], []>} : vector<16x128xbf16>, vector<128x768xbf16>, vector<16x768xf32> -> vector<16x768xf32>
    %122 = vector.extract_strided_slice %121 {offsets = [0, 0], sizes = [16, 128], strides = [1, 1]} : vector<16x768xf32> to vector<16x128xf32>
    %123 = vector.extract_strided_slice %0 {offsets = [5, 0], sizes = [1, 128], strides = [1, 1]} : vector<56x128xf32> to vector<1x128xf32>
    %124 = vector.broadcast %123 : vector<1x128xf32> to vector<16x128xf32>
    %125 = arith.addf %122, %124 : vector<16x128xf32>
    %126 = vector.extract_strided_slice %121 {offsets = [0, 128], sizes = [16, 128], strides = [1, 1]} : vector<16x768xf32> to vector<16x128xf32>
    %127 = vector.extract_strided_slice %0 {offsets = [7, 0], sizes = [1, 128], strides = [1, 1]} : vector<56x128xf32> to vector<1x128xf32>
    %128 = vector.broadcast %127 : vector<1x128xf32> to vector<16x128xf32>
    %129 = arith.addf %126, %128 : vector<16x128xf32>
    %130 = vector.extract_strided_slice %121 {offsets = [0, 256], sizes = [16, 128], strides = [1, 1]} : vector<16x768xf32> to vector<16x128xf32>
    %131 = vector.extract_strided_slice %0 {offsets = [9, 0], sizes = [1, 128], strides = [1, 1]} : vector<56x128xf32> to vector<1x128xf32>
    %132 = vector.broadcast %131 : vector<1x128xf32> to vector<16x128xf32>
    %133 = arith.addf %130, %132 : vector<16x128xf32>
    %134 = vector.shape_cast %125 : vector<16x128xf32> to vector<2x8x128xf32>
    %135 = arith.truncf %134 : vector<2x8x128xf32> to vector<2x8x128xbf16>
    %136 = vector.shape_cast %129 : vector<16x128xf32> to vector<2x8x128xf32>
    %137 = arith.truncf %136 : vector<2x8x128xf32> to vector<2x8x128xbf16>
    %138 = vector.shape_cast %133 : vector<16x128xf32> to vector<2x8x128xf32>
    %139 = arith.truncf %138 : vector<2x8x128xf32> to vector<2x8x128xbf16>
    "tpu.trace_start"() <{level = 10 : i32, message = "bqd,bkd->bqk"}> : () -> ()
    %cst_33 = arith.constant dense<0.000000e+00> : vector<2x8x8xf32>
    %140 = tpu.matmul %135, %137, %cst_33 {dimension_numbers = #tpu.dot_dimension_numbers<[2], [2], [1], [1], [0, 0, 0, 1, 1, 1], [0], [0]>} : vector<2x8x128xbf16>, vector<2x8x128xbf16>, vector<2x8x8xf32> -> vector<2x8x8xf32>
    "tpu.trace_stop"() : () -> ()
    %cst_34 = arith.constant 2.500000e-01 : f32
    %141 = vector.broadcast %cst_34 : f32 to vector<2x8x8xf32>
    %142 = arith.mulf %140, %141 : vector<2x8x8xf32>
    %143 = vector.broadcast %5 : vector<2x1x8xf32> to vector<2x8x8xf32>
    %144 = arith.addf %142, %143 : vector<2x8x8xf32>
    %cst_35 = arith.constant dense<0xFF800000> : vector<2x8xf32>
    %145 = vector.multi_reduction <maximumf>, %144, %cst_35 [2] : vector<2x8x8xf32> to vector<2x8xf32>
    %146 = vector.shape_cast %145 : vector<2x8xf32> to vector<2x8x1xf32>
    %147 = vector.broadcast %146 : vector<2x8x1xf32> to vector<2x8x8xf32>
    %148 = arith.subf %144, %147 : vector<2x8x8xf32>
    %149 = math.exp %148 : vector<2x8x8xf32>
    %cst_36 = arith.constant dense<0.000000e+00> : vector<2x8xf32>
    %150 = vector.multi_reduction <add>, %149, %cst_36 [2] : vector<2x8x8xf32> to vector<2x8xf32>
    %151 = vector.shape_cast %150 : vector<2x8xf32> to vector<2x8x1xf32>
    %152 = tpu.reciprocal %151 {approx = true} : vector<2x8x1xf32> -> vector<2x8x1xf32>
    %153 = vector.broadcast %152 : vector<2x8x1xf32> to vector<2x8x8xf32>
    %154 = arith.mulf %149, %153 : vector<2x8x8xf32>
    %155 = arith.truncf %154 : vector<2x8x8xf32> to vector<2x8x8xbf16>
    "tpu.trace_start"() <{level = 10 : i32, message = "bqk,bkd->bqd"}> : () -> ()
    %cst_37 = arith.constant dense<0.000000e+00> : vector<2x8x128xf32>
    %156 = tpu.matmul %155, %139, %cst_37 {dimension_numbers = #tpu.dot_dimension_numbers<[2], [1], [1], [2], [0, 0, 0, 1, 1, 2], [0], [0]>} : vector<2x8x8xbf16>, vector<2x8x128xbf16>, vector<2x8x128xf32> -> vector<2x8x128xf32>
    "tpu.trace_stop"() : () -> ()
    %157 = vector.shape_cast %156 : vector<2x8x128xf32> to vector<16x128xf32>
    %158 = arith.truncf %157 : vector<16x128xf32> to vector<16x128xbf16>
    %c1152 = arith.constant 1152 : index
    %c0_38 = arith.constant 0 : index
    %159 = vector.load %arg2[%c1152, %c0_38] : memref<2432x128xbf16, #tpu.memory_space<vmem>>, vector<128x128xbf16>
    %cst_39 = arith.constant dense<0.000000e+00> : vector<16x128xf32>
    %160 = tpu.matmul %158, %159, %cst_39 {dimension_numbers = #tpu.dot_dimension_numbers<[1], [0], [0], [1], [0, 0, 1, 1], [], []>} : vector<16x128xbf16>, vector<128x128xbf16>, vector<16x128xf32> -> vector<16x128xf32>
    %161 = vector.extract_strided_slice %121 {offsets = [0, 384], sizes = [16, 128], strides = [1, 1]} : vector<16x768xf32> to vector<16x128xf32>
    %162 = vector.extract_strided_slice %0 {offsets = [6, 0], sizes = [1, 128], strides = [1, 1]} : vector<56x128xf32> to vector<1x128xf32>
    %163 = vector.broadcast %162 : vector<1x128xf32> to vector<16x128xf32>
    %164 = arith.addf %161, %163 : vector<16x128xf32>
    %165 = vector.extract_strided_slice %121 {offsets = [0, 512], sizes = [16, 128], strides = [1, 1]} : vector<16x768xf32> to vector<16x128xf32>
    %166 = vector.extract_strided_slice %0 {offsets = [8, 0], sizes = [1, 128], strides = [1, 1]} : vector<56x128xf32> to vector<1x128xf32>
    %167 = vector.broadcast %166 : vector<1x128xf32> to vector<16x128xf32>
    %168 = arith.addf %165, %167 : vector<16x128xf32>
    %169 = vector.extract_strided_slice %121 {offsets = [0, 640], sizes = [16, 128], strides = [1, 1]} : vector<16x768xf32> to vector<16x128xf32>
    %170 = vector.extract_strided_slice %0 {offsets = [10, 0], sizes = [1, 128], strides = [1, 1]} : vector<56x128xf32> to vector<1x128xf32>
    %171 = vector.broadcast %170 : vector<1x128xf32> to vector<16x128xf32>
    %172 = arith.addf %169, %171 : vector<16x128xf32>
    %173 = vector.shape_cast %164 : vector<16x128xf32> to vector<2x8x128xf32>
    %174 = arith.truncf %173 : vector<2x8x128xf32> to vector<2x8x128xbf16>
    %175 = vector.shape_cast %168 : vector<16x128xf32> to vector<2x8x128xf32>
    %176 = arith.truncf %175 : vector<2x8x128xf32> to vector<2x8x128xbf16>
    %177 = vector.shape_cast %172 : vector<16x128xf32> to vector<2x8x128xf32>
    %178 = arith.truncf %177 : vector<2x8x128xf32> to vector<2x8x128xbf16>
    "tpu.trace_start"() <{level = 10 : i32, message = "bqd,bkd->bqk"}> : () -> ()
    %cst_40 = arith.constant dense<0.000000e+00> : vector<2x8x8xf32>
    %179 = tpu.matmul %174, %176, %cst_40 {dimension_numbers = #tpu.dot_dimension_numbers<[2], [2], [1], [1], [0, 0, 0, 1, 1, 1], [0], [0]>} : vector<2x8x128xbf16>, vector<2x8x128xbf16>, vector<2x8x8xf32> -> vector<2x8x8xf32>
    "tpu.trace_stop"() : () -> ()
    %cst_41 = arith.constant 2.500000e-01 : f32
    %180 = vector.broadcast %cst_41 : f32 to vector<2x8x8xf32>
    %181 = arith.mulf %179, %180 : vector<2x8x8xf32>
    %182 = vector.broadcast %5 : vector<2x1x8xf32> to vector<2x8x8xf32>
    %183 = arith.addf %181, %182 : vector<2x8x8xf32>
    %cst_42 = arith.constant dense<0xFF800000> : vector<2x8xf32>
    %184 = vector.multi_reduction <maximumf>, %183, %cst_42 [2] : vector<2x8x8xf32> to vector<2x8xf32>
    %185 = vector.shape_cast %184 : vector<2x8xf32> to vector<2x8x1xf32>
    %186 = vector.broadcast %185 : vector<2x8x1xf32> to vector<2x8x8xf32>
    %187 = arith.subf %183, %186 : vector<2x8x8xf32>
    %188 = math.exp %187 : vector<2x8x8xf32>
    %cst_43 = arith.constant dense<0.000000e+00> : vector<2x8xf32>
    %189 = vector.multi_reduction <add>, %188, %cst_43 [2] : vector<2x8x8xf32> to vector<2x8xf32>
    %190 = vector.shape_cast %189 : vector<2x8xf32> to vector<2x8x1xf32>
    %191 = tpu.reciprocal %190 {approx = true} : vector<2x8x1xf32> -> vector<2x8x1xf32>
    %192 = vector.broadcast %191 : vector<2x8x1xf32> to vector<2x8x8xf32>
    %193 = arith.mulf %188, %192 : vector<2x8x8xf32>
    %194 = arith.truncf %193 : vector<2x8x8xf32> to vector<2x8x8xbf16>
    "tpu.trace_start"() <{level = 10 : i32, message = "bqk,bkd->bqd"}> : () -> ()
    %cst_44 = arith.constant dense<0.000000e+00> : vector<2x8x128xf32>
    %195 = tpu.matmul %194, %178, %cst_44 {dimension_numbers = #tpu.dot_dimension_numbers<[2], [1], [1], [2], [0, 0, 0, 1, 1, 2], [0], [0]>} : vector<2x8x8xbf16>, vector<2x8x128xbf16>, vector<2x8x128xf32> -> vector<2x8x128xf32>
    "tpu.trace_stop"() : () -> ()
    %196 = vector.shape_cast %195 : vector<2x8x128xf32> to vector<16x128xf32>
    %197 = arith.truncf %196 : vector<16x128xf32> to vector<16x128xbf16>
    %c1280 = arith.constant 1280 : index
    %c0_45 = arith.constant 0 : index
    %198 = vector.load %arg2[%c1280, %c0_45] : memref<2432x128xbf16, #tpu.memory_space<vmem>>, vector<128x128xbf16>
    %cst_46 = arith.constant dense<0.000000e+00> : vector<16x128xf32>
    %199 = tpu.matmul %197, %198, %cst_46 {dimension_numbers = #tpu.dot_dimension_numbers<[1], [0], [0], [1], [0, 0, 1, 1], [], []>} : vector<16x128xbf16>, vector<128x128xbf16>, vector<16x128xf32> -> vector<16x128xf32>
    %200 = arith.addf %160, %199 : vector<16x128xf32>
    %201 = vector.extract_strided_slice %0 {offsets = [11, 0], sizes = [1, 128], strides = [1, 1]} : vector<56x128xf32> to vector<1x128xf32>
    %202 = vector.broadcast %201 : vector<1x128xf32> to vector<16x128xf32>
    %203 = arith.addf %200, %202 : vector<16x128xf32>
    %204 = arith.addf %203, %118 : vector<16x128xf32>
    %205 = vector.extract_strided_slice %0 {offsets = [12, 0], sizes = [1, 128], strides = [1, 1]} : vector<56x128xf32> to vector<1x128xf32>
    %206 = vector.extract_strided_slice %0 {offsets = [13, 0], sizes = [1, 128], strides = [1, 1]} : vector<56x128xf32> to vector<1x128xf32>
    %cst_47 = arith.constant dense<0.000000e+00> : vector<16xf32>
    %207 = vector.multi_reduction <add>, %204, %cst_47 [1] : vector<16x128xf32> to vector<16xf32>
    %208 = vector.shape_cast %207 : vector<16xf32> to vector<16x1xf32>
    %cst_48 = arith.constant 3.125000e-02 : f32
    %209 = vector.broadcast %cst_48 : f32 to vector<16x1xf32>
    %210 = arith.mulf %208, %209 : vector<16x1xf32>
    %211 = arith.mulf %204, %204 : vector<16x128xf32>
    %cst_49 = arith.constant dense<0.000000e+00> : vector<16xf32>
    %212 = vector.multi_reduction <add>, %211, %cst_49 [1] : vector<16x128xf32> to vector<16xf32>
    %213 = vector.shape_cast %212 : vector<16xf32> to vector<16x1xf32>
    %cst_50 = arith.constant 3.125000e-02 : f32
    %214 = vector.broadcast %cst_50 : f32 to vector<16x1xf32>
    %215 = arith.mulf %213, %214 : vector<16x1xf32>
    %216 = arith.mulf %210, %210 : vector<16x1xf32>
    %217 = arith.subf %215, %216 : vector<16x1xf32>
    %cst_51 = arith.constant 0.000000e+00 : f32
    %218 = vector.broadcast %cst_51 : f32 to vector<16x1xf32>
    %219 = arith.maximumf %217, %218 : vector<16x1xf32>
    %220 = vector.broadcast %210 : vector<16x1xf32> to vector<16x128xf32>
    %221 = arith.subf %204, %220 : vector<16x128xf32>
    %cst_52 = arith.constant 9.99999996E-13 : f32
    %222 = vector.broadcast %cst_52 : f32 to vector<16x1xf32>
    %223 = arith.addf %219, %222 : vector<16x1xf32>
    %224 = math.rsqrt %223 : vector<16x1xf32>
    %225 = vector.broadcast %224 : vector<16x1xf32> to vector<16x128xf32>
    %226 = arith.mulf %221, %225 : vector<16x128xf32>
    %227 = vector.broadcast %205 : vector<1x128xf32> to vector<16x128xf32>
    %228 = arith.mulf %226, %227 : vector<16x128xf32>
    %229 = vector.broadcast %206 : vector<1x128xf32> to vector<16x128xf32>
    %230 = arith.addf %228, %229 : vector<16x128xf32>
    %231 = arith.truncf %230 : vector<16x128xf32> to vector<16x128xbf16>
    %c1408 = arith.constant 1408 : index
    %c0_53 = arith.constant 0 : index
    %232 = vector.load %arg2[%c1408, %c0_53] : memref<2432x128xbf16, #tpu.memory_space<vmem>>, vector<128x128xbf16>
    %cst_54 = arith.constant dense<0.000000e+00> : vector<16x128xf32>
    %233 = tpu.matmul %231, %232, %cst_54 {dimension_numbers = #tpu.dot_dimension_numbers<[1], [0], [0], [1], [0, 0, 1, 1], [], []>} : vector<16x128xbf16>, vector<128x128xbf16>, vector<16x128xf32> -> vector<16x128xf32>
    %234 = vector.extract_strided_slice %0 {offsets = [14, 0], sizes = [1, 128], strides = [1, 1]} : vector<56x128xf32> to vector<1x128xf32>
    %235 = vector.broadcast %234 : vector<1x128xf32> to vector<16x128xf32>
    %236 = arith.addf %233, %235 : vector<16x128xf32>
    %237 = arith.mulf %236, %236 : vector<16x128xf32>
    %238 = arith.mulf %236, %237 : vector<16x128xf32>
    %cst_55 = arith.constant 4.471500e-02 : f32
    %239 = vector.broadcast %cst_55 : f32 to vector<16x128xf32>
    %240 = arith.mulf %239, %238 : vector<16x128xf32>
    %241 = arith.addf %236, %240 : vector<16x128xf32>
    %cst_56 = arith.constant 0.797884583 : f32
    %242 = vector.broadcast %cst_56 : f32 to vector<16x128xf32>
    %243 = arith.mulf %242, %241 : vector<16x128xf32>
    %244 = math.tanh %243 : vector<16x128xf32>
    %cst_57 = arith.constant 1.000000e+00 : f32
    %245 = vector.broadcast %cst_57 : f32 to vector<16x128xf32>
    %246 = arith.addf %245, %244 : vector<16x128xf32>
    %cst_58 = arith.constant 5.000000e-01 : f32
    %247 = vector.broadcast %cst_58 : f32 to vector<16x128xf32>
    %248 = arith.mulf %247, %246 : vector<16x128xf32>
    %249 = arith.mulf %236, %248 : vector<16x128xf32>
    %250 = arith.truncf %249 : vector<16x128xf32> to vector<16x128xbf16>
    %c1536 = arith.constant 1536 : index
    %c0_59 = arith.constant 0 : index
    %251 = vector.load %arg2[%c1536, %c0_59] : memref<2432x128xbf16, #tpu.memory_space<vmem>>, vector<128x128xbf16>
    %cst_60 = arith.constant dense<0.000000e+00> : vector<16x128xf32>
    %252 = tpu.matmul %250, %251, %cst_60 {dimension_numbers = #tpu.dot_dimension_numbers<[1], [0], [0], [1], [0, 0, 1, 1], [], []>} : vector<16x128xbf16>, vector<128x128xbf16>, vector<16x128xf32> -> vector<16x128xf32>
    %253 = vector.extract_strided_slice %0 {offsets = [15, 0], sizes = [1, 128], strides = [1, 1]} : vector<56x128xf32> to vector<1x128xf32>
    %254 = vector.broadcast %253 : vector<1x128xf32> to vector<16x128xf32>
    %255 = arith.addf %252, %254 : vector<16x128xf32>
    %256 = arith.addf %255, %230 : vector<16x128xf32>
    %257 = vector.extract_strided_slice %0 {offsets = [16, 0], sizes = [1, 128], strides = [1, 1]} : vector<56x128xf32> to vector<1x128xf32>
    %258 = vector.extract_strided_slice %0 {offsets = [17, 0], sizes = [1, 128], strides = [1, 1]} : vector<56x128xf32> to vector<1x128xf32>
    %cst_61 = arith.constant dense<0.000000e+00> : vector<16xf32>
    %259 = vector.multi_reduction <add>, %256, %cst_61 [1] : vector<16x128xf32> to vector<16xf32>
    %260 = vector.shape_cast %259 : vector<16xf32> to vector<16x1xf32>
    %cst_62 = arith.constant 3.125000e-02 : f32
    %261 = vector.broadcast %cst_62 : f32 to vector<16x1xf32>
    %262 = arith.mulf %260, %261 : vector<16x1xf32>
    %263 = arith.mulf %256, %256 : vector<16x128xf32>
    %cst_63 = arith.constant dense<0.000000e+00> : vector<16xf32>
    %264 = vector.multi_reduction <add>, %263, %cst_63 [1] : vector<16x128xf32> to vector<16xf32>
    %265 = vector.shape_cast %264 : vector<16xf32> to vector<16x1xf32>
    %cst_64 = arith.constant 3.125000e-02 : f32
    %266 = vector.broadcast %cst_64 : f32 to vector<16x1xf32>
    %267 = arith.mulf %265, %266 : vector<16x1xf32>
    %268 = arith.mulf %262, %262 : vector<16x1xf32>
    %269 = arith.subf %267, %268 : vector<16x1xf32>
    %cst_65 = arith.constant 0.000000e+00 : f32
    %270 = vector.broadcast %cst_65 : f32 to vector<16x1xf32>
    %271 = arith.maximumf %269, %270 : vector<16x1xf32>
    %272 = vector.broadcast %262 : vector<16x1xf32> to vector<16x128xf32>
    %273 = arith.subf %256, %272 : vector<16x128xf32>
    %cst_66 = arith.constant 9.99999996E-13 : f32
    %274 = vector.broadcast %cst_66 : f32 to vector<16x1xf32>
    %275 = arith.addf %271, %274 : vector<16x1xf32>
    %276 = math.rsqrt %275 : vector<16x1xf32>
    %277 = vector.broadcast %276 : vector<16x1xf32> to vector<16x128xf32>
    %278 = arith.mulf %273, %277 : vector<16x128xf32>
    %279 = vector.broadcast %257 : vector<1x128xf32> to vector<16x128xf32>
    %280 = arith.mulf %278, %279 : vector<16x128xf32>
    %281 = vector.broadcast %258 : vector<1x128xf32> to vector<16x128xf32>
    %282 = arith.addf %280, %281 : vector<16x128xf32>
    %283 = arith.truncf %282 : vector<16x128xf32> to vector<16x128xbf16>
    %c128_67 = arith.constant 128 : index
    %c0_68 = arith.constant 0 : index
    %284 = vector.load %arg3[%c128_67, %c0_68] : memref<256x768xbf16, #tpu.memory_space<vmem>>, vector<128x768xbf16>
    %cst_69 = arith.constant dense<0.000000e+00> : vector<16x768xf32>
    %285 = tpu.matmul %283, %284, %cst_69 {dimension_numbers = #tpu.dot_dimension_numbers<[1], [0], [0], [1], [0, 0, 1, 1], [], []>} : vector<16x128xbf16>, vector<128x768xbf16>, vector<16x768xf32> -> vector<16x768xf32>
    %286 = vector.extract_strided_slice %285 {offsets = [0, 0], sizes = [16, 128], strides = [1, 1]} : vector<16x768xf32> to vector<16x128xf32>
    %287 = vector.extract_strided_slice %0 {offsets = [18, 0], sizes = [1, 128], strides = [1, 1]} : vector<56x128xf32> to vector<1x128xf32>
    %288 = vector.broadcast %287 : vector<1x128xf32> to vector<16x128xf32>
    %289 = arith.addf %286, %288 : vector<16x128xf32>
    %290 = vector.extract_strided_slice %285 {offsets = [0, 128], sizes = [16, 128], strides = [1, 1]} : vector<16x768xf32> to vector<16x128xf32>
    %291 = vector.extract_strided_slice %0 {offsets = [20, 0], sizes = [1, 128], strides = [1, 1]} : vector<56x128xf32> to vector<1x128xf32>
    %292 = vector.broadcast %291 : vector<1x128xf32> to vector<16x128xf32>
    %293 = arith.addf %290, %292 : vector<16x128xf32>
    %294 = vector.extract_strided_slice %285 {offsets = [0, 256], sizes = [16, 128], strides = [1, 1]} : vector<16x768xf32> to vector<16x128xf32>
    %295 = vector.extract_strided_slice %0 {offsets = [22, 0], sizes = [1, 128], strides = [1, 1]} : vector<56x128xf32> to vector<1x128xf32>
    %296 = vector.broadcast %295 : vector<1x128xf32> to vector<16x128xf32>
    %297 = arith.addf %294, %296 : vector<16x128xf32>
    %298 = vector.shape_cast %289 : vector<16x128xf32> to vector<2x8x128xf32>
    %299 = arith.truncf %298 : vector<2x8x128xf32> to vector<2x8x128xbf16>
    %300 = vector.shape_cast %293 : vector<16x128xf32> to vector<2x8x128xf32>
    %301 = arith.truncf %300 : vector<2x8x128xf32> to vector<2x8x128xbf16>
    %302 = vector.shape_cast %297 : vector<16x128xf32> to vector<2x8x128xf32>
    %303 = arith.truncf %302 : vector<2x8x128xf32> to vector<2x8x128xbf16>
    "tpu.trace_start"() <{level = 10 : i32, message = "bqd,bkd->bqk"}> : () -> ()
    %cst_70 = arith.constant dense<0.000000e+00> : vector<2x8x8xf32>
    %304 = tpu.matmul %299, %301, %cst_70 {dimension_numbers = #tpu.dot_dimension_numbers<[2], [2], [1], [1], [0, 0, 0, 1, 1, 1], [0], [0]>} : vector<2x8x128xbf16>, vector<2x8x128xbf16>, vector<2x8x8xf32> -> vector<2x8x8xf32>
    "tpu.trace_stop"() : () -> ()
    %cst_71 = arith.constant 2.500000e-01 : f32
    %305 = vector.broadcast %cst_71 : f32 to vector<2x8x8xf32>
    %306 = arith.mulf %304, %305 : vector<2x8x8xf32>
    %307 = vector.broadcast %5 : vector<2x1x8xf32> to vector<2x8x8xf32>
    %308 = arith.addf %306, %307 : vector<2x8x8xf32>
    %cst_72 = arith.constant dense<0xFF800000> : vector<2x8xf32>
    %309 = vector.multi_reduction <maximumf>, %308, %cst_72 [2] : vector<2x8x8xf32> to vector<2x8xf32>
    %310 = vector.shape_cast %309 : vector<2x8xf32> to vector<2x8x1xf32>
    %311 = vector.broadcast %310 : vector<2x8x1xf32> to vector<2x8x8xf32>
    %312 = arith.subf %308, %311 : vector<2x8x8xf32>
    %313 = math.exp %312 : vector<2x8x8xf32>
    %cst_73 = arith.constant dense<0.000000e+00> : vector<2x8xf32>
    %314 = vector.multi_reduction <add>, %313, %cst_73 [2] : vector<2x8x8xf32> to vector<2x8xf32>
    %315 = vector.shape_cast %314 : vector<2x8xf32> to vector<2x8x1xf32>
    %316 = tpu.reciprocal %315 {approx = true} : vector<2x8x1xf32> -> vector<2x8x1xf32>
    %317 = vector.broadcast %316 : vector<2x8x1xf32> to vector<2x8x8xf32>
    %318 = arith.mulf %313, %317 : vector<2x8x8xf32>
    %319 = arith.truncf %318 : vector<2x8x8xf32> to vector<2x8x8xbf16>
    "tpu.trace_start"() <{level = 10 : i32, message = "bqk,bkd->bqd"}> : () -> ()
    %cst_74 = arith.constant dense<0.000000e+00> : vector<2x8x128xf32>
    %320 = tpu.matmul %319, %303, %cst_74 {dimension_numbers = #tpu.dot_dimension_numbers<[2], [1], [1], [2], [0, 0, 0, 1, 1, 2], [0], [0]>} : vector<2x8x8xbf16>, vector<2x8x128xbf16>, vector<2x8x128xf32> -> vector<2x8x128xf32>
    "tpu.trace_stop"() : () -> ()
    %321 = vector.shape_cast %320 : vector<2x8x128xf32> to vector<16x128xf32>
    %322 = arith.truncf %321 : vector<16x128xf32> to vector<16x128xbf16>
    %c1664 = arith.constant 1664 : index
    %c0_75 = arith.constant 0 : index
    %323 = vector.load %arg2[%c1664, %c0_75] : memref<2432x128xbf16, #tpu.memory_space<vmem>>, vector<128x128xbf16>
    %cst_76 = arith.constant dense<0.000000e+00> : vector<16x128xf32>
    %324 = tpu.matmul %322, %323, %cst_76 {dimension_numbers = #tpu.dot_dimension_numbers<[1], [0], [0], [1], [0, 0, 1, 1], [], []>} : vector<16x128xbf16>, vector<128x128xbf16>, vector<16x128xf32> -> vector<16x128xf32>
    %325 = vector.extract_strided_slice %285 {offsets = [0, 384], sizes = [16, 128], strides = [1, 1]} : vector<16x768xf32> to vector<16x128xf32>
    %326 = vector.extract_strided_slice %0 {offsets = [19, 0], sizes = [1, 128], strides = [1, 1]} : vector<56x128xf32> to vector<1x128xf32>
    %327 = vector.broadcast %326 : vector<1x128xf32> to vector<16x128xf32>
    %328 = arith.addf %325, %327 : vector<16x128xf32>
    %329 = vector.extract_strided_slice %285 {offsets = [0, 512], sizes = [16, 128], strides = [1, 1]} : vector<16x768xf32> to vector<16x128xf32>
    %330 = vector.extract_strided_slice %0 {offsets = [21, 0], sizes = [1, 128], strides = [1, 1]} : vector<56x128xf32> to vector<1x128xf32>
    %331 = vector.broadcast %330 : vector<1x128xf32> to vector<16x128xf32>
    %332 = arith.addf %329, %331 : vector<16x128xf32>
    %333 = vector.extract_strided_slice %285 {offsets = [0, 640], sizes = [16, 128], strides = [1, 1]} : vector<16x768xf32> to vector<16x128xf32>
    %334 = vector.extract_strided_slice %0 {offsets = [23, 0], sizes = [1, 128], strides = [1, 1]} : vector<56x128xf32> to vector<1x128xf32>
    %335 = vector.broadcast %334 : vector<1x128xf32> to vector<16x128xf32>
    %336 = arith.addf %333, %335 : vector<16x128xf32>
    %337 = vector.shape_cast %328 : vector<16x128xf32> to vector<2x8x128xf32>
    %338 = arith.truncf %337 : vector<2x8x128xf32> to vector<2x8x128xbf16>
    %339 = vector.shape_cast %332 : vector<16x128xf32> to vector<2x8x128xf32>
    %340 = arith.truncf %339 : vector<2x8x128xf32> to vector<2x8x128xbf16>
    %341 = vector.shape_cast %336 : vector<16x128xf32> to vector<2x8x128xf32>
    %342 = arith.truncf %341 : vector<2x8x128xf32> to vector<2x8x128xbf16>
    "tpu.trace_start"() <{level = 10 : i32, message = "bqd,bkd->bqk"}> : () -> ()
    %cst_77 = arith.constant dense<0.000000e+00> : vector<2x8x8xf32>
    %343 = tpu.matmul %338, %340, %cst_77 {dimension_numbers = #tpu.dot_dimension_numbers<[2], [2], [1], [1], [0, 0, 0, 1, 1, 1], [0], [0]>} : vector<2x8x128xbf16>, vector<2x8x128xbf16>, vector<2x8x8xf32> -> vector<2x8x8xf32>
    "tpu.trace_stop"() : () -> ()
    %cst_78 = arith.constant 2.500000e-01 : f32
    %344 = vector.broadcast %cst_78 : f32 to vector<2x8x8xf32>
    %345 = arith.mulf %343, %344 : vector<2x8x8xf32>
    %346 = vector.broadcast %5 : vector<2x1x8xf32> to vector<2x8x8xf32>
    %347 = arith.addf %345, %346 : vector<2x8x8xf32>
    %cst_79 = arith.constant dense<0xFF800000> : vector<2x8xf32>
    %348 = vector.multi_reduction <maximumf>, %347, %cst_79 [2] : vector<2x8x8xf32> to vector<2x8xf32>
    %349 = vector.shape_cast %348 : vector<2x8xf32> to vector<2x8x1xf32>
    %350 = vector.broadcast %349 : vector<2x8x1xf32> to vector<2x8x8xf32>
    %351 = arith.subf %347, %350 : vector<2x8x8xf32>
    %352 = math.exp %351 : vector<2x8x8xf32>
    %cst_80 = arith.constant dense<0.000000e+00> : vector<2x8xf32>
    %353 = vector.multi_reduction <add>, %352, %cst_80 [2] : vector<2x8x8xf32> to vector<2x8xf32>
    %354 = vector.shape_cast %353 : vector<2x8xf32> to vector<2x8x1xf32>
    %355 = tpu.reciprocal %354 {approx = true} : vector<2x8x1xf32> -> vector<2x8x1xf32>
    %356 = vector.broadcast %355 : vector<2x8x1xf32> to vector<2x8x8xf32>
    %357 = arith.mulf %352, %356 : vector<2x8x8xf32>
    %358 = arith.truncf %357 : vector<2x8x8xf32> to vector<2x8x8xbf16>
    "tpu.trace_start"() <{level = 10 : i32, message = "bqk,bkd->bqd"}> : () -> ()
    %cst_81 = arith.constant dense<0.000000e+00> : vector<2x8x128xf32>
    %359 = tpu.matmul %358, %342, %cst_81 {dimension_numbers = #tpu.dot_dimension_numbers<[2], [1], [1], [2], [0, 0, 0, 1, 1, 2], [0], [0]>} : vector<2x8x8xbf16>, vector<2x8x128xbf16>, vector<2x8x128xf32> -> vector<2x8x128xf32>
    "tpu.trace_stop"() : () -> ()
    %360 = vector.shape_cast %359 : vector<2x8x128xf32> to vector<16x128xf32>
    %361 = arith.truncf %360 : vector<16x128xf32> to vector<16x128xbf16>
    %c1792 = arith.constant 1792 : index
    %c0_82 = arith.constant 0 : index
    %362 = vector.load %arg2[%c1792, %c0_82] : memref<2432x128xbf16, #tpu.memory_space<vmem>>, vector<128x128xbf16>
    %cst_83 = arith.constant dense<0.000000e+00> : vector<16x128xf32>
    %363 = tpu.matmul %361, %362, %cst_83 {dimension_numbers = #tpu.dot_dimension_numbers<[1], [0], [0], [1], [0, 0, 1, 1], [], []>} : vector<16x128xbf16>, vector<128x128xbf16>, vector<16x128xf32> -> vector<16x128xf32>
    %364 = arith.addf %324, %363 : vector<16x128xf32>
    %365 = vector.extract_strided_slice %0 {offsets = [24, 0], sizes = [1, 128], strides = [1, 1]} : vector<56x128xf32> to vector<1x128xf32>
    %366 = vector.broadcast %365 : vector<1x128xf32> to vector<16x128xf32>
    %367 = arith.addf %364, %366 : vector<16x128xf32>
    %368 = arith.addf %367, %282 : vector<16x128xf32>
    %369 = vector.extract_strided_slice %0 {offsets = [25, 0], sizes = [1, 128], strides = [1, 1]} : vector<56x128xf32> to vector<1x128xf32>
    %370 = vector.extract_strided_slice %0 {offsets = [26, 0], sizes = [1, 128], strides = [1, 1]} : vector<56x128xf32> to vector<1x128xf32>
    %cst_84 = arith.constant dense<0.000000e+00> : vector<16xf32>
    %371 = vector.multi_reduction <add>, %368, %cst_84 [1] : vector<16x128xf32> to vector<16xf32>
    %372 = vector.shape_cast %371 : vector<16xf32> to vector<16x1xf32>
    %cst_85 = arith.constant 3.125000e-02 : f32
    %373 = vector.broadcast %cst_85 : f32 to vector<16x1xf32>
    %374 = arith.mulf %372, %373 : vector<16x1xf32>
    %375 = arith.mulf %368, %368 : vector<16x128xf32>
    %cst_86 = arith.constant dense<0.000000e+00> : vector<16xf32>
    %376 = vector.multi_reduction <add>, %375, %cst_86 [1] : vector<16x128xf32> to vector<16xf32>
    %377 = vector.shape_cast %376 : vector<16xf32> to vector<16x1xf32>
    %cst_87 = arith.constant 3.125000e-02 : f32
    %378 = vector.broadcast %cst_87 : f32 to vector<16x1xf32>
    %379 = arith.mulf %377, %378 : vector<16x1xf32>
    %380 = arith.mulf %374, %374 : vector<16x1xf32>
    %381 = arith.subf %379, %380 : vector<16x1xf32>
    %cst_88 = arith.constant 0.000000e+00 : f32
    %382 = vector.broadcast %cst_88 : f32 to vector<16x1xf32>
    %383 = arith.maximumf %381, %382 : vector<16x1xf32>
    %384 = vector.broadcast %374 : vector<16x1xf32> to vector<16x128xf32>
    %385 = arith.subf %368, %384 : vector<16x128xf32>
    %cst_89 = arith.constant 9.99999996E-13 : f32
    %386 = vector.broadcast %cst_89 : f32 to vector<16x1xf32>
    %387 = arith.addf %383, %386 : vector<16x1xf32>
    %388 = math.rsqrt %387 : vector<16x1xf32>
    %389 = vector.broadcast %388 : vector<16x1xf32> to vector<16x128xf32>
    %390 = arith.mulf %385, %389 : vector<16x128xf32>
    %391 = vector.broadcast %369 : vector<1x128xf32> to vector<16x128xf32>
    %392 = arith.mulf %390, %391 : vector<16x128xf32>
    %393 = vector.broadcast %370 : vector<1x128xf32> to vector<16x128xf32>
    %394 = arith.addf %392, %393 : vector<16x128xf32>
    %395 = arith.truncf %394 : vector<16x128xf32> to vector<16x128xbf16>
    %c1920 = arith.constant 1920 : index
    %c0_90 = arith.constant 0 : index
    %396 = vector.load %arg2[%c1920, %c0_90] : memref<2432x128xbf16, #tpu.memory_space<vmem>>, vector<128x128xbf16>
    %cst_91 = arith.constant dense<0.000000e+00> : vector<16x128xf32>
    %397 = tpu.matmul %395, %396, %cst_91 {dimension_numbers = #tpu.dot_dimension_numbers<[1], [0], [0], [1], [0, 0, 1, 1], [], []>} : vector<16x128xbf16>, vector<128x128xbf16>, vector<16x128xf32> -> vector<16x128xf32>
    %398 = vector.extract_strided_slice %0 {offsets = [27, 0], sizes = [1, 128], strides = [1, 1]} : vector<56x128xf32> to vector<1x128xf32>
    %399 = vector.broadcast %398 : vector<1x128xf32> to vector<16x128xf32>
    %400 = arith.addf %397, %399 : vector<16x128xf32>
    %401 = arith.mulf %400, %400 : vector<16x128xf32>
    %402 = arith.mulf %400, %401 : vector<16x128xf32>
    %cst_92 = arith.constant 4.471500e-02 : f32
    %403 = vector.broadcast %cst_92 : f32 to vector<16x128xf32>
    %404 = arith.mulf %403, %402 : vector<16x128xf32>
    %405 = arith.addf %400, %404 : vector<16x128xf32>
    %cst_93 = arith.constant 0.797884583 : f32
    %406 = vector.broadcast %cst_93 : f32 to vector<16x128xf32>
    %407 = arith.mulf %406, %405 : vector<16x128xf32>
    %408 = math.tanh %407 : vector<16x128xf32>
    %cst_94 = arith.constant 1.000000e+00 : f32
    %409 = vector.broadcast %cst_94 : f32 to vector<16x128xf32>
    %410 = arith.addf %409, %408 : vector<16x128xf32>
    %cst_95 = arith.constant 5.000000e-01 : f32
    %411 = vector.broadcast %cst_95 : f32 to vector<16x128xf32>
    %412 = arith.mulf %411, %410 : vector<16x128xf32>
    %413 = arith.mulf %400, %412 : vector<16x128xf32>
    %414 = arith.truncf %413 : vector<16x128xf32> to vector<16x128xbf16>
    %c2048 = arith.constant 2048 : index
    %c0_96 = arith.constant 0 : index
    %415 = vector.load %arg2[%c2048, %c0_96] : memref<2432x128xbf16, #tpu.memory_space<vmem>>, vector<128x128xbf16>
    %cst_97 = arith.constant dense<0.000000e+00> : vector<16x128xf32>
    %416 = tpu.matmul %414, %415, %cst_97 {dimension_numbers = #tpu.dot_dimension_numbers<[1], [0], [0], [1], [0, 0, 1, 1], [], []>} : vector<16x128xbf16>, vector<128x128xbf16>, vector<16x128xf32> -> vector<16x128xf32>
    %417 = vector.extract_strided_slice %0 {offsets = [28, 0], sizes = [1, 128], strides = [1, 1]} : vector<56x128xf32> to vector<1x128xf32>
    %418 = vector.broadcast %417 : vector<1x128xf32> to vector<16x128xf32>
    %419 = arith.addf %416, %418 : vector<16x128xf32>
    %420 = arith.addf %419, %394 : vector<16x128xf32>
    %421 = vector.extract_strided_slice %0 {offsets = [29, 0], sizes = [1, 128], strides = [1, 1]} : vector<56x128xf32> to vector<1x128xf32>
    %422 = vector.extract_strided_slice %0 {offsets = [30, 0], sizes = [1, 128], strides = [1, 1]} : vector<56x128xf32> to vector<1x128xf32>
    %cst_98 = arith.constant dense<0.000000e+00> : vector<16xf32>
    %423 = vector.multi_reduction <add>, %420, %cst_98 [1] : vector<16x128xf32> to vector<16xf32>
    %424 = vector.shape_cast %423 : vector<16xf32> to vector<16x1xf32>
    %cst_99 = arith.constant 3.125000e-02 : f32
    %425 = vector.broadcast %cst_99 : f32 to vector<16x1xf32>
    %426 = arith.mulf %424, %425 : vector<16x1xf32>
    %427 = arith.mulf %420, %420 : vector<16x128xf32>
    %cst_100 = arith.constant dense<0.000000e+00> : vector<16xf32>
    %428 = vector.multi_reduction <add>, %427, %cst_100 [1] : vector<16x128xf32> to vector<16xf32>
    %429 = vector.shape_cast %428 : vector<16xf32> to vector<16x1xf32>
    %cst_101 = arith.constant 3.125000e-02 : f32
    %430 = vector.broadcast %cst_101 : f32 to vector<16x1xf32>
    %431 = arith.mulf %429, %430 : vector<16x1xf32>
    %432 = arith.mulf %426, %426 : vector<16x1xf32>
    %433 = arith.subf %431, %432 : vector<16x1xf32>
    %cst_102 = arith.constant 0.000000e+00 : f32
    %434 = vector.broadcast %cst_102 : f32 to vector<16x1xf32>
    %435 = arith.maximumf %433, %434 : vector<16x1xf32>
    %436 = vector.broadcast %426 : vector<16x1xf32> to vector<16x128xf32>
    %437 = arith.subf %420, %436 : vector<16x128xf32>
    %cst_103 = arith.constant 9.99999996E-13 : f32
    %438 = vector.broadcast %cst_103 : f32 to vector<16x1xf32>
    %439 = arith.addf %435, %438 : vector<16x1xf32>
    %440 = math.rsqrt %439 : vector<16x1xf32>
    %441 = vector.broadcast %440 : vector<16x1xf32> to vector<16x128xf32>
    %442 = arith.mulf %437, %441 : vector<16x128xf32>
    %443 = vector.broadcast %421 : vector<1x128xf32> to vector<16x128xf32>
    %444 = arith.mulf %442, %443 : vector<16x128xf32>
    %445 = vector.broadcast %422 : vector<1x128xf32> to vector<16x128xf32>
    %446 = arith.addf %444, %445 : vector<16x128xf32>
    %447 = arith.truncf %446 : vector<16x128xf32> to vector<16x128xbf16>
    %c2176 = arith.constant 2176 : index
    %c0_104 = arith.constant 0 : index
    %448 = vector.load %arg2[%c2176, %c0_104] : memref<2432x128xbf16, #tpu.memory_space<vmem>>, vector<128x128xbf16>
    %cst_105 = arith.constant dense<0.000000e+00> : vector<16x128xf32>
    %449 = tpu.matmul %447, %448, %cst_105 {dimension_numbers = #tpu.dot_dimension_numbers<[1], [0], [0], [1], [0, 0, 1, 1], [], []>} : vector<16x128xbf16>, vector<128x128xbf16>, vector<16x128xf32> -> vector<16x128xf32>
    %450 = vector.extract_strided_slice %0 {offsets = [31, 0], sizes = [1, 128], strides = [1, 1]} : vector<56x128xf32> to vector<1x128xf32>
    %451 = vector.broadcast %450 : vector<1x128xf32> to vector<16x128xf32>
    %452 = arith.addf %449, %451 : vector<16x128xf32>
    %453 = arith.mulf %452, %452 : vector<16x128xf32>
    %454 = arith.mulf %452, %453 : vector<16x128xf32>
    %cst_106 = arith.constant 4.471500e-02 : f32
    %455 = vector.broadcast %cst_106 : f32 to vector<16x128xf32>
    %456 = arith.mulf %455, %454 : vector<16x128xf32>
    %457 = arith.addf %452, %456 : vector<16x128xf32>
    %cst_107 = arith.constant 0.797884583 : f32
    %458 = vector.broadcast %cst_107 : f32 to vector<16x128xf32>
    %459 = arith.mulf %458, %457 : vector<16x128xf32>
    %460 = math.tanh %459 : vector<16x128xf32>
    %cst_108 = arith.constant 1.000000e+00 : f32
    %461 = vector.broadcast %cst_108 : f32 to vector<16x128xf32>
    %462 = arith.addf %461, %460 : vector<16x128xf32>
    %cst_109 = arith.constant 5.000000e-01 : f32
    %463 = vector.broadcast %cst_109 : f32 to vector<16x128xf32>
    %464 = arith.mulf %463, %462 : vector<16x128xf32>
    %465 = arith.mulf %452, %464 : vector<16x128xf32>
    %466 = vector.extract_strided_slice %0 {offsets = [32, 0], sizes = [1, 128], strides = [1, 1]} : vector<56x128xf32> to vector<1x128xf32>
    %467 = vector.extract_strided_slice %0 {offsets = [33, 0], sizes = [1, 128], strides = [1, 1]} : vector<56x128xf32> to vector<1x128xf32>
    %cst_110 = arith.constant dense<0.000000e+00> : vector<16xf32>
    %468 = vector.multi_reduction <add>, %465, %cst_110 [1] : vector<16x128xf32> to vector<16xf32>
    %469 = vector.shape_cast %468 : vector<16xf32> to vector<16x1xf32>
    %cst_111 = arith.constant 3.125000e-02 : f32
    %470 = vector.broadcast %cst_111 : f32 to vector<16x1xf32>
    %471 = arith.mulf %469, %470 : vector<16x1xf32>
    %472 = arith.mulf %465, %465 : vector<16x128xf32>
    %cst_112 = arith.constant dense<0.000000e+00> : vector<16xf32>
    %473 = vector.multi_reduction <add>, %472, %cst_112 [1] : vector<16x128xf32> to vector<16xf32>
    %474 = vector.shape_cast %473 : vector<16xf32> to vector<16x1xf32>
    %cst_113 = arith.constant 3.125000e-02 : f32
    %475 = vector.broadcast %cst_113 : f32 to vector<16x1xf32>
    %476 = arith.mulf %474, %475 : vector<16x1xf32>
    %477 = arith.mulf %471, %471 : vector<16x1xf32>
    %478 = arith.subf %476, %477 : vector<16x1xf32>
    %cst_114 = arith.constant 0.000000e+00 : f32
    %479 = vector.broadcast %cst_114 : f32 to vector<16x1xf32>
    %480 = arith.maximumf %478, %479 : vector<16x1xf32>
    %481 = vector.broadcast %471 : vector<16x1xf32> to vector<16x128xf32>
    %482 = arith.subf %465, %481 : vector<16x128xf32>
    %cst_115 = arith.constant 9.99999996E-13 : f32
    %483 = vector.broadcast %cst_115 : f32 to vector<16x1xf32>
    %484 = arith.addf %480, %483 : vector<16x1xf32>
    %485 = math.rsqrt %484 : vector<16x1xf32>
    %486 = vector.broadcast %485 : vector<16x1xf32> to vector<16x128xf32>
    %487 = arith.mulf %482, %486 : vector<16x128xf32>
    %488 = vector.broadcast %466 : vector<1x128xf32> to vector<16x128xf32>
    %489 = arith.mulf %487, %488 : vector<16x128xf32>
    %490 = vector.broadcast %467 : vector<1x128xf32> to vector<16x128xf32>
    %491 = arith.addf %489, %490 : vector<16x128xf32>
    %492 = arith.truncf %491 : vector<16x128xf32> to vector<16x128xbf16>
    %c2304 = arith.constant 2304 : index
    %c0_116 = arith.constant 0 : index
    %493 = vector.load %arg2[%c2304, %c0_116] : memref<2432x128xbf16, #tpu.memory_space<vmem>>, vector<128x128xbf16>
    %cst_117 = arith.constant dense<0.000000e+00> : vector<16x128xf32>
    %494 = tpu.matmul %492, %493, %cst_117 {dimension_numbers = #tpu.dot_dimension_numbers<[1], [0], [0], [1], [0, 0, 1, 1], [], []>} : vector<16x128xbf16>, vector<128x128xbf16>, vector<16x128xf32> -> vector<16x128xf32>
    %495 = vector.extract_strided_slice %0 {offsets = [34, 0], sizes = [1, 128], strides = [1, 1]} : vector<56x128xf32> to vector<1x128xf32>
    %496 = vector.broadcast %495 : vector<1x128xf32> to vector<16x128xf32>
    %497 = arith.addf %494, %496 : vector<16x128xf32>
    %c0_118 = arith.constant 0 : index
    %c0_119 = arith.constant 0 : index
    %498 = vector.load %arg5[%c0_118, %c0_119] : memref<16x128xf32, #tpu.memory_space<vmem>>, vector<16x128xf32>
    tpu.vector_store %arg5[%c0_118, %c0_119], %497 {strides = array<i32>} : memref<16x128xf32, #tpu.memory_space<vmem>>, vector<16x128xf32>,
    %cst_120 = arith.constant dense<0xFF800000> : vector<16xf32>
    %499 = vector.multi_reduction <maximumf>, %497, %cst_120 [1] : vector<16x128xf32> to vector<16xf32>
    %500 = vector.shape_cast %499 : vector<16xf32> to vector<16x1xf32>
    %501 = vector.broadcast %500 : vector<16x1xf32> to vector<16x128xf32>
    %502 = arith.subf %497, %501 : vector<16x128xf32>
    %503 = math.exp %502 : vector<16x128xf32>
    %cst_121 = arith.constant dense<0.000000e+00> : vector<16xf32>
    %504 = vector.multi_reduction <add>, %503, %cst_121 [1] : vector<16x128xf32> to vector<16xf32>
    %505 = vector.shape_cast %504 : vector<16xf32> to vector<16x1xf32>
    %506 = math.log %505 : vector<16x1xf32>
    %507 = arith.addf %500, %506 : vector<16x1xf32>
    %508 = vector.broadcast %3 : vector<16x1xi32> to vector<16x128xi32>
    %509 = arith.cmpi eq, %6, %508 : vector<16x128xi32>
    %cst_122 = arith.constant 0.000000e+00 : f32
    %510 = vector.broadcast %cst_122 : f32 to vector<16x128xf32>
    %511 = arith.select %509, %497, %510 : vector<16x128xi1>, vector<16x128xf32>
    %cst_123 = arith.constant dense<0.000000e+00> : vector<16xf32>
    %512 = vector.multi_reduction <add>, %511, %cst_123 [1] : vector<16x128xf32> to vector<16xf32>
    %513 = vector.shape_cast %512 : vector<16xf32> to vector<16x1xf32>
    %514 = arith.subf %507, %513 : vector<16x1xf32>
    %cst_124 = arith.constant dense<0.000000e+00> : vector<1xf32>
    %515 = vector.multi_reduction <add>, %514, %cst_124 [0] : vector<16x1xf32> to vector<1xf32>
    %516 = vector.shape_cast %515 : vector<1xf32> to vector<1x1xf32>
    %cst_125 = arith.constant 6.250000e-02 : f32
    %517 = vector.broadcast %cst_125 : f32 to vector<1x1xf32>
    %518 = arith.mulf %516, %517 : vector<1x1xf32>
    %c0_126 = arith.constant 0 : index
    %c0_127 = arith.constant 0 : index
    %519 = vector.load %arg6[%c0_126, %c0_127] : memref<1x1xf32, #tpu.memory_space<vmem>>, vector<1x1xf32>
    tpu.vector_store %arg6[%c0_126, %c0_127], %518 {strides = array<i32>} : memref<1x1xf32, #tpu.memory_space<vmem>>, vector<1x1xf32>,
    return
  }
}

</mosaic_0001>

<bundles_post_ra>
// kernel: forward.1
= control target key start
LH: loop header
LB: loop body
LE: loop exit
PB: predicated region body
PF: predicated region fallthrough
CT: control target
= control target key end

     0   :  { %12 = vsyncpa [#allocation3], 0  ;;  %s6775_s0 = inlined_call_operand.vmem [shape: s32[160,1], index: 0, kind: input, shape index: {}]   ;;  %s6776_s1 = inlined_call_operand.vmem [shape: f32[2,1,8], index: 1, kind: input, shape index: {}]   ;;  %s6777_s2 = inlined_call_operand.hbm [shape: bf16[2432,128], index: 2, kind: input, shape index: {}]   ;;  %s6778_s3 = inlined_call_operand.hbm [shape: bf16[256,768], index: 3, kind: input, shape index: {}]   ;;  %s6779_s4 = inlined_call_operand.vmem [shape: f32[56,128], index: 4, kind: input, shape index: {}]   ;;  %s6780_s5 = inlined_call_operand.vmem [shape: f32[16,128], index: 5, kind: output, shape index: {0}]   ;;  %s6781_s6 = inlined_call_operand.hbm [shape: f32[1,1], index: 6, kind: output, shape index: {1}]  }
   0x1   :  { %13 = vsyncpa [#allocation6], 0 }
   0x2   :  { %14 = vsyncpa [#allocation4], 0  ;;  %s6082_s21 = smov [#allocation2]   ;;  %s6010_s25 = scalar_lea.hbm %s6777_s2, 19456 }
   0x3   :  { %s24_s22 = sshll.u32 %s6082_s21, 4  ;;  %p6011_p0 = scmp.ne.s32.totalorder %s6777_s2, %s6010_s25  ;;  %s25_s22 = int_to_ptr.vmem [resolvable:$true] %s24_s22 }
   0x4   :  { %p6014_p1 = scmp.lt.u32.totalorder %s6010_s25, %s6777_s2 }
   0x6   :  { %p6016_p2 = pnand %p6014_p1, %p6011_p0 }
   0x8   :  { %6019 = shalt.err (!%p6016_p2)
}
   0x9   :  { %s6020_s30 = scalar_lea.vmem %s25_s22, 19456  ;;  %p6025_p4 = scmp.lt.s32.totalorder %s25_s22, %s25_s22 }
   0xa   :  { %p6021_p3 = scmp.ne.s32.totalorder %s25_s22, %s6020_s30  ;;  %p6026_p5 = scmp.lt.s32.totalorder %s6020_s30, %s6020_s30 }
   0xc   :  { %p6027_p6 = por %p6026_p5, %p6025_p4 }
   0xe   :  { %p6028_p7 = pnand %p6027_p6, %p6021_p3 }
  0x10   :  { %6031 = shalt.err (!%p6028_p7)
}
  0x11   :  { %s6083_s7 = smov 64   ;;  %s6084_s8 = smov 4  }
  0x12   :  { %30 = dma.hbm_to_vmem [thread:$0]  %s6777_s2, 19456, %s25_s22, [#allocation3], %s6083_s7, %s6083_s7, %s6084_s8  }
  0x13   :  { %s6085_s11 = smov [#allocation5]   ;;  %s6032_s15 = scalar_lea.hbm %s6778_s3, 12288 }
  0x14   :  { %s36_s12 = sshll.u32 %s6085_s11, 4  ;;  %p6033_p8 = scmp.ne.s32.totalorder %s6778_s3, %s6032_s15  ;;  %s37_s12 = int_to_ptr.vmem [resolvable:$true] %s36_s12 }
  0x15   :  { %p6036_p9 = scmp.lt.u32.totalorder %s6032_s15, %s6778_s3 }
  0x17   :  { %p6038_p10 = pnand %p6036_p9, %p6033_p8 }
  0x19   :  { %6041 = shalt.err (!%p6038_p10)
}
  0x1a   :  { %s6042_s20 = scalar_lea.vmem %s37_s12, 12288  ;;  %p6047_p12 = scmp.lt.s32.totalorder %s37_s12, %s37_s12 }
  0x1b   :  { %p6043_p11 = scmp.ne.s32.totalorder %s37_s12, %s6042_s20  ;;  %p6048_p13 = scmp.lt.s32.totalorder %s6042_s20, %s6042_s20 }
  0x1d   :  { %p6049_p0 = por %p6048_p13, %p6047_p12 }
  0x1f   :  { %p6050_p1 = pnand %p6049_p0, %p6043_p11 }
  0x21   :  { %6053 = shalt.err (!%p6050_p1)
}
  0x22   :  { %s6086_s2 = smov 384   ;;  %s6087_s21 = smov 24  }
  0x23   :  { %42 = dma.hbm_to_vmem [thread:$0]  %s6778_s3, 12288, %s37_s12, [#allocation6], %s6086_s2, %s6086_s2, %s6087_s21  }
  0x24   :  { %6076 = dma.done.wait [#allocation3], 19456  }
  0x25   :  { %6077 = vsyncadd [#allocation3], 4294947840 }
  0x26   :  { %6078 = dma.done.wait [#allocation6], 12288  }
  0x27   :  { %6079 = vsyncadd [#allocation6], 4294955008  ;;  %v6088_v0 = vmov 0   ;;  %v6089_v1 = vmov 0.0   ;;  %v63_v2 = vld [vmem:[%s6775_s0 + $0x20] sm:$0xff]  ;;  %v64_v4 = vld [vmem:[%s6775_s0 + $0x28] sm:$0xff]  ;;  %v81_v37 = vlaneseq }
  0x28   :  { %5635 = vset.pattern.permute.xlu1 %v6088_v0  ;;  %5634 = vset.pattern.permute.xlu0 %v6088_v0  ;;  %v59_v3 = vld [vmem:[%s6775_s0] sm:$0xff]  ;;  %v60_v5 = vld [vmem:[%s6775_s0 + $0x8] sm:$0xff]  ;;  %v66_v6 = vld [vmem:[%s6775_s0 + $0x38] sm:$0xff]  ;;  %vm6090_vm0 = vmmov 0   ;;  %v6091_v45 = vmov 1.0|1.0  }
  0x29   :  { %5131 = vmatprep.subr.bf16.mxu1 %v6089_v1  ;;  %5111 = vmatprep.subr.bf16.mxu0 %v6089_v1  ;;  %v65_v7 = vld [vmem:[%s6775_s0 + $0x30] sm:$0xff]  ;;  %v5636_v8 = vld [vmem:[#allocation2 + $0x40] sm:$0xff]   ;;  %v68_v10 = vld [vmem:[%s6775_s0 + $0x48] sm:$0xff]  ;;  %v6230_v38 = vand.u32 127, %v81_v37 }
  0x2a   :  { %417 = vperm.xlu1 %5635, %v63_v2   ;;  %84 = vperm.xlu0 %5634, %v59_v3   ;;  %v5637_v9 = vld [vmem:[#allocation2] sm:$0xff]   ;;  %v5638_v11 = vld [vmem:[#allocation2 + $0x48] sm:$0xff]   ;;  %v70_v14 = vld [vmem:[%s6775_s0 + $0x58] sm:$0xff] }
  0x2b   :  { %5127 = vmatprep.mubr.msk.bf16.mxu0 %vm6090_vm0, %v6089_v1  ;;  %5147 = vmatprep.mubr.msk.bf16.mxu1 %vm6090_vm0, %v6089_v1  ;;  %v67_v12 = vld [vmem:[%s6775_s0 + $0x40] sm:$0xff]  ;;  %v5639_v13 = vld [vmem:[#allocation2 + $0x8] sm:$0xff]   ;;  %v5640_v15 = vld [vmem:[#allocation2 + $0x50] sm:$0xff]  }
  0x2c   :  { %5132 = vmatpush3.bf16.msra.mxu1 %v5636_v8  ;;  %5112 = vmatpush3.bf16.msra.mxu0 %v5637_v9  ;;  %v69_v16 = vld [vmem:[%s6775_s0 + $0x50] sm:$0xff]  ;;  %v72_v18 = vld [vmem:[%s6775_s0 + $0x68] sm:$0xff]  ;;  %v5642_v19 = vld [vmem:[#allocation2 + $0x58] sm:$0xff]  }
  0x2d   :  { %5133 = vmatprep.subr.bf16.mxu1 %v6089_v1  ;;  %5113 = vmatprep.subr.bf16.mxu0 %v6089_v1  ;;  %v5641_v17 = vld [vmem:[#allocation2 + $0x10] sm:$0xff]   ;;  %v71_v20 = vld [vmem:[%s6775_s0 + $0x60] sm:$0xff]  ;;  %v5643_v21 = vld [vmem:[#allocation2 + $0x18] sm:$0xff]  }
  0x2e   :  { %420 = vperm.xlu1 %5635, %v64_v4   ;;  %87 = vperm.xlu0 %5634, %v60_v5   ;;  %v74_v22 = vld [vmem:[%s6775_s0 + $0x78] sm:$0xff]  ;;  %v5644_v23 = vld [vmem:[#allocation2 + $0x60] sm:$0xff]   ;;  %v73_v24 = vld [vmem:[%s6775_s0 + $0x70] sm:$0xff] }
  0x2f   :  { %v5645_v25 = vld [vmem:[#allocation2 + $0x20] sm:$0xff]   ;;  %v76_v26 = vld [vmem:[%s6775_s0 + $0x88] sm:$0xff]  ;;  %v5648_v30 = vld [vmem:[#allocation2 + $0x70] sm:$0xff]  }
  0x30   :  { %5134 = vmatpush3.bf16.msra.mxu1 %v5638_v11  ;;  %5114 = vmatpush3.bf16.msra.mxu0 %v5639_v13  ;;  %v5646_v27 = vld [vmem:[#allocation2 + $0x68] sm:$0xff]   ;;  %v75_v28 = vld [vmem:[%s6775_s0 + $0x80] sm:$0xff]  ;;  %v78_v31 = vld [vmem:[%s6775_s0 + $0x98] sm:$0xff] }
  0x31   :  { %5135 = vmatprep.subr.bf16.mxu1 %v6089_v1  ;;  %5115 = vmatprep.subr.bf16.mxu0 %v6089_v1  ;;  %v5647_v29 = vld [vmem:[#allocation2 + $0x28] sm:$0xff]   ;;  %v77_v32 = vld [vmem:[%s6775_s0 + $0x90] sm:$0xff]  ;;  %v5650_v34 = vld [vmem:[#allocation2 + $0x78] sm:$0xff]  }
  0x32   :  { %426 = vperm.xlu1 %5635, %v66_v6   ;;  %423 = vperm.xlu0 %5634, %v65_v7   ;;  %v5649_v33 = vld [vmem:[#allocation2 + $0x30] sm:$0xff]   ;;  %v5652_v35 = vld [vmem:[#allocation2 + $0xc0] sm:$0xff]   ;;  %v5651_v36 = vld [vmem:[#allocation2 + $0x38] sm:$0xff]  }
  0x33   :  { %v5653_v43 = vld [vmem:[#allocation2 + $0xc8] sm:$0xff]   ;;  %v5660_v44 = vld [vmem:[#allocation2 + $0x80] sm:$0xff]   ;;  %v5654_v46 = vld [vmem:[#allocation2 + $0xd0] sm:$0xff]  }
  0x34   :  { %5136 = vmatpush3.bf16.msra.mxu1 %v5640_v15  ;;  %5116 = vmatpush3.bf16.msra.mxu0 %v5641_v17  ;;  %v5661_v47 = vld [vmem:[#allocation2 + $0x88] sm:$0xff]   ;;  %v5655_v48 = vld [vmem:[#allocation2 + $0xd8] sm:$0xff]   ;;  %v5662_v49 = vld [vmem:[#allocation2 + $0x90] sm:$0xff]  }
  0x35   :  { %5137 = vmatprep.subr.bf16.mxu1 %v6089_v1  ;;  %5117 = vmatprep.subr.bf16.mxu0 %v6089_v1  ;;  %v5656_v50 = vld [vmem:[#allocation2 + $0xe0] sm:$0xff]   ;;  %v5663_v51 = vld [vmem:[#allocation2 + $0x98] sm:$0xff]   ;;  %v5657_v54 = vld [vmem:[#allocation2 + $0xe8] sm:$0xff]  }
  0x36   :  { %432 = vperm.xlu1 %5635, %v68_v10   ;;  %429 = vperm.xlu0 %5634, %v67_v12   ;;  %v5664_v55 = vld [vmem:[#allocation2 + $0xa0] sm:$0xff]   ;;  %v5658_v58 = vld [vmem:[#allocation2 + $0xf0] sm:$0xff]   ;;  %v5665_v59 = vld [vmem:[#allocation2 + $0xa8] sm:$0xff]  }
  0x37   :  { %v5659_v60 = vld [vmem:[#allocation2 + $0xf8] sm:$0xff]   ;;  %v5666_v61 = vld [vmem:[#allocation2 + $0xb0] sm:$0xff]   ;;  %v5668_v11 = vld [vmem:[#allocation2 + $0x100] sm:$0xff]  }
  0x38   :  { %5138 = vmatpush3.bf16.msra.mxu1 %v5642_v19  ;;  %5118 = vmatpush3.bf16.msra.mxu0 %v5643_v21  ;;  %v5667_v10 = vld [vmem:[#allocation2 + $0xb8] sm:$0xff]   ;;  %v5669_v12 = vld [vmem:[#allocation2 + $0x140] sm:$0xff]   ;;  %v5671_v13 = vld [vmem:[#allocation2 + $0x148] sm:$0xff]  }
  0x39   :  { %5139 = vmatprep.subr.bf16.mxu1 %v6089_v1  ;;  %5119 = vmatprep.subr.bf16.mxu0 %v6089_v1  ;;  %v5675_v15 = vld [vmem:[#allocation2 + $0x158] sm:$0xff]   ;;  %v5679_v17 = vld [vmem:[#allocation2 + $0x168] sm:$0xff]  }
  0x3a   :  { %438 = vperm.xlu1 %5635, %v70_v14   ;;  %435 = vperm.xlu0 %5634, %v69_v16   ;;  %v5673_v14 = vld [vmem:[#allocation2 + $0x150] sm:$0xff]   ;;  %v5677_v16 = vld [vmem:[#allocation2 + $0x160] sm:$0xff]   ;;  %v5683_v19 = vld [vmem:[#allocation2 + $0x178] sm:$0xff]  }
  0x3c   :  { %5140 = vmatpush3.bf16.msra.mxu1 %v5644_v23  ;;  %5120 = vmatpush3.bf16.msra.mxu0 %v5645_v25 }
  0x3d   :  { %5141 = vmatprep.subr.bf16.mxu1 %v6089_v1  ;;  %5121 = vmatprep.subr.bf16.mxu0 %v6089_v1 }
  0x3e   :  { %444 = vperm.xlu1 %5635, %v72_v18   ;;  %441 = vperm.xlu0 %5634, %v71_v20   ;;  %v5681_v18 = vld [vmem:[#allocation2 + $0x170] sm:$0xff]  }
  0x40   :  { %5142 = vmatpush3.bf16.msra.mxu1 %v5646_v27  ;;  %5122 = vmatpush3.bf16.msra.mxu0 %v5647_v29 }
  0x41   :  { %5143 = vmatprep.subr.bf16.mxu1 %v6089_v1  ;;  %5123 = vmatprep.subr.bf16.mxu0 %v6089_v1 }
  0x42   :  { %450 = vperm.xlu1 %5635, %v74_v22   ;;  %447 = vperm.xlu0 %5634, %v73_v24  }
  0x44   :  { %5144 = vmatpush3.bf16.msra.mxu1 %v5648_v30  ;;  %5124 = vmatpush3.bf16.msra.mxu0 %v5649_v33  ;;  %v5670_v30 = vld [vmem:[#allocation2 + $0x108] sm:$0xff]   ;;  %v5676_v33 = vld [vmem:[#allocation2 + $0x120] sm:$0xff]  }
  0x45   :  { %5145 = vmatprep.subr.bf16.mxu1 %v6089_v1  ;;  %5125 = vmatprep.subr.bf16.mxu0 %v6089_v1 }
  0x46   :  { %456 = vperm.xlu1 %5635, %v76_v26   ;;  %453 = vperm.xlu0 %5634, %v75_v28  }
  0x48   :  { %5146 = vmatpush3.bf16.msra.mxu1 %v5650_v34  ;;  %5126 = vmatpush3.bf16.msra.mxu0 %v5651_v36  ;;  %v5678_v34 = vld [vmem:[#allocation2 + $0x128] sm:$0xff]   ;;  %v5682_v36 = vld [vmem:[#allocation2 + $0x138] sm:$0xff]  }
  0x49   :  { %5171 = vmatprep.subr.bf16.mxu1 %v5652_v35  ;;  %5151 = vmatprep.subr.bf16.mxu0 %v6089_v1 }
  0x4a   :  { %462 = vperm.xlu1 %5635, %v78_v31   ;;  %459 = vperm.xlu0 %5634, %v77_v32   ;;  %v5672_v31 = vld [vmem:[#allocation2 + $0x110] sm:$0xff]   ;;  %v5674_v32 = vld [vmem:[#allocation2 + $0x118] sm:$0xff]  }
  0xa9   :  { %v418_v39 = vpop.permute.xlu1 %417  ;;  %v85_v40 = vpop.permute.xlu0 %84 }
  0xaa   :  { %vm464_vm1 = vcmp.eq.s32.totalorder %v6230_v38, %v418_v39  ;;  %vm89_vm4 = vcmp.eq.s32.totalorder %v6230_v38, %v85_v40 }
  0xad   :  { %v421_v41 = vpop.permute.xlu1 %420  ;;  %v88_v42 = vpop.permute.xlu0 %87 }
  0xae   :  { %vm465_vm2 = vcmp.eq.s32.totalorder %v6230_v38, %v421_v41  ;;  %vm90_vm3 = vcmp.eq.s32.totalorder %v6230_v38, %v88_v42 }
  0xaf   :  { %vm4645_vm5 = vmpackc.low %vm465_vm2, %vm464_vm1 }
  0xb0   :  { %vm4601_vm6 = vmpackc.low %vm90_vm3, %vm89_vm4 }
  0xb1   :  { %5128 = vmatmul.mubr.msk.bf16.vlgmr.msra.gmra.mrb[0].mxu0 %vm4601_vm6, %v6091_v45  ;;  %5148 = vmatmul.mubr.msk.bf16.vlgmr.msra.gmra.mrb[0].mxu1 %vm4601_vm6, %v6091_v45  ;;  %v427_v52 = vpop.permute.xlu1 %426  ;;  %v424_v53 = vpop.permute.xlu0 %423 }
  0xb2   :  { %5172 = vmatpush3.bf16.msra.mxu1 %v5652_v35  ;;  %5187 = vmatprep.mubr.msk.bf16.mxu1 %vm4645_vm5, %v6091_v45  ;;  %vm467_vm7 = vcmp.eq.s32.totalorder %v6230_v38, %v427_v52  ;;  %vm466_vm8 = vcmp.eq.s32.totalorder %v6230_v38, %v424_v53  ;;  %v5680_v35 = vld [vmem:[#allocation2 + $0x130] sm:$0xff]  }
  0xb3   :  { %5173 = vmatprep.subr.bf16.mxu1 %v5653_v43  ;;  %5152 = vmatpush3.bf16.msra.mxu0 %v5660_v44  ;;  %vm4647_vm11 = vmpackc.low %vm467_vm7, %vm466_vm8  ;;  %v5686_v53 = vld [vmem:[#allocation2 + $0x190] sm:$0xff]  }
  0xb4   :  { %5153 = vmatprep.subr.bf16.mxu0 %v6089_v1  ;;  %5167 = vmatprep.mubr.msk.bf16.mxu0 %vm6090_vm0, %v6089_v1 }
  0xb5   :  { %v433_v56 = vpop.permute.xlu1 %432  ;;  %v430_v57 = vpop.permute.xlu0 %429 }
  0xb6   :  { %5174 = vmatpush3.bf16.msra.mxu1 %v5653_v43  ;;  %vm469_vm9 = vcmp.eq.s32.totalorder %v6230_v38, %v433_v56  ;;  %vm468_vm10 = vcmp.eq.s32.totalorder %v6230_v38, %v430_v57 }
  0xb7   :  { %5175 = vmatprep.subr.bf16.mxu1 %v5654_v46  ;;  %5154 = vmatpush3.bf16.msra.mxu0 %v5661_v47  ;;  %vm4649_vm12 = vmpackc.low %vm469_vm9, %vm468_vm10  ;;  %v5685_v47 = vld [vmem:[#allocation2 + $0x188] sm:$0xff]  }
  0xb8   :  { %5155 = vmatprep.subr.bf16.mxu0 %v6089_v1 }
  0xb9   :  { %v439_v62 = vpop.permute.xlu1 %438  ;;  %v436_v63 = vpop.permute.xlu0 %435 }
  0xba   :  { %5176 = vmatpush3.bf16.msra.mxu1 %v5654_v46  ;;  %vm471_vm13 = vcmp.eq.s32.totalorder %v6230_v38, %v439_v62  ;;  %vm470_vm14 = vcmp.eq.s32.totalorder %v6230_v38, %v436_v63  ;;  %v5689_v63 = vld [vmem:[#allocation2 + $0x1a8] sm:$0xff]  }
  0xbb   :  { %5177 = vmatprep.subr.bf16.mxu1 %v5655_v48  ;;  %5156 = vmatpush3.bf16.msra.mxu0 %v5662_v49  ;;  %vm4651_vm2 = vmpackc.low %vm471_vm13, %vm470_vm14  ;;  %vm1985_vm13 = vcmask 1043456   ;;  %vm1957_vm14 = vcmask 64512  }
  0xbc   :  { %5157 = vmatprep.subr.bf16.mxu0 %v6089_v1 }
  0xbd   :  { %v445_v2 = vpop.permute.xlu1 %444  ;;  %v442_v3 = vpop.permute.xlu0 %441 }
  0xbe   :  { %5178 = vmatpush3.bf16.msra.mxu1 %v5655_v48  ;;  %vm473_vm15 = vcmp.eq.s32.totalorder %v6230_v38, %v445_v2  ;;  %vm472_vm1 = vcmp.eq.s32.totalorder %v6230_v38, %v442_v3 }
  0xbf   :  { %5179 = vmatprep.subr.bf16.mxu1 %v5656_v50  ;;  %5158 = vmatpush3.bf16.msra.mxu0 %v5663_v51  ;;  %vm4653_vm3 = vmpackc.low %vm473_vm15, %vm472_vm1  ;;  %vm4569_vm1 = vcmask 0  }
  0xc0   :  { %5159 = vmatprep.subr.bf16.mxu0 %v6089_v1 }
  0xc1   :  { %v451_v4 = vpop.permute.xlu1 %450  ;;  %v448_v5 = vpop.permute.xlu0 %447 }
  0xc2   :  { %5180 = vmatpush3.bf16.msra.mxu1 %v5656_v50  ;;  %vm475_vm4 = vcmp.eq.s32.totalorder %v6230_v38, %v451_v4  ;;  %vm474_vm5 = vcmp.eq.s32.totalorder %v6230_v38, %v448_v5 }
  0xc3   :  { %5181 = vmatprep.subr.bf16.mxu1 %v5657_v54  ;;  %5160 = vmatpush3.bf16.msra.mxu0 %v5664_v55  ;;  %vm4655_vm8 = vmpackc.low %vm475_vm4, %vm474_vm5  ;;  %v5687_v55 = vld [vmem:[#allocation2 + $0x198] sm:$0xff]  }
  0xc4   :  { %5161 = vmatprep.subr.bf16.mxu0 %v6089_v1 }
  0xc5   :  { %v457_v6 = vpop.permute.xlu1 %456  ;;  %v454_v7 = vpop.permute.xlu0 %453 }
  0xc6   :  { %5182 = vmatpush3.bf16.msra.mxu1 %v5657_v54  ;;  %vm477_vm6 = vcmp.eq.s32.totalorder %v6230_v38, %v457_v6  ;;  %vm476_vm7 = vcmp.eq.s32.totalorder %v6230_v38, %v454_v7  ;;  %v5690_v7 = vld [vmem:[#allocation2 + $0x1b0] sm:$0xff]  }
  0xc7   :  { %5183 = vmatprep.subr.bf16.mxu1 %v5658_v58  ;;  %5162 = vmatpush3.bf16.msra.mxu0 %v5665_v59  ;;  %vm4657_vm9 = vmpackc.low %vm477_vm6, %vm476_vm7 }
  0xc8   :  { %5163 = vmatprep.subr.bf16.mxu0 %v6089_v1 }
  0xc9   :  { %v463_v8 = vpop.permute.xlu1 %462  ;;  %v460_v9 = vpop.permute.xlu0 %459 }
  0xca   :  { %5184 = vmatpush3.bf16.msra.mxu1 %v5658_v58  ;;  %vm479_vm10 = vcmp.eq.s32.totalorder %v6230_v38, %v463_v8  ;;  %v5691_v8 = vld [vmem:[#allocation2 + $0x1b8] sm:$0xff]  }
  0xcb   :  { %5185 = vmatprep.subr.bf16.mxu1 %v5659_v60  ;;  %5164 = vmatpush3.bf16.msra.mxu0 %v5666_v61  ;;  %v5688_v61 = vld [vmem:[#allocation2 + $0x1a0] sm:$0xff]  }
  0xcc   :  { %5165 = vmatprep.subr.bf16.mxu0 %v6089_v1 }
  0xce   :  { %5186 = vmatpush3.bf16.msra.mxu1 %v5659_v60 }
  0xcf   :  { %5166 = vmatpush3.bf16.msra.mxu0 %v5667_v10  ;;  %5235 = vmatprep.subr.bf16.mxu1 %v5669_v12  ;;  %v5693_v10 = vld [vmem:[#allocation2 + $0x1c8] sm:$0xff]  }
  0xd0   :  { %5203 = vmatprep.subr.bf16.mxu0 %v5668_v11 }
  0xd1   :  { %5188 = vmatmul.mubr.msk.bf16.vlgmr.msra.gmra.mrb[4].mxu1 %vm4647_vm11, %v6091_v45  ;;  %vm478_vm11 = vcmp.eq.s32.totalorder %v6230_v38, %v460_v9  ;;  %v5692_v9 = vld [vmem:[#allocation2 + $0x1c0] sm:$0xff]  }
  0xd2   :  { %5191 = vmatprep.mubr.msk.bf16.mxu1 %vm4649_vm12, %v6091_v45  ;;  %vm4659_vm12 = vmpackc.low %vm479_vm10, %vm478_vm11  ;;  %5236 = vmatpush3.bf16.msra.mxu1 %v5669_v12  ;;  %v5695_v12 = vld [vmem:[#allocation2 + $0x1d8] sm:$0xff]  }
  0xd3   :  { %5237 = vmatprep.subr.bf16.mxu1 %v5671_v13 }
  0xd6   :  { %5238 = vmatpush3.bf16.msra.mxu1 %v5671_v13  ;;  %v5696_v13 = vld [vmem:[#allocation2 + $0x1e0] sm:$0xff]  }
  0xd7   :  { %5239 = vmatprep.subr.bf16.mxu1 %v5673_v14 }
  0xd9   :  { %5192 = vmatmul.mubr.msk.bf16.gmra.mrb[8].mxu1 %vm4651_vm2, %v6091_v45 }
  0xda   :  { %5195 = vmatprep.mubr.msk.bf16.mxu1 %vm4653_vm3, %v6091_v45  ;;  %5240 = vmatpush3.bf16.msra.mxu1 %v5673_v14  ;;  %v5697_v14 = vld [vmem:[#allocation2 + $0x1e8] sm:$0xff]  }
  0xdb   :  { %5241 = vmatprep.subr.bf16.mxu1 %v5675_v15 }
  0xde   :  { %5242 = vmatpush3.bf16.msra.mxu1 %v5675_v15  ;;  %v5698_v15 = vld [vmem:[#allocation2 + $0x1f0] sm:$0xff]  }
  0xdf   :  { %5243 = vmatprep.subr.bf16.mxu1 %v5677_v16 }
  0xe1   :  { %5196 = vmatmul.mubr.msk.bf16.gmra.mrb[12].mxu1 %vm4655_vm8, %v6091_v45 }
  0xe2   :  { %5199 = vmatprep.mubr.msk.bf16.mxu1 %vm4657_vm9, %v6091_v45  ;;  %5244 = vmatpush3.bf16.msra.mxu1 %v5677_v16  ;;  %v5699_v16 = vld [vmem:[#allocation2 + $0x1f8] sm:$0xff]  }
  0xe3   :  { %5245 = vmatprep.subr.bf16.mxu1 %v5679_v17 }
  0xe6   :  { %5246 = vmatpush3.bf16.msra.mxu1 %v5679_v17  ;;  %v6301_v17 = vshrl.u32 %v81_v37, 7 }
  0xe7   :  { %5247 = vmatprep.subr.bf16.mxu1 %v5681_v18 }
  0xe9   :  { %5200 = vmatmul.mubr.msk.bf16.gmra.mrb[16].mxu1 %vm4659_vm12, %v6091_v45  ;;  %v5684_v45 = vld [vmem:[#allocation2 + $0x180] sm:$0xff]  }
  0xea   :  { %5248 = vmatpush3.bf16.msra.mxu1 %v5681_v18  ;;  %v6304_v18 = vsub.s32 1, %v6301_v17 }
  0xeb   :  { %5249 = vmatprep.subr.bf16.mxu1 %v5683_v19 }
  0xee   :  { %5250 = vmatpush3.bf16.msra.mxu1 %v5683_v19  ;;  %v6309_v19 = vld [vmem:[%s6779_s4] sm:$0xff] }
  0xef   :  { %5287 = vmatprep.subr.bf16.mxu1 %v6089_v1 }
 0x184   :  { %v6270_v20 = vpop.f32.mrb[0].mxu0  ;;  %v299_v21 = vpop.f32.mrb[0].mxu1 }
 0x185   :  { %v5129_v22 = vpop.f32.mrb[1].mxu0  ;;  %v5149_v23 = vpop.f32.mrb[1].mxu1 }
 0x186   :  { %v6272_v24 = vpop.f32.mrb[2].mxu0  ;;  %v302_v25 = vpop.f32.mrb[2].mxu1 }
 0x187   :  { %v1051_v26 = vpack.c.bf16 %v6272_v24, %v6270_v20  ;;  %v306_v27 = vpack.c.bf16 %v302_v25, %v299_v21  ;;  %v5130_v28 = vpop.f32.mrb[3].mxu0  ;;  %v5150_v29 = vpop.f32.mrb[3].mxu1  ;;  %v326_v20 = vrot.slane %v6309_v19, %v6304_v18 }
 0x189   :  { %5168 = vmatmul.mubr.bf16.vlgmr.msra.gmra.mrb[4].mxu0 %v306_v27 }
 0x18a   :  { %5204 = vmatpush3.bf16.msra.mxu0 %v5668_v11  ;;  %v5694_v11 = vld [vmem:[#allocation2 + $0x1d0] sm:$0xff]  }
 0x18b   :  { %5205 = vmatprep.subr.bf16.mxu0 %v5670_v30 }
 0x18e   :  { %5206 = vmatpush3.bf16.msra.mxu0 %v5670_v30 }
 0x18f   :  { %5207 = vmatprep.subr.bf16.mxu0 %v5672_v31 }
 0x192   :  { %5208 = vmatpush3.bf16.msra.mxu0 %v5672_v31 }
 0x193   :  { %5209 = vmatprep.subr.bf16.mxu0 %v5674_v32 }
 0x196   :  { %5210 = vmatpush3.bf16.msra.mxu0 %v5674_v32 }
 0x197   :  { %5211 = vmatprep.subr.bf16.mxu0 %v5676_v33 }
 0x19a   :  { %5212 = vmatpush3.bf16.msra.mxu0 %v5676_v33 }
 0x19b   :  { %5213 = vmatprep.subr.bf16.mxu0 %v5678_v34 }
 0x19e   :  { %5214 = vmatpush3.bf16.msra.mxu0 %v5678_v34 }
 0x19f   :  { %5215 = vmatprep.subr.bf16.mxu0 %v5680_v35 }
 0x1a2   :  { %5216 = vmatpush3.bf16.msra.mxu0 %v5680_v35 }
 0x1a3   :  { %5217 = vmatprep.subr.bf16.mxu0 %v5682_v36 }
 0x1a4   :  { %v5189_v39 = vpop.f32.mrb[4].mxu1 }
 0x1a5   :  { %v618_v40 = vpop.f32.mrb[5].mxu1 }
 0x1a6   :  { %v5190_v41 = vpop.f32.mrb[6].mxu1  ;;  %5218 = vmatpush3.bf16.msra.mxu0 %v5682_v36  ;;  %v6320_v36 = vsub.s32 0, %v6301_v17 }
 0x1a7   :  { %v682_v42 = vpack.c.bf16 %v5190_v41, %v5189_v39  ;;  %v621_v43 = vpop.f32.mrb[7].mxu1  ;;  %5267 = vmatprep.subr.bf16.mxu0 %v6089_v1 }
 0x1a8   :  { %v681_v44 = vpack.c.bf16 %v621_v43, %v618_v40  ;;  %v1012_v40 = vrot.slane %v6309_v19, %v6320_v36 }
 0x1aa   :  { %5219 = vmatprep.mubr.bf16.mxu0 %v681_v44  ;;  %5251 = vmatprep.mubr.bf16.mxu1 %v681_v44 }
 0x1ab   :  { %5220 = vmatmul.mubr.bf16.vlgmr.msra.gmra.mrb[8].mxu0 %v682_v42  ;;  %5252 = vmatmul.mubr.bf16.vlgmr.msra.gmra.mrb[20].mxu1 %v682_v42 }
 0x1ac   :  { %v5193_v46 = vpop.f32.mrb[8].mxu1  ;;  %5288 = vmatpush3.bf16.msra.mxu1 %v5684_v45  ;;  %5268 = vmatpush3.bf16.msra.mxu0 %v5692_v9 }
 0x1ad   :  { %v634_v48 = vpop.f32.mrb[9].mxu1  ;;  %5289 = vmatprep.subr.bf16.mxu1 %v6089_v1  ;;  %5269 = vmatprep.subr.bf16.mxu0 %v6089_v1 }
 0x1ae   :  { %v5194_v49 = vpop.f32.mrb[10].mxu1 }
 0x1af   :  { %v684_v50 = vpack.c.bf16 %v5194_v49, %v5193_v46  ;;  %v637_v51 = vpop.f32.mrb[11].mxu1 }
 0x1b0   :  { %v683_v52 = vpack.c.bf16 %v637_v51, %v634_v48  ;;  %5290 = vmatpush3.bf16.msra.mxu1 %v5685_v47  ;;  %5270 = vmatpush3.bf16.msra.mxu0 %v5693_v10 }
 0x1b1   :  { %5291 = vmatprep.subr.bf16.mxu1 %v6089_v1  ;;  %5271 = vmatprep.subr.bf16.mxu0 %v6089_v1 }
 0x1b2   :  { %5223 = vmatprep.mubr.bf16.mxu0 %v683_v52  ;;  %5255 = vmatprep.mubr.bf16.mxu1 %v683_v52 }
 0x1b3   :  { %5224 = vmatmul.mubr.bf16.gmra.mrb[12].mxu0 %v684_v50  ;;  %5256 = vmatmul.mubr.bf16.gmra.mrb[24].mxu1 %v684_v50 }
 0x1b4   :  { %v5197_v54 = vpop.f32.mrb[12].mxu1  ;;  %5292 = vmatpush3.bf16.msra.mxu1 %v5686_v53  ;;  %5272 = vmatpush3.bf16.msra.mxu0 %v5694_v11 }
 0x1b5   :  { %v650_v56 = vpop.f32.mrb[13].mxu1  ;;  %5293 = vmatprep.subr.bf16.mxu1 %v6089_v1  ;;  %5273 = vmatprep.subr.bf16.mxu0 %v6089_v1 }
 0x1b6   :  { %v5198_v57 = vpop.f32.mrb[14].mxu1 }
 0x1b7   :  { %v686_v58 = vpack.c.bf16 %v5198_v57, %v5197_v54  ;;  %v653_v59 = vpop.f32.mrb[15].mxu1 }
 0x1b8   :  { %v685_v60 = vpack.c.bf16 %v653_v59, %v650_v56  ;;  %5294 = vmatpush3.bf16.msra.mxu1 %v5687_v55  ;;  %5274 = vmatpush3.bf16.msra.mxu0 %v5695_v12 }
 0x1b9   :  { %5295 = vmatprep.subr.bf16.mxu1 %v6089_v1  ;;  %5275 = vmatprep.subr.bf16.mxu0 %v6089_v1 }
 0x1ba   :  { %5227 = vmatprep.mubr.bf16.mxu0 %v685_v60  ;;  %5259 = vmatprep.mubr.bf16.mxu1 %v685_v60 }
 0x1bb   :  { %5228 = vmatmul.mubr.bf16.gmra.mrb[16].mxu0 %v686_v58  ;;  %5260 = vmatmul.mubr.bf16.gmra.mrb[28].mxu1 %v686_v58 }
 0x1bc   :  { %v5201_v62 = vpop.f32.mrb[16].mxu1  ;;  %5296 = vmatpush3.bf16.msra.mxu1 %v5688_v61  ;;  %5276 = vmatpush3.bf16.msra.mxu0 %v5696_v13 }
 0x1bd   :  { %v666_v2 = vpop.f32.mrb[17].mxu1  ;;  %5297 = vmatprep.subr.bf16.mxu1 %v6089_v1  ;;  %5277 = vmatprep.subr.bf16.mxu0 %v6089_v1 }
 0x1be   :  { %v5202_v3 = vpop.f32.mrb[18].mxu1 }
 0x1bf   :  { %v688_v4 = vpack.c.bf16 %v5202_v3, %v5201_v62  ;;  %v669_v5 = vpop.f32.mrb[19].mxu1 }
 0x1c0   :  { %v687_v6 = vpack.c.bf16 %v669_v5, %v666_v2  ;;  %5298 = vmatpush3.bf16.msra.mxu1 %v5689_v63  ;;  %5278 = vmatpush3.bf16.msra.mxu0 %v5697_v14 }
 0x1c1   :  { %5299 = vmatprep.subr.bf16.mxu1 %v6089_v1  ;;  %5279 = vmatprep.subr.bf16.mxu0 %v6089_v1 }
 0x1c2   :  { %5231 = vmatprep.mubr.bf16.mxu0 %v687_v6  ;;  %5263 = vmatprep.mubr.bf16.mxu1 %v687_v6 }
 0x1c3   :  { %5232 = vmatmul.mubr.bf16.gmra.mrb[20].mxu0 %v688_v4  ;;  %5264 = vmatmul.mubr.bf16.gmra.mrb[32].mxu1 %v688_v4 }
 0x1c4   :  { %5300 = vmatpush3.bf16.msra.mxu1 %v5690_v7  ;;  %5303 = vmatprep.mubr.msk.bf16.mxu1 %vm6090_vm0, %v6089_v1 }
 0x1c5   :  { %5301 = vmatprep.subr.bf16.mxu1 %v6089_v1  ;;  %5283 = vmatprep.mubr.msk.bf16.mxu0 %vm6090_vm0, %v6089_v1 }
 0x1c6   :  { %5280 = vmatpush3.bf16.msra.mxu0 %v5698_v15 }
 0x1c7   :  { %5281 = vmatprep.subr.bf16.mxu0 %v6089_v1 }
 0x1c8   :  { %5302 = vmatpush3.bf16.msra.mxu1 %v5691_v8 }
 0x1ca   :  { %5282 = vmatpush3.bf16.msra.mxu0 %v5699_v16 }
 0x1cb   :  { %5304 = vmatmul.mubr.bf16.vlgmr.msra.gmra.mrb[36].mxu1 %v1051_v26  ;;  %5307 = vmatprep.subr.bf16.mxu0 %v6089_v1 }
 0x1cc   :  { %1740 = vmatprep.mubr.bf16.mxu1 %v6088_v0 }
 0x25c   :  { %v409_v21 = vpop.f32.mrb[4].mxu0 }
 0x25d   :  { %v5169_v22 = vpop.f32.mrb[5].mxu0  ;;  %v6313_v24 = vadd.f32 %v409_v21, %v326_v20 }
 0x25e   :  { %v412_v23 = vpop.f32.mrb[6].mxu0 }
 0x25f   :  { %v6315_v25 = vadd.f32 %v412_v23, %v326_v20  ;;  %v5170_v37 = vpop.f32.mrb[7].mxu0 }
 0x261   :  { %v1263_v26 = vpack.c.bf16 %v6315_v25, %v6313_v24  ;;  %v57_v24 = vld [vmem:[%s6779_s4 + $0x28] sm:$0xff] }
 0x27e   :  { %v5221_v27 = vpop.f32.mrb[8].mxu0  ;;  %v5253_v28 = vpop.f32.mrb[20].mxu1 }
 0x27f   :  { %v787_v29 = vpop.f32.mrb[9].mxu0  ;;  %v946_v30 = vpop.f32.mrb[21].mxu1 }
 0x280   :  { %v1007_v31 = vadd.f32 %v5253_v28, %v787_v29  ;;  %v5222_v32 = vpop.f32.mrb[10].mxu0  ;;  %v5254_v33 = vpop.f32.mrb[22].mxu1 }
 0x281   :  { %v790_v34 = vpop.f32.mrb[11].mxu0  ;;  %v948_v35 = vpop.f32.mrb[23].mxu1 }
 0x282   :  { %v1008_v39 = vadd.f32 %v5254_v33, %v790_v34  ;;  %v1013_v51 = vadd.f32 %v1012_v40, %v1007_v31 }
 0x284   :  { %v1014_v55 = vadd.f32 %v1012_v40, %v1008_v39 }
 0x286   :  { %v5225_v41 = vpop.f32.mrb[12].mxu0  ;;  %v5257_v42 = vpop.f32.mrb[24].mxu1 }
 0x287   :  { %v803_v43 = vpop.f32.mrb[13].mxu0  ;;  %v960_v44 = vpop.f32.mrb[25].mxu1 }
 0x288   :  { %v1021_v45 = vadd.f32 %v5257_v42, %v803_v43  ;;  %v1015_v46 = vadd.f32 %v5221_v27, %v960_v44  ;;  %v5226_v47 = vpop.f32.mrb[14].mxu0  ;;  %v5258_v48 = vpop.f32.mrb[26].mxu1 }
 0x289   :  { %v806_v49 = vpop.f32.mrb[15].mxu0  ;;  %v963_v50 = vpop.f32.mrb[27].mxu1 }
 0x28a   :  { %v1017_v52 = vadd.f32 %v1015_v46, %v1012_v40  ;;  %v1022_v53 = vadd.f32 %v5258_v48, %v806_v49  ;;  %v1016_v54 = vadd.f32 %v5222_v32, %v963_v50  ;;  %v1023_v56 = vadd.f32 %v1021_v45, %v1012_v40 }
 0x28c   :  { %v1019_v57 = vmax.f32 %v1013_v51, %v1017_v52  ;;  %v1018_v58 = vadd.f32 %v1016_v54, %v1012_v40  ;;  %v1024_v59 = vadd.f32 %v1022_v53, %v1012_v40  ;;  %v5700_v54 = vld [vmem:[#allocation2 + $0x200] sm:$0xff]  }
 0x28e   :  { %v1020_v60 = vmax.f32 %v1014_v55, %v1018_v58  ;;  %v5229_v61 = vpop.f32.mrb[16].mxu0  ;;  %v5261_v62 = vpop.f32.mrb[28].mxu1  ;;  %v1025_v63 = vmax.f32 %v1019_v57, %v1023_v56  ;;  %v5701_v56 = vld [vmem:[#allocation2 + $0x208] sm:$0xff]   ;;  %v5702_v57 = vld [vmem:[#allocation2 + $0x210] sm:$0xff]   ;;  %v5704_v58 = vld [vmem:[#allocation2 + $0x220] sm:$0xff]  }
 0x28f   :  { %v819_v2 = vpop.f32.mrb[17].mxu0  ;;  %v976_v3 = vpop.f32.mrb[29].mxu1 }
 0x290   :  { %v1033_v4 = vadd.f32 %v5261_v62, %v819_v2  ;;  %v1027_v5 = vadd.f32 %v5225_v41, %v976_v3  ;;  %v5230_v6 = vpop.f32.mrb[18].mxu0  ;;  %v5262_v7 = vpop.f32.mrb[30].mxu1  ;;  %v1026_v8 = vmax.f32 %v1020_v60, %v1024_v59  ;;  %v5705_v59 = vld [vmem:[#allocation2 + $0x228] sm:$0xff]   ;;  %v5706_v60 = vld [vmem:[#allocation2 + $0x230] sm:$0xff]  }
 0x291   :  { %v822_v9 = vpop.f32.mrb[19].mxu0  ;;  %v979_v10 = vpop.f32.mrb[31].mxu1 }
 0x292   :  { %v1029_v11 = vadd.f32 %v1027_v5, %v1012_v40  ;;  %v1034_v12 = vadd.f32 %v5262_v7, %v822_v9  ;;  %v1028_v13 = vadd.f32 %v5226_v47, %v979_v10  ;;  %v1035_v14 = vadd.f32 %v1033_v4, %v1012_v40 }
 0x294   :  { %v1031_v15 = vmax.f32 %v1025_v63, %v1029_v11  ;;  %v1030_v16 = vadd.f32 %v1028_v13, %v1012_v40  ;;  %v1036_v20 = vadd.f32 %v1034_v12, %v1012_v40  ;;  %v58_v13 = vld [vmem:[%s6779_s4 + $0x30] sm:$0xff] }
 0x296   :  { %v1032_v21 = vmax.f32 %v1026_v8, %v1030_v16  ;;  %v5233_v22 = vpop.f32.mrb[20].mxu0  ;;  %v5265_v23 = vpop.f32.mrb[32].mxu1  ;;  %v1037_v37 = vmax.f32 %v1031_v15, %v1035_v14 }
 0x297   :  { %v835_v27 = vpop.f32.mrb[21].mxu0  ;;  %v992_v28 = vpop.f32.mrb[33].mxu1  ;;  %v5710_v22 = vld [vmem:[#allocation5 + $0x4] ss:$24 sps:$4 sm:$0xff]  }
 0x298   :  { %v1045_v29 = vadd.f32 %v5265_v23, %v835_v27  ;;  %v1039_v30 = vadd.f32 %v5229_v61, %v992_v28  ;;  %v5234_v31 = vpop.f32.mrb[22].mxu0  ;;  %v5266_v32 = vpop.f32.mrb[34].mxu1  ;;  %v1038_v33 = vmax.f32 %v1032_v21, %v1036_v20  ;;  %v5707_v61 = vld [vmem:[#allocation2 + $0x238] sm:$0xff]   ;;  %1708 = vmatprep.subr.bf16.mxu1 %v5710_v22  ;;  %v5711_v27 = vld [vmem:[#allocation5 + $0x8] ss:$24 sps:$4 sm:$0xff]   ;;  %v6366_v22 = vsub.s32 4, %v6301_v17 }
 0x299   :  { %v838_v34 = vpop.f32.mrb[23].mxu0  ;;  %v995_v35 = vpop.f32.mrb[35].mxu1  ;;  %v5708_v23 = vld [vmem:[#allocation5] ss:$24 sps:$4 sm:$0xff]   ;;  %v5716_v28 = vld [vmem:[#allocation5 + $0x34] ss:$24 sps:$4 sm:$0xff]  }
 0x29a   :  { %v1041_v39 = vadd.f32 %v1039_v30, %v1012_v40  ;;  %v1046_v41 = vadd.f32 %v5266_v32, %v838_v34  ;;  %v1040_v42 = vadd.f32 %v5230_v6, %v995_v35  ;;  %v1047_v43 = vadd.f32 %v1045_v29, %v1012_v40  ;;  %1709 = vmatpush1.bf16.msra.mxu1 %v5708_v23  ;;  %v5714_v29 = vld [vmem:[#allocation5 + $0x30] ss:$24 sps:$4 sm:$0xff]   ;;  %v5719_v30 = vld [vmem:[#allocation5 + $0x3c] ss:$24 sps:$4 sm:$0xff]   ;;  %v5725_v34 = vld [vmem:[#allocation5 + $0x6c] ss:$24 sps:$4 sm:$0xff]  }
 0x29b   :  { %v6338_v6 = vsub.s32 2, %v6301_v17  ;;  %1710 = vmatprep.subr.bf16.mxu1 %v5716_v28  ;;  %v5717_v31 = vld [vmem:[#allocation5 + $0x38] ss:$24 sps:$4 sm:$0xff]   ;;  %v5722_v32 = vld [vmem:[#allocation5 + $0x64] ss:$24 sps:$4 sm:$0xff]  }
 0x29c   :  { %v1043_v44 = vmax.f32 %v1037_v37, %v1041_v39  ;;  %v1042_v45 = vadd.f32 %v1040_v42, %v1012_v40  ;;  %v1048_v47 = vadd.f32 %v1046_v41, %v1012_v40  ;;  %v5703_v40 = vld [vmem:[#allocation2 + $0x218] sm:$0xff]   ;;  %v5713_v37 = vld [vmem:[#allocation5 + $0xc] ss:$24 sps:$4 sm:$0xff]   ;;  %v5723_v35 = vld [vmem:[#allocation5 + $0x68] ss:$24 sps:$4 sm:$0xff]  }
 0x29d   :  { %v1374_v7 = vrot.slane %v6309_v19, %v6338_v6  ;;  %v5728_v39 = vld [vmem:[#allocation5 + $0x94] ss:$24 sps:$4 sm:$0xff]   ;;  %v5726_v41 = vld [vmem:[#allocation5 + $0x90] ss:$24 sps:$4 sm:$0xff]  }
 0x29e   :  { %v1049_v46 = vmax.f32 %v1043_v44, %v1047_v43  ;;  %v1044_v48 = vmax.f32 %v1038_v33, %v1042_v45  ;;  %v1256_v49 = vpop.f32.mrb[36].mxu1  ;;  %1711 = vmatpush1.bf16.msra.mxu1 %v5714_v29  ;;  %v5720_v33 = vld [vmem:[#allocation5 + $0x60] ss:$24 sps:$4 sm:$0xff]   ;;  %v5731_v42 = vld [vmem:[#allocation5 + $0x9c] ss:$24 sps:$4 sm:$0xff]   ;;  %v1416_v29 = vrot.slane %v6309_v19, %v6366_v22 }
 0x29f   :  { %v5305_v50 = vpop.f32.mrb[37].mxu1  ;;  %1712 = vmatprep.subr.bf16.mxu1 %v5722_v32  ;;  %v5729_v43 = vld [vmem:[#allocation5 + $0x98] ss:$24 sps:$4 sm:$0xff]   ;;  %v5734_v45 = vld [vmem:[#allocation5 + $0xc4] ss:$24 sps:$4 sm:$0xff]  }
 0x2a0   :  { %v1050_v51 = vmax.f32 %v1044_v48, %v1048_v47  ;;  %v1259_v52 = vpop.f32.mrb[38].mxu1  ;;  %v5732_v44 = vld [vmem:[#allocation5 + $0xc0] ss:$24 sps:$4 sm:$0xff]   ;;  %v5737_v47 = vld [vmem:[#allocation5 + $0xcc] ss:$24 sps:$4 sm:$0xff]  }
 0x2a1   :  { %v5306_v53 = vpop.f32.mrb[39].mxu1  ;;  %v5740_v48 = vld [vmem:[#allocation5 + $0xf4] ss:$24 sps:$4 sm:$0xff]   ;;  %v5738_v50 = vld [vmem:[#allocation5 + $0xf0] ss:$24 sps:$4 sm:$0xff]  }
 0x2a2   :  { %v1068_v55 = vpack.c.bf16 %v1050_v51, %v1049_v46  ;;  %1713 = vmatpush1.bf16.msra.mxu1 %v5720_v33  ;;  %v5735_v46 = vld [vmem:[#allocation5 + $0xc8] ss:$24 sps:$4 sm:$0xff]   ;;  %v5741_v51 = vld [vmem:[#allocation5 + $0xf8] ss:$24 sps:$4 sm:$0xff]   ;;  %v5749_v53 = vld [vmem:[#allocation5 + $0x12c] ss:$24 sps:$4 sm:$0xff]  }
 0x2a3   :  { %1714 = vmatprep.subr.bf16.mxu1 %v5728_v39  ;;  %v5756_v32 = vld [vmem:[#allocation5 + $0x10] ss:$24 sps:$4 sm:$0xff]  }
 0x2a4   :  { %5284 = vmatmul.mubr.bf16.vlgmr.msra.gmra.mrb[24].mxu0 %v1068_v55  ;;  %v5747_v55 = vld [vmem:[#allocation5 + $0x128] ss:$24 sps:$4 sm:$0xff]  }
 0x2a5   :  { %5308 = vmatpush3.bf16.msra.mxu0 %v5700_v54  ;;  %5323 = vmatprep.mubr.msk.bf16.mxu0 %vm6090_vm0, %v6089_v1  ;;  %v5744_v54 = vld [vmem:[#allocation5 + $0x120] ss:$24 sps:$4 sm:$0xff]   ;;  %v5762_v39 = vld [vmem:[#allocation5 + $0x70] ss:$24 sps:$4 sm:$0xff]  }
 0x2a6   :  { %5309 = vmatprep.subr.bf16.mxu0 %v6089_v1  ;;  %1715 = vmatpush1.bf16.msra.mxu1 %v5726_v41  ;;  %v5767_v41 = vld [vmem:[#allocation5 + $0xa4] ss:$24 sps:$4 sm:$0xff]  }
 0x2a7   :  { %1716 = vmatprep.subr.bf16.mxu1 %v5734_v45  ;;  %v5773_v45 = vld [vmem:[#allocation5 + $0x104] ss:$24 sps:$4 sm:$0xff]  }
 0x2a9   :  { %5310 = vmatpush3.bf16.msra.mxu0 %v5701_v56  ;;  %v5752_v56 = vld [vmem:[#allocation5 + $0x154] ss:$24 sps:$4 sm:$0xff]  }
 0x2aa   :  { %5311 = vmatprep.subr.bf16.mxu0 %v6089_v1  ;;  %1717 = vmatpush1.bf16.msra.mxu1 %v5732_v44  ;;  %v5768_v44 = vld [vmem:[#allocation5 + $0xd0] ss:$24 sps:$4 sm:$0xff]  }
 0x2ab   :  { %1718 = vmatprep.subr.bf16.mxu1 %v5740_v48  ;;  %v5774_v48 = vld [vmem:[#allocation5 + $0x130] ss:$24 sps:$4 sm:$0xff]  }
 0x2ad   :  { %5312 = vmatpush3.bf16.msra.mxu0 %v5702_v57  ;;  %v5755_v57 = vld [vmem:[#allocation5 + $0x15c] ss:$24 sps:$4 sm:$0xff]  }
 0x2ae   :  { %5313 = vmatprep.subr.bf16.mxu0 %v6089_v1  ;;  %1719 = vmatpush1.bf16.msra.mxu1 %v5738_v50  ;;  %v5777_v50 = vld [vmem:[#allocation5 + $0x160] ss:$24 sps:$4 sm:$0xff]  }
 0x2b1   :  { %5314 = vmatpush3.bf16.msra.mxu0 %v5703_v40  ;;  %v5750_v40 = vld [vmem:[#allocation5 + $0x150] ss:$24 sps:$4 sm:$0xff]  }
 0x2b2   :  { %5315 = vmatprep.subr.bf16.mxu0 %v6089_v1 }
 0x2b5   :  { %5316 = vmatpush3.bf16.msra.mxu0 %v5704_v58  ;;  %v5753_v58 = vld [vmem:[#allocation5 + $0x158] ss:$24 sps:$4 sm:$0xff]  }
 0x2b6   :  { %5317 = vmatprep.subr.bf16.mxu0 %v6089_v1 }
 0x2b9   :  { %5318 = vmatpush3.bf16.msra.mxu0 %v5705_v59  ;;  %v5758_v59 = vld [vmem:[#allocation5 + $0x14] ss:$24 sps:$4 sm:$0xff]  }
 0x2ba   :  { %5319 = vmatprep.subr.bf16.mxu0 %v6089_v1 }
 0x2bd   :  { %5320 = vmatpush3.bf16.msra.mxu0 %v5706_v60 }
 0x2be   :  { %5321 = vmatprep.subr.bf16.mxu0 %v6089_v1 }
 0x2c1   :  { %5322 = vmatpush3.bf16.msra.mxu0 %v5707_v61 }
 0x2c2   :  { %1751 = vmatprep.subr.bf16.mxu0 %v5713_v37 }
 0x2c4   :  { %5324 = vmatmul.mubr.bf16.vlgmr.msra.gmra.mrb[28].mxu0 %v1263_v26 }
 0x2c5   :  { %1783 = vmatprep.mubr.bf16.mxu0 %v6088_v0  ;;  %1752 = vmatpush1.bf16.msra.mxu0 %v5711_v27 }
 0x2c6   :  { %1753 = vmatprep.subr.bf16.mxu0 %v5719_v30 }
 0x2c9   :  { %1754 = vmatpush1.bf16.msra.mxu0 %v5717_v31 }
 0x2ca   :  { %1755 = vmatprep.subr.bf16.mxu0 %v5725_v34  ;;  %v5761_v34 = vld [vmem:[#allocation5 + $0x44] ss:$24 sps:$4 sm:$0xff]  }
 0x2cd   :  { %1756 = vmatpush1.bf16.msra.mxu0 %v5723_v35  ;;  %v5764_v35 = vld [vmem:[#allocation5 + $0x74] ss:$24 sps:$4 sm:$0xff]  }
 0x2ce   :  { %1757 = vmatprep.subr.bf16.mxu0 %v5731_v42  ;;  %v5765_v42 = vld [vmem:[#allocation5 + $0xa0] ss:$24 sps:$4 sm:$0xff]  }
 0x2d1   :  { %1758 = vmatpush1.bf16.msra.mxu0 %v5729_v43  ;;  %v5770_v43 = vld [vmem:[#allocation5 + $0xd4] ss:$24 sps:$4 sm:$0xff]  }
 0x2d2   :  { %1759 = vmatprep.subr.bf16.mxu0 %v5737_v47  ;;  %v5776_v47 = vld [vmem:[#allocation5 + $0x134] ss:$24 sps:$4 sm:$0xff]  }
 0x2d5   :  { %1760 = vmatpush1.bf16.msra.mxu0 %v5735_v46  ;;  %v5771_v46 = vld [vmem:[#allocation5 + $0x100] ss:$24 sps:$4 sm:$0xff]  }
 0x377   :  { %v1167_v62 = vpop.f32.mrb[24].mxu0 }
 0x378   :  { %v1257_v63 = vadd.f32 %v1256_v49, %v1167_v62  ;;  %v5285_v2 = vpop.f32.mrb[25].mxu0  ;;  %v5743_v49 = vld [vmem:[#allocation5 + $0xfc] ss:$24 sps:$4 sm:$0xff]  }
 0x379   :  { %v1170_v3 = vpop.f32.mrb[26].mxu0  ;;  %1761 = vmatprep.subr.bf16.mxu0 %v5743_v49  ;;  %v5779_v49 = vld [vmem:[#allocation5 + $0x164] ss:$24 sps:$4 sm:$0xff]  }
 0x37a   :  { %v1260_v4 = vadd.f32 %v1259_v52, %v1170_v3  ;;  %v5286_v5 = vpop.f32.mrb[27].mxu0  ;;  %v5746_v52 = vld [vmem:[#allocation5 + $0x124] ss:$24 sps:$4 sm:$0xff]   ;;  %1762 = vmatpush1.bf16.msra.mxu0 %v5741_v51  ;;  %v6384_v51 = vsub.s32 7, %v6301_v17 }
 0x37b   :  { %1720 = vmatprep.subr.bf16.mxu1 %v5746_v52  ;;  %1763 = vmatprep.subr.bf16.mxu0 %v5749_v53  ;;  %v6389_v52 = vld [vmem:[%s6779_s4 + $0x8] sm:$0xff] }
 0x37c   :  { %1721 = vmatpush1.bf16.msra.mxu1 %v5744_v54  ;;  %v1846_v53 = vrot.slane %v6309_v19, %v6384_v51  ;;  %v6394_v54 = vsub.s32 5, %v6301_v17 }
 0x37d   :  { %1722 = vmatprep.subr.bf16.mxu1 %v5752_v56 }
 0x37e   :  { %1764 = vmatpush1.bf16.msra.mxu0 %v5747_v55 }
 0x37f   :  { %1765 = vmatprep.subr.bf16.mxu0 %v5755_v57  ;;  %v1852_v57 = vrot.slane %v6389_v52, %v6304_v18 }
 0x380   :  { %1723 = vmatpush1.bf16.msra.mxu1 %v5750_v40 }
 0x381   :  { %1794 = vmatprep.subr.bf16.mxu1 %v5758_v59 }
 0x382   :  { %1766 = vmatpush1.bf16.msra.mxu0 %v5753_v58 }
 0x383   :  { %5327 = vmatprep.subr.bf16.mxu0 %v6089_v1 }
 0x397   :  { %v1362_v8 = vpop.f32.mrb[28].mxu0 }
 0x398   :  { %v1369_v9 = vadd.f32 %v1362_v8, %v1257_v63  ;;  %v5325_v10 = vpop.f32.mrb[29].mxu0 }
 0x399   :  { %v1365_v11 = vpop.f32.mrb[30].mxu0 }
 0x39a   :  { %v1375_v25 = vadd.f32 %v1374_v7, %v1369_v9  ;;  %v1370_v26 = vadd.f32 %v1365_v11, %v1260_v4  ;;  %v5326_v12 = vpop.f32.mrb[31].mxu0 }
 0x39b   :  { %v6360_v12 = vsub.s32 3, %v6301_v17 }
 0x39c   :  { %v1376_v14 = vadd.f32 %v1374_v7, %v1370_v26  ;;  %v6348_v15 = vadd.f32 %v1375_v25, %v57_v24 }
 0x39e   :  { %1379 = vadd.xlane.f32.xlu0 %v6348_v15  ;;  %v6351_v16 = vadd.f32 %v1376_v14, %v58_v13  ;;  %v1385_v20 = vmul.f32 %v6348_v15, %v6348_v15 }
 0x3a0   :  { %1381 = vadd.xlane.f32.xlu1 %v6351_v16  ;;  %v1386_v21 = vmul.f32 %v6351_v16, %v6351_v16 }
 0x3a2   :  { %1387 = vadd.xlane.f32.xlu0 %v1385_v20 }
 0x3a6   :  { %1389 = vadd.xlane.f32.xlu0 %v1386_v21  ;;  %v1410_v21 = vrot.slane %v6309_v19, %v6360_v12 }
 0x42b   :  { %v1380_v60 = vpop.xlane.xlu0 %1379 }
 0x42c   :  { %v1383_v61 = vmul.f32 0.03125, %v1380_v60 }
 0x42d   :  { %v1382_v62 = vpop.xlane.xlu1 %1381 }
 0x42e   :  { %v1393_v2 = vmul.f32 %v1383_v61, %v1383_v61  ;;  %v1384_v3 = vmul.f32 0.03125, %v1382_v62  ;;  %v1399_v13 = vsub.f32 %v6348_v15, %v1383_v61  ;;  %v1840_v62 = vrot.slane %v6309_v19, %v6394_v54 }
 0x42f   :  { %v1388_v63 = vpop.xlane.xlu0 %1387 }
 0x430   :  { %v1391_v4 = vmul.f32 0.03125, %v1388_v63  ;;  %v1394_v8 = vmul.f32 %v1384_v3, %v1384_v3  ;;  %v1400_v23 = vsub.f32 %v6351_v16, %v1384_v3  ;;  %v5759_v16 = vld [vmem:[#allocation5 + $0x40] ss:$24 sps:$4 sm:$0xff]  }
 0x432   :  { %v1395_v5 = vsub.f32 %v1391_v4, %v1393_v2 }
 0x433   :  { %v1390_v7 = vpop.xlane.xlu0 %1389 }
 0x434   :  { %v1397_v9 = vmax.f32 %v1395_v5, 0.0  ;;  %v1392_v10 = vmul.f32 0.03125, %v1390_v7 }
 0x436   :  { %v1401_v11 = vadd.f32 1e-12, %v1397_v9  ;;  %v1396_v24 = vsub.f32 %v1392_v10, %v1394_v8 }
 0x438   :  { %5932 = vrsqrt.f32 %v1401_v11  ;;  %v1398_v25 = vmax.f32 %v1396_v24, 0.0 }
 0x43a   :  { %v1402_v26 = vadd.f32 1e-12, %v1398_v25 }
 0x43c   :  { %5934 = vrsqrt.f32 %v1402_v26 }
 0x442   :  { %v5933_v14 = vpop.eup %5932 }
 0x443   :  { %v1405_v20 = vmul.f32 %v5933_v14, %v1399_v13 }
 0x445   :  { %v1411_v28 = vmul.f32 %v1410_v21, %v1405_v20 }
 0x446   :  { %v5935_v37 = vpop.eup %5934 }
 0x447   :  { %v1406_v27 = vmul.f32 %v5935_v37, %v1400_v23  ;;  %v6371_v31 = vadd.f32 %v1416_v29, %v1411_v28  ;;  %v6417_v28 = vld [vmem:[%s6776_s1] ss:$0 sm:$0xff] }
 0x449   :  { %v1412_v30 = vmul.f32 %v1410_v21, %v1406_v27 }
 0x44b   :  { %v6373_v15 = vadd.f32 %v1416_v29, %v1412_v30 }
 0x44d   :  { %v1419_v33 = vpack.c.bf16 %v6373_v15, %v6371_v31 }
 0x44f   :  { %1741 = vmatmul.mubr.bf16.vlgmr.msra.gmra.mrb[40].mxu1 %v1419_v33  ;;  %1784 = vmatmul.mubr.bf16.vlgmr.msra.gmra.mrb[32].mxu0 %v1419_v33 }
 0x450   :  { %1795 = vmatpush1.bf16.msra.mxu1 %v5756_v32  ;;  %1826 = vmatprep.mubr.bf16.mxu1 %v6088_v0 }
 0x451   :  { %1796 = vmatprep.subr.bf16.mxu1 %v5761_v34  ;;  %5329 = vmatprep.mubr.msk.bf16.mxu0 %vm6090_vm0, %v6089_v1  ;;  %v6422_v34 = vld [vmem:[%s6776_s1 + $0x1] ss:$0 sm:$0xff] }
 0x454   :  { %1797 = vmatpush1.bf16.msra.mxu1 %v5759_v16 }
 0x455   :  { %1798 = vmatprep.subr.bf16.mxu1 %v5764_v35 }
 0x458   :  { %1799 = vmatpush1.bf16.msra.mxu1 %v5762_v39 }
 0x459   :  { %1800 = vmatprep.subr.bf16.mxu1 %v5767_v41 }
 0x45c   :  { %1801 = vmatpush1.bf16.msra.mxu1 %v5765_v42 }
 0x45d   :  { %1802 = vmatprep.subr.bf16.mxu1 %v5770_v43 }
 0x460   :  { %1803 = vmatpush1.bf16.msra.mxu1 %v5768_v44 }
 0x461   :  { %1804 = vmatprep.subr.bf16.mxu1 %v5773_v45 }
 0x464   :  { %1805 = vmatpush1.bf16.msra.mxu1 %v5771_v46 }
 0x465   :  { %1806 = vmatprep.subr.bf16.mxu1 %v5776_v47 }
 0x468   :  { %1807 = vmatpush1.bf16.msra.mxu1 %v5774_v48 }
 0x469   :  { %1808 = vmatprep.subr.bf16.mxu1 %v5779_v49 }
 0x46c   :  { %1809 = vmatpush1.bf16.msra.mxu1 %v5777_v50 }
 0x46d   :  { %5333 = vmatprep.subr.bf16.mxu1 %v6089_v1 }
 0x46f   :  { %1827 = vmatmul.mubr.bf16.vlgmr.msra.gmra.mrb[44].mxu1 %v1419_v33 }
 0x470   :  { %5335 = vmatprep.mubr.msk.bf16.mxu1 %vm6090_vm0, %v6089_v1 }
 0x522   :  { %v1742_v55 = vpop.f32.mrb[40].mxu1  ;;  %v1785_v56 = vpop.f32.mrb[32].mxu0 }
 0x523   :  { %v1744_v40 = vpop.f32.mrb[41].mxu1  ;;  %v6398_v58 = vpop.f32.mrb[33].mxu0  ;;  %v1853_v5 = vadd.f32 %v1852_v57, %v1785_v56  ;;  %v1841_v8 = vadd.f32 %v1840_v62, %v1742_v55 }
 0x524   :  { %v1847_v59 = vadd.f32 %v1846_v53, %v1744_v40  ;;  %v1746_v60 = vpop.f32.mrb[42].mxu1  ;;  %v1789_v61 = vpop.f32.mrb[34].mxu0 }
 0x525   :  { %v1748_v63 = vpop.f32.mrb[43].mxu1  ;;  %v6402_v2 = vpop.f32.mrb[35].mxu0  ;;  %v1854_v9 = vadd.f32 %v1852_v57, %v1789_v61  ;;  %v1859_v10 = vpack.c.bf16 %v1853_v5, %v1853_v5  ;;  %v1842_v11 = vadd.f32 %v1840_v62, %v1746_v60  ;;  %v1855_v24 = vpack.c.bf16 %v1841_v8, %v1841_v8 }
 0x526   :  { %v1857_v3 = vpack.c.bf16 %v1847_v59, %v1847_v59  ;;  %v1848_v4 = vadd.f32 %v1846_v53, %v1748_v63  ;;  %v2101_v62 = vrot.slane %v6389_v52, %v6320_v36  ;;  %v6433_v63 = vsub.s32 6, %v6301_v17 }
 0x527   :  { %v1860_v25 = vpack.c.bf16 %v1854_v9, %v1854_v9  ;;  %v1987_v26 = vsel %vm1985_vm13, %v1859_v10, 0  ;;  %v1856_v13 = vpack.c.bf16 %v1842_v11, %v1842_v11  ;;  %v2107_v5 = vrot.slane %v6389_v52, %v6338_v6 }
 0x528   :  { %v1858_v7 = vpack.c.bf16 %v1848_v4, %v1848_v4  ;;  %5328 = vmatpush3.bf16.xpose.msra.mxu0 %v1857_v3  ;;  %v2095_v10 = vrot.slane %v6309_v19, %v6433_v63 }
 0x529   :  { %5339 = vmatprep.subr.bf16.mxu0 %v6089_v1  ;;  %v2033_v14 = vsel %vm1985_vm13, %v1860_v25, 0 }
 0x52a   :  { %5334 = vmatpush3.bf16.xpose.msra.mxu1 %v1858_v7  ;;  %v2097_v19 = vadd.f32 %v2095_v10, %v6402_v2 }
 0x52b   :  { %5345 = vmatprep.subr.bf16.mxu1 %v6089_v1 }
 0x52f   :  { %5330 = vmatmul.mubr.bf16.vlgmr.msra.gmra.mrb[36].mxu0 %v1855_v24 }
 0x530   :  { %5340 = vmatpush3.bf16.msra.mxu0 %v1987_v26  ;;  %5341 = vmatprep.mubr.msk.bf16.mxu0 %vm6090_vm0, %v6089_v1 }
 0x531   :  { %5336 = vmatmul.mubr.bf16.vlgmr.msra.gmra.mrb[48].mxu1 %v1856_v13  ;;  %5351 = vmatprep.subr.bf16.mxu0 %v6089_v1 }
 0x532   :  { %5346 = vmatpush3.bf16.msra.mxu1 %v2033_v14  ;;  %5347 = vmatprep.mubr.msk.bf16.mxu1 %vm6090_vm0, %v6089_v1  ;;  %v2096_v14 = vadd.f32 %v2095_v10, %v6398_v58 }
 0x533   :  { %5357 = vmatprep.subr.bf16.mxu1 %v6089_v1 }
 0x542   :  { %v1828_v20 = vpop.f32.mrb[44].mxu1 }
 0x543   :  { %v1830_v21 = vpop.f32.mrb[45].mxu1  ;;  %v2102_v4 = vadd.f32 %v2101_v62, %v1828_v20 }
 0x544   :  { %v1832_v23 = vpop.f32.mrb[46].mxu1  ;;  %v2108_v26 = vadd.f32 %v2107_v5, %v1830_v21 }
 0x545   :  { %v1834_v37 = vpop.f32.mrb[47].mxu1  ;;  %v2103_v9 = vadd.f32 %v2101_v62, %v1832_v23  ;;  %v2112_v25 = vpack.c.bf16 %v2102_v4, %v2102_v4  ;;  %v2110_v23 = vpack.c.bf16 %v2096_v14, %v2096_v14  ;;  %v5780_v14 = vld [vmem:[#allocation2 + $0x240] sm:$0xff]  }
 0x546   :  { %v2109_v20 = vadd.f32 %v2107_v5, %v1834_v37  ;;  %v2114_v21 = vpack.c.bf16 %v2108_v26, %v2108_v26  ;;  %v5788_v26 = vld [vmem:[#allocation2 + $0x280] sm:$0xff]  }
 0x547   :  { %v2113_v17 = vpack.c.bf16 %v2103_v9, %v2103_v9 }
 0x602   :  { %v1895_v27 = vpop.f32.mrb[36].mxu0 }
 0x603   :  { %v1941_v29 = vmul.f32 0.25, %v1895_v27  ;;  %v5331_v30 = vpop.f32.mrb[37].mxu0  ;;  %v2115_v27 = vpack.c.bf16 %v2109_v20, %v2109_v20 }
 0x604   :  { %v1898_v32 = vpop.f32.mrb[38].mxu0  ;;  %v1935_v33 = vpop.f32.mrb[48].mxu1  ;;  %v2228_v30 = vsel %vm1985_vm13, %v2114_v21, 0  ;;  %v5781_v21 = vld [vmem:[#allocation2 + $0x248] sm:$0xff]  }
 0x605   :  { %v1942_v16 = vmul.f32 0.25, %v1935_v33  ;;  %v5332_v35 = vpop.f32.mrb[39].mxu0  ;;  %v5337_v39 = vpop.f32.mrb[49].mxu1  ;;  %v1955_v41 = vadd.f32 %v6417_v28, %v1941_v29  ;;  %v2111_v29 = vpack.c.bf16 %v2097_v19, %v2097_v19  ;;  %v2274_v58 = vsel %vm1985_vm13, %v2115_v27, 0  ;;  %v5789_v19 = vld [vmem:[#allocation2 + $0x288] sm:$0xff]   ;;  %v5782_v27 = vld [vmem:[#allocation2 + $0x250] sm:$0xff]  }
 0x606   :  { %v1938_v42 = vpop.f32.mrb[50].mxu1 }
 0x607   :  { %v5338_v43 = vpop.f32.mrb[51].mxu1  ;;  %v1958_v44 = vsel %vm1957_vm14, %v1955_v41, -inf  ;;  %v1956_v45 = vadd.f32 %v6422_v34, %v1942_v16 }
 0x608   :  { %1959 = vmax.xlane.f32.xlu1 %v1958_v44 }
 0x609   :  { %v1961_v46 = vsel %vm1957_vm14, %v1956_v45, -inf }
 0x60a   :  { %1962 = vmax.xlane.f32.xlu0 %v1961_v46 }
 0x695   :  { %v1960_v47 = vpop.xlane.xlu1 %1959 }
 0x696   :  { %v1964_v48 = vsub.f32 %v1955_v41, %v1960_v47 }
 0x697   :  { %v1963_v49 = vpop.xlane.xlu0 %1962 }
 0x698   :  { %v1966_v50 = vmul.f32 1.442695, %v1964_v48  ;;  %v1965_v53 = vsub.f32 %v1956_v45, %v1963_v49 }
 0x69a   :  { %5936 = vpow2.f32 %v1966_v50  ;;  %v1968_v55 = vmul.f32 1.442695, %v1965_v53 }
 0x69c   :  { %5938 = vpow2.f32 %v1968_v55 }
 0x6a4   :  { %v5937_v56 = vpop.eup %5936 }
 0x6a5   :  { %v1970_v57 = vsel %vm1957_vm14, %v5937_v56, 0.0 }
 0x6a6   :  { %v5939_v40 = vpop.eup %5938  ;;  %1971 = vadd.xlane.f32.xlu1 %v1970_v57 }
 0x6a7   :  { %v1973_v59 = vsel %vm1957_vm14, %v5939_v40, 0.0 }
 0x6a8   :  { %1974 = vadd.xlane.f32.xlu0 %v1973_v59 }
 0x733   :  { %v1972_v60 = vpop.xlane.xlu1 %1971 }
 0x734   :  { %5940 = vrcp.f32 %v1972_v60 }
 0x735   :  { %v1975_v61 = vpop.xlane.xlu0 %1974 }
 0x736   :  { %5942 = vrcp.f32 %v1975_v61 }
 0x73e   :  { %v5941_v3 = vpop.eup %5940 }
 0x73f   :  { %v1978_v7 = vmul.f32 %v5941_v3, %v5937_v56 }
 0x740   :  { %v5943_v8 = vpop.eup %5942 }
 0x741   :  { %v1979_v11 = vmul.f32 %v5943_v8, %v5939_v40  ;;  %v1980_v24 = vpack.c.bf16 %v1978_v7, %v1978_v7 }
 0x743   :  { %5342 = vmatmul.mubr.msk.bf16.vlgmr.msra.gmra.mrb[40].mxu0 %vm1957_vm14, %v1980_v24  ;;  %v1981_v13 = vpack.c.bf16 %v1979_v11, %v1979_v11 }
 0x744   :  { %5352 = vmatpush3.bf16.xpose.msra.mxu0 %v2112_v25  ;;  %5353 = vmatprep.mubr.msk.bf16.mxu0 %vm6090_vm0, %v6089_v1 }
 0x745   :  { %5348 = vmatmul.mubr.msk.bf16.vlgmr.msra.gmra.mrb[52].mxu1 %vm1957_vm14, %v1981_v13  ;;  %5363 = vmatprep.subr.bf16.mxu0 %v6089_v1 }
 0x746   :  { %5358 = vmatpush3.bf16.xpose.msra.mxu1 %v2113_v17  ;;  %5359 = vmatprep.mubr.msk.bf16.mxu1 %vm6090_vm0, %v6089_v1 }
 0x747   :  { %5369 = vmatprep.subr.bf16.mxu1 %v6089_v1 }
 0x74b   :  { %5354 = vmatmul.mubr.bf16.vlgmr.msra.gmra.mrb[44].mxu0 %v2110_v23  ;;  %v5790_v23 = vld [vmem:[#allocation2 + $0x290] sm:$0xff]  }
 0x74c   :  { %5364 = vmatpush3.bf16.msra.mxu0 %v2228_v30  ;;  %5365 = vmatprep.mubr.msk.bf16.mxu0 %vm6090_vm0, %v6089_v1  ;;  %v5783_v30 = vld [vmem:[#allocation2 + $0x258] sm:$0xff]  }
 0x74d   :  { %5360 = vmatmul.mubr.bf16.vlgmr.msra.gmra.mrb[56].mxu1 %v2111_v29  ;;  %5375 = vmatprep.subr.bf16.mxu0 %v6089_v1  ;;  %v5791_v29 = vld [vmem:[#allocation2 + $0x298] sm:$0xff]  }
 0x74e   :  { %5370 = vmatpush3.bf16.msra.mxu1 %v2274_v58  ;;  %5371 = vmatprep.mubr.msk.bf16.mxu1 %vm6090_vm0, %v6089_v1  ;;  %v5792_v58 = vld [vmem:[#allocation2 + $0x2a0] sm:$0xff]  }
 0x74f   :  { %5395 = vmatprep.subr.bf16.mxu1 %v6089_v1 }
 0x816   :  { %v6457_v2 = vpop.f32.mrb[40].mxu0 }
 0x817   :  { %v5343_v37 = vpop.f32.mrb[41].mxu0 }
 0x818   :  { %v2026_v32 = vpop.f32.mrb[42].mxu0  ;;  %v6459_v33 = vpop.f32.mrb[52].mxu1  ;;  %v5784_v37 = vld [vmem:[#allocation2 + $0x260] sm:$0xff]  }
 0x819   :  { %v2075_v16 = vpack.c.bf16 %v6459_v33, %v6457_v2  ;;  %v5344_v35 = vpop.f32.mrb[43].mxu0  ;;  %v5349_v39 = vpop.f32.mrb[53].mxu1  ;;  %v5793_v32 = vld [vmem:[#allocation2 + $0x2a8] sm:$0xff]  }
 0x81a   :  { %v2072_v41 = vpop.f32.mrb[54].mxu1  ;;  %v5785_v35 = vld [vmem:[#allocation2 + $0x268] sm:$0xff]   ;;  %v5794_v39 = vld [vmem:[#allocation2 + $0x2b0] sm:$0xff]  }
 0x81b   :  { %v5350_v42 = vpop.f32.mrb[55].mxu1  ;;  %v5786_v41 = vld [vmem:[#allocation2 + $0x270] sm:$0xff]  }
 0x81c   :  { %v5787_v42 = vld [vmem:[#allocation2 + $0x278] sm:$0xff]  }
 0x81e   :  { %v2150_v43 = vpop.f32.mrb[44].mxu0 }
 0x81f   :  { %v2196_v44 = vmul.f32 0.25, %v2150_v43  ;;  %v5355_v45 = vpop.f32.mrb[45].mxu0  ;;  %v5795_v43 = vld [vmem:[#allocation2 + $0x2b8] sm:$0xff]  }
 0x820   :  { %v2153_v46 = vpop.f32.mrb[46].mxu0  ;;  %v2190_v47 = vpop.f32.mrb[56].mxu1 }
 0x821   :  { %v2197_v48 = vmul.f32 0.25, %v2190_v47  ;;  %v5356_v49 = vpop.f32.mrb[47].mxu0  ;;  %v5361_v50 = vpop.f32.mrb[57].mxu1  ;;  %v2198_v53 = vadd.f32 %v6417_v28, %v2196_v44 }
 0x822   :  { %v2193_v55 = vpop.f32.mrb[58].mxu1 }
 0x823   :  { %v5362_v56 = vpop.f32.mrb[59].mxu1  ;;  %v2200_v57 = vsel %vm1957_vm14, %v2198_v53, -inf  ;;  %v2199_v40 = vadd.f32 %v6422_v34, %v2197_v48 }
 0x824   :  { %2201 = vmax.xlane.f32.xlu1 %v2200_v57  ;;  %v2514_v57 = vrot.slane %v6389_v52, %v6360_v12 }
 0x825   :  { %v2203_v59 = vsel %vm1957_vm14, %v2199_v40, -inf }
 0x826   :  { %2204 = vmax.xlane.f32.xlu0 %v2203_v59 }
 0x8b1   :  { %v2202_v60 = vpop.xlane.xlu1 %2201 }
 0x8b2   :  { %v2206_v61 = vsub.f32 %v2198_v53, %v2202_v60 }
 0x8b3   :  { %v2205_v62 = vpop.xlane.xlu0 %2204 }
 0x8b4   :  { %v2208_v3 = vmul.f32 1.442695, %v2206_v61  ;;  %v2207_v4 = vsub.f32 %v2199_v40, %v2205_v62 }
 0x8b6   :  { %5944 = vpow2.f32 %v2208_v3  ;;  %v2210_v5 = vmul.f32 1.442695, %v2207_v4 }
 0x8b8   :  { %5946 = vpow2.f32 %v2210_v5 }
 0x8c0   :  { %v5945_v7 = vpop.eup %5944 }
 0x8c1   :  { %v2212_v28 = vsel %vm1957_vm14, %v5945_v7, 0.0 }
 0x8c2   :  { %v5947_v8 = vpop.eup %5946  ;;  %2213 = vadd.xlane.f32.xlu1 %v2212_v28 }
 0x8c3   :  { %v2215_v9 = vsel %vm1957_vm14, %v5947_v8, 0.0 }
 0x8c4   :  { %2216 = vadd.xlane.f32.xlu0 %v2215_v9 }
 0x94f   :  { %v2214_v34 = vpop.xlane.xlu1 %2213 }
 0x950   :  { %5948 = vrcp.f32 %v2214_v34  ;;  %v5796_v34 = vld [vmem:[#allocation2 + $0x2c0] sm:$0xff]  }
 0x951   :  { %v2217_v10 = vpop.xlane.xlu0 %2216 }
 0x952   :  { %5950 = vrcp.f32 %v2217_v10  ;;  %v5797_v10 = vld [vmem:[#allocation2 + $0x2c8] sm:$0xff]  }
 0x95a   :  { %v5949_v11 = vpop.eup %5948 }
 0x95b   :  { %v2220_v24 = vmul.f32 %v5949_v11, %v5945_v7  ;;  %v5798_v11 = vld [vmem:[#allocation2 + $0x2d0] sm:$0xff]  }
 0x95c   :  { %v5951_v25 = vpop.eup %5950 }
 0x95d   :  { %v2221_v13 = vmul.f32 %v5951_v25, %v5947_v8  ;;  %v2222_v17 = vpack.c.bf16 %v2220_v24, %v2220_v24  ;;  %v5801_v24 = vld [vmem:[#allocation2 + $0x2e8] sm:$0xff]   ;;  %v5802_v25 = vld [vmem:[#allocation2 + $0x2f0] sm:$0xff]  }
 0x95f   :  { %5366 = vmatmul.mubr.msk.bf16.vlgmr.msra.gmra.mrb[48].mxu0 %vm1957_vm14, %v2222_v17  ;;  %v2223_v20 = vpack.c.bf16 %v2221_v13, %v2221_v13 }
 0x960   :  { %5376 = vmatpush3.bf16.msra.mxu0 %v5788_v26  ;;  %5391 = vmatprep.mubr.msk.bf16.mxu0 %vm6090_vm0, %v6089_v1  ;;  %v5803_v26 = vld [vmem:[#allocation2 + $0x2f8] sm:$0xff]  }
 0x961   :  { %5372 = vmatmul.mubr.msk.bf16.vlgmr.msra.gmra.mrb[60].mxu1 %vm1957_vm14, %v2223_v20  ;;  %5377 = vmatprep.subr.bf16.mxu0 %v6089_v1 }
 0x962   :  { %5396 = vmatpush3.bf16.msra.mxu1 %v5780_v14  ;;  %5411 = vmatprep.mubr.msk.bf16.mxu1 %vm6090_vm0, %v6089_v1 }
 0x963   :  { %5397 = vmatprep.subr.bf16.mxu1 %v6089_v1 }
 0x964   :  { %5378 = vmatpush3.bf16.msra.mxu0 %v5789_v19 }
 0x965   :  { %5379 = vmatprep.subr.bf16.mxu0 %v6089_v1 }
 0x966   :  { %5398 = vmatpush3.bf16.msra.mxu1 %v5781_v21 }
 0x967   :  { %5399 = vmatprep.subr.bf16.mxu1 %v6089_v1 }
 0x968   :  { %5380 = vmatpush3.bf16.msra.mxu0 %v5790_v23 }
 0x969   :  { %5381 = vmatprep.subr.bf16.mxu0 %v6089_v1 }
 0x96a   :  { %5400 = vmatpush3.bf16.msra.mxu1 %v5782_v27 }
 0x96b   :  { %5401 = vmatprep.subr.bf16.mxu1 %v6089_v1 }
 0x96c   :  { %5382 = vmatpush3.bf16.msra.mxu0 %v5791_v29 }
 0x96d   :  { %5383 = vmatprep.subr.bf16.mxu0 %v6089_v1 }
 0x96e   :  { %5402 = vmatpush3.bf16.msra.mxu1 %v5783_v30 }
 0x96f   :  { %5403 = vmatprep.subr.bf16.mxu1 %v6089_v1 }
 0x970   :  { %5384 = vmatpush3.bf16.msra.mxu0 %v5792_v58 }
 0x971   :  { %5385 = vmatprep.subr.bf16.mxu0 %v6089_v1 }
 0x972   :  { %5404 = vmatpush3.bf16.msra.mxu1 %v5784_v37 }
 0x973   :  { %5405 = vmatprep.subr.bf16.mxu1 %v6089_v1 }
 0x974   :  { %5386 = vmatpush3.bf16.msra.mxu0 %v5793_v32 }
 0x975   :  { %5387 = vmatprep.subr.bf16.mxu0 %v6089_v1 }
 0x976   :  { %5406 = vmatpush3.bf16.msra.mxu1 %v5785_v35 }
 0x977   :  { %5407 = vmatprep.subr.bf16.mxu1 %v6089_v1 }
 0x978   :  { %5388 = vmatpush3.bf16.msra.mxu0 %v5794_v39 }
 0x979   :  { %5389 = vmatprep.subr.bf16.mxu0 %v6089_v1 }
 0x97a   :  { %5408 = vmatpush3.bf16.msra.mxu1 %v5786_v41 }
 0x97b   :  { %5409 = vmatprep.subr.bf16.mxu1 %v6089_v1 }
 0x97c   :  { %5390 = vmatpush3.bf16.msra.mxu0 %v5795_v43  ;;  %v2550_v43 = vrot.slane %v6389_v52, %v6366_v22 }
 0x97d   :  { %5415 = vmatprep.subr.bf16.mxu0 %v6089_v1 }
 0x97e   :  { %5410 = vmatpush3.bf16.msra.mxu1 %v5787_v42 }
 0x97f   :  { %5435 = vmatprep.subr.bf16.mxu1 %v6089_v1 }
 0x981   :  { %5412 = vmatmul.mubr.bf16.vlgmr.msra.gmra.mrb[64].mxu1 %v2075_v16 }
 0x982   :  { %5451 = vmatprep.mubr.msk.bf16.mxu1 %vm6090_vm0, %v6089_v1 }
 0xa32   :  { %v2264_v44 = vpop.f32.mrb[48].mxu0 }
 0xa33   :  { %v5367_v45 = vpop.f32.mrb[49].mxu0 }
 0xa34   :  { %v2267_v46 = vpop.f32.mrb[50].mxu0  ;;  %v2310_v47 = vpop.f32.mrb[60].mxu1 }
 0xa35   :  { %v2316_v48 = vpack.c.bf16 %v2310_v47, %v2264_v44  ;;  %v5368_v49 = vpop.f32.mrb[51].mxu0  ;;  %v5373_v50 = vpop.f32.mrb[61].mxu1 }
 0xa36   :  { %v2313_v53 = vpop.f32.mrb[62].mxu1  ;;  %v2556_v50 = vrot.slane %v6389_v52, %v6394_v54 }
 0xa37   :  { %v5374_v55 = vpop.f32.mrb[63].mxu1  ;;  %5392 = vmatmul.mubr.bf16.vlgmr.msra.gmra.mrb[52].mxu0 %v2316_v48 }
 0xa38   :  { %5431 = vmatprep.mubr.msk.bf16.mxu0 %vm6090_vm0, %v6089_v1  ;;  %5416 = vmatpush3.bf16.msra.mxu0 %v5796_v34 }
 0xa39   :  { %5417 = vmatprep.subr.bf16.mxu0 %v6089_v1 }
 0xa3c   :  { %5418 = vmatpush3.bf16.msra.mxu0 %v5797_v10 }
 0xa3d   :  { %5419 = vmatprep.subr.bf16.mxu0 %v6089_v1 }
 0xa40   :  { %5420 = vmatpush3.bf16.msra.mxu0 %v5798_v11 }
 0xa41   :  { %5421 = vmatprep.subr.bf16.mxu0 %v6089_v1 }
 0xa54   :  { %v2504_v2 = vpop.f32.mrb[64].mxu1 }
 0xa55   :  { %v5413_v33 = vpop.f32.mrb[65].mxu1 }
 0xa56   :  { %v2507_v16 = vpop.f32.mrb[66].mxu1 }
 0xa57   :  { %v5414_v56 = vpop.f32.mrb[67].mxu1 }
 0xa58   :  { %v5805_v56 = vld [vmem:[#allocation2 + $0x308] sm:$0xff]  }
 0xb0a   :  { %v2415_v40 = vpop.f32.mrb[52].mxu0 }
 0xb0b   :  { %v2505_v59 = vadd.f32 %v2504_v2, %v2415_v40  ;;  %v5393_v60 = vpop.f32.mrb[53].mxu0  ;;  %v5807_v40 = vld [vmem:[#allocation2 + $0x318] sm:$0xff]  }
 0xb0c   :  { %v2418_v61 = vpop.f32.mrb[54].mxu0  ;;  %v5809_v60 = vld [vmem:[#allocation2 + $0x328] sm:$0xff]  }
 0xb0d   :  { %v2515_v62 = vadd.f32 %v2514_v57, %v2505_v59  ;;  %v2508_v3 = vadd.f32 %v2507_v16, %v2418_v61  ;;  %v5394_v4 = vpop.f32.mrb[55].mxu0  ;;  %v5804_v16 = vld [vmem:[#allocation2 + $0x300] sm:$0xff]   ;;  %v5810_v61 = vld [vmem:[#allocation2 + $0x330] sm:$0xff]  }
 0xb0e   :  { %5436 = vmatpush3.bf16.msra.mxu1 %v5804_v16  ;;  %v5808_v59 = vld [vmem:[#allocation2 + $0x320] sm:$0xff]  }
 0xb0f   :  { %v2516_v5 = vadd.f32 %v2514_v57, %v2508_v3  ;;  %v2517_v7 = vadd.f32 %v2515_v62, %v6371_v31  ;;  %v5799_v31 = vld [vmem:[#allocation2 + $0x2d8] sm:$0xff]   ;;  %5437 = vmatprep.subr.bf16.mxu1 %v6089_v1  ;;  %v5806_v57 = vld [vmem:[#allocation2 + $0x310] sm:$0xff]   ;;  %v2579_v3 = vrot.slane %v6389_v52, %v6433_v63 }
 0xb10   :  { %5422 = vmatpush3.bf16.msra.mxu0 %v5799_v31  ;;  %v5811_v62 = vld [vmem:[#allocation2 + $0x338] sm:$0xff]  }
 0xb11   :  { %2519 = vadd.xlane.f32.xlu1 %v2517_v7  ;;  %v2518_v28 = vadd.f32 %v2516_v5, %v6373_v15  ;;  %v2525_v8 = vmul.f32 %v2517_v7, %v2517_v7  ;;  %v5800_v15 = vld [vmem:[#allocation2 + $0x2e0] sm:$0xff]   ;;  %5423 = vmatprep.subr.bf16.mxu0 %v6089_v1 }
 0xb12   :  { %5438 = vmatpush3.bf16.msra.mxu1 %v5805_v56  ;;  %v5826_v16 = vld [vmem:[#allocation5 + $0x1e4] ss:$24 sps:$4 sm:$0xff]   ;;  %v5824_v56 = vld [vmem:[#allocation5 + $0x1e0] ss:$24 sps:$4 sm:$0xff]  }
 0xb13   :  { %2521 = vadd.xlane.f32.xlu0 %v2518_v28  ;;  %v2526_v9 = vmul.f32 %v2518_v28, %v2518_v28  ;;  %5439 = vmatprep.subr.bf16.mxu1 %v6089_v1 }
 0xb14   :  { %5424 = vmatpush3.bf16.msra.mxu0 %v5800_v15 }
 0xb15   :  { %2527 = vadd.xlane.f32.xlu1 %v2525_v8  ;;  %5425 = vmatprep.subr.bf16.mxu0 %v6089_v1 }
 0xb16   :  { %5440 = vmatpush3.bf16.msra.mxu1 %v5806_v57  ;;  %v5829_v57 = vld [vmem:[#allocation5 + $0x1ec] ss:$24 sps:$4 sm:$0xff]  }
 0xb17   :  { %2529 = vadd.xlane.f32.xlu0 %v2526_v9  ;;  %5441 = vmatprep.subr.bf16.mxu1 %v6089_v1 }
 0xb18   :  { %5426 = vmatpush3.bf16.msra.mxu0 %v5801_v24 }
 0xb19   :  { %5427 = vmatprep.subr.bf16.mxu0 %v6089_v1 }
 0xb1a   :  { %5442 = vmatpush3.bf16.msra.mxu1 %v5807_v40  ;;  %v5827_v40 = vld [vmem:[#allocation5 + $0x1e8] ss:$24 sps:$4 sm:$0xff]  }
 0xb1b   :  { %5443 = vmatprep.subr.bf16.mxu1 %v6089_v1 }
 0xb1c   :  { %5428 = vmatpush3.bf16.msra.mxu0 %v5802_v25 }
 0xb1d   :  { %5429 = vmatprep.subr.bf16.mxu0 %v6089_v1 }
 0xb1e   :  { %5444 = vmatpush3.bf16.msra.mxu1 %v5808_v59  ;;  %v5832_v59 = vld [vmem:[#allocation5 + $0x214] ss:$24 sps:$4 sm:$0xff]  }
 0xb1f   :  { %5445 = vmatprep.subr.bf16.mxu1 %v6089_v1 }
 0xb20   :  { %5430 = vmatpush3.bf16.msra.mxu0 %v5803_v26 }
 0xb22   :  { %5446 = vmatpush3.bf16.msra.mxu1 %v5809_v60  ;;  %v5830_v60 = vld [vmem:[#allocation5 + $0x210] ss:$24 sps:$4 sm:$0xff]  }
 0xb23   :  { %5447 = vmatprep.subr.bf16.mxu1 %v6089_v1 }
 0xb26   :  { %5448 = vmatpush3.bf16.msra.mxu1 %v5810_v61  ;;  %v5835_v61 = vld [vmem:[#allocation5 + $0x21c] ss:$24 sps:$4 sm:$0xff]  }
 0xb27   :  { %5449 = vmatprep.subr.bf16.mxu1 %v6089_v1 }
 0xb2a   :  { %5450 = vmatpush3.bf16.msra.mxu1 %v5811_v62  ;;  %v5833_v62 = vld [vmem:[#allocation5 + $0x218] ss:$24 sps:$4 sm:$0xff]  }
 0xb9e   :  { %v2520_v13 = vpop.xlane.xlu1 %2519 }
 0xb9f   :  { %v2523_v17 = vmul.f32 0.03125, %v2520_v13 }
 0xba0   :  { %v2522_v14 = vpop.xlane.xlu0 %2521 }
 0xba1   :  { %v2524_v20 = vmul.f32 0.03125, %v2522_v14  ;;  %v2533_v21 = vmul.f32 %v2523_v17, %v2523_v17  ;;  %v2539_v42 = vsub.f32 %v2517_v7, %v2523_v17 }
 0xba2   :  { %v2528_v19 = vpop.xlane.xlu1 %2527 }
 0xba3   :  { %v2531_v23 = vmul.f32 0.03125, %v2528_v19  ;;  %v2534_v29 = vmul.f32 %v2524_v20, %v2524_v20  ;;  %v2540_v45 = vsub.f32 %v2518_v28, %v2524_v20 }
 0xba4   :  { %v2530_v27 = vpop.xlane.xlu0 %2529 }
 0xba5   :  { %v2535_v30 = vsub.f32 %v2531_v23, %v2533_v21  ;;  %v2532_v58 = vmul.f32 0.03125, %v2530_v27 }
 0xba7   :  { %v2537_v37 = vmax.f32 %v2535_v30, 0.0  ;;  %v2536_v32 = vsub.f32 %v2532_v58, %v2534_v29 }
 0xba9   :  { %v2541_v35 = vadd.f32 1e-12, %v2537_v37  ;;  %v2538_v39 = vmax.f32 %v2536_v32, 0.0  ;;  %v2707_v37 = vrot.slane %v6389_v52, %v6384_v51 }
 0xbab   :  { %5952 = vrsqrt.f32 %v2541_v35  ;;  %v2542_v41 = vadd.f32 1e-12, %v2538_v39 }
 0xbad   :  { %5954 = vrsqrt.f32 %v2542_v41 }
 0xbb5   :  { %v5953_v44 = vpop.eup %5952 }
 0xbb6   :  { %v2545_v46 = vmul.f32 %v5953_v44, %v2539_v42 }
 0xbb7   :  { %v5955_v47 = vpop.eup %5954 }
 0xbb8   :  { %v2546_v48 = vmul.f32 %v5955_v47, %v2540_v45  ;;  %v2551_v49 = vmul.f32 %v2550_v43, %v2545_v46  ;;  %v5814_v47 = vld [vmem:[#allocation5 + $0x184] ss:$24 sps:$4 sm:$0xff]  }
 0xbb9   :  { %3128 = vmatprep.subr.bf16.mxu0 %v5814_v47 }
 0xbba   :  { %v2552_v53 = vmul.f32 %v2550_v43, %v2546_v48  ;;  %v6513_v55 = vadd.f32 %v2556_v50, %v2551_v49  ;;  %v5812_v48 = vld [vmem:[#allocation5 + $0x180] ss:$24 sps:$4 sm:$0xff]   ;;  %v5817_v49 = vld [vmem:[#allocation5 + $0x18c] ss:$24 sps:$4 sm:$0xff]  }
 0xbbb   :  { %3171 = vmatprep.subr.bf16.mxu1 %v5817_v49 }
 0xbbc   :  { %v6515_v2 = vadd.f32 %v2556_v50, %v2552_v53  ;;  %v5815_v50 = vld [vmem:[#allocation5 + $0x188] ss:$24 sps:$4 sm:$0xff]   ;;  %v5820_v53 = vld [vmem:[#allocation5 + $0x1b4] ss:$24 sps:$4 sm:$0xff]  }
 0xbbe   :  { %v2559_v33 = vpack.c.bf16 %v6515_v2, %v6513_v55 }
 0xbc0   :  { %5432 = vmatmul.mubr.bf16.vlgmr.msra.gmra.mrb[56].mxu0 %v2559_v33  ;;  %v5821_v33 = vld [vmem:[#allocation5 + $0x1b8] ss:$24 sps:$4 sm:$0xff]  }
 0xbc1   :  { %3160 = vmatprep.mubr.bf16.mxu0 %v6088_v0  ;;  %3129 = vmatpush1.bf16.msra.mxu0 %v5812_v48 }
 0xbc2   :  { %3130 = vmatprep.subr.bf16.mxu0 %v5820_v53 }
 0xc93   :  { %v2662_v4 = vpop.f32.mrb[56].mxu0 }
 0xc94   :  { %v2663_v5 = vadd.f32 %v2662_v4, %v2579_v3  ;;  %v5433_v7 = vpop.f32.mrb[57].mxu0  ;;  %v5838_v4 = vld [vmem:[#allocation5 + $0x244] ss:$24 sps:$4 sm:$0xff]  }
 0xc95   :  { %v2665_v28 = vpop.f32.mrb[58].mxu0  ;;  %v5841_v7 = vld [vmem:[#allocation5 + $0x24c] ss:$24 sps:$4 sm:$0xff]  }
 0xc96   :  { %v2669_v8 = vmul.f32 %v2663_v5, %v2663_v5  ;;  %v2666_v9 = vadd.f32 %v2665_v28, %v2579_v3  ;;  %v5434_v34 = vpop.f32.mrb[59].mxu0  ;;  %v5836_v3 = vld [vmem:[#allocation5 + $0x240] ss:$24 sps:$4 sm:$0xff]   ;;  %v5844_v28 = vld [vmem:[#allocation5 + $0x274] ss:$24 sps:$4 sm:$0xff]  }
 0xc97   :  { %v5845_v34 = vld [vmem:[#allocation5 + $0x278] ss:$24 sps:$4 sm:$0xff]  }
 0xc98   :  { %v2671_v10 = vmul.f32 %v2669_v8, %v2663_v5  ;;  %v2670_v11 = vmul.f32 %v2666_v9, %v2666_v9  ;;  %v5847_v8 = vld [vmem:[#allocation5 + $0x27c] ss:$24 sps:$4 sm:$0xff]  }
 0xc9a   :  { %v2673_v31 = vmul.f32 0.044715, %v2671_v10  ;;  %v2672_v15 = vmul.f32 %v2670_v11, %v2666_v9  ;;  %v5850_v10 = vld [vmem:[#allocation5 + $0x2a4] ss:$24 sps:$4 sm:$0xff]  }
 0xc9b   :  { %v5853_v11 = vld [vmem:[#allocation5 + $0x2ac] ss:$24 sps:$4 sm:$0xff]  }
 0xc9c   :  { %v2675_v24 = vadd.f32 %v2673_v31, %v2663_v5  ;;  %v2674_v25 = vmul.f32 0.044715, %v2672_v15  ;;  %v5848_v31 = vld [vmem:[#allocation5 + $0x2a0] ss:$24 sps:$4 sm:$0xff]  }
 0xc9d   :  { %v5851_v15 = vld [vmem:[#allocation5 + $0x2a8] ss:$24 sps:$4 sm:$0xff]  }
 0xc9e   :  { %v2677_v26 = vmul.f32 0.7978846, %v2675_v24  ;;  %v2676_v13 = vadd.f32 %v2674_v25, %v2666_v9  ;;  %v5856_v24 = vld [vmem:[#allocation5 + $0x2d4] ss:$24 sps:$4 sm:$0xff]  }
 0xc9f   :  { %v5859_v25 = vld [vmem:[#allocation5 + $0x2dc] ss:$24 sps:$4 sm:$0xff]  }
 0xca0   :  { %5956 = vtanh.f32 %v2677_v26  ;;  %v2678_v17 = vmul.f32 0.7978846, %v2676_v13  ;;  %v5854_v26 = vld [vmem:[#allocation5 + $0x2d0] ss:$24 sps:$4 sm:$0xff]  }
 0xca1   :  { %v5857_v13 = vld [vmem:[#allocation5 + $0x2d8] ss:$24 sps:$4 sm:$0xff]  }
 0xca2   :  { %5958 = vtanh.f32 %v2678_v17  ;;  %v5862_v17 = vld [vmem:[#allocation5 + $0x194] ss:$24 sps:$4 sm:$0xff]  }
 0xcaa   :  { %v5957_v14 = vpop.eup %5956 }
 0xcab   :  { %v2681_v20 = vadd.f32 1.0, %v5957_v14 }
 0xcac   :  { %v5959_v19 = vpop.eup %5958 }
 0xcad   :  { %v2683_v21 = vmul.f32 0.5, %v2681_v20  ;;  %v2682_v23 = vadd.f32 1.0, %v5959_v19 }
 0xcaf   :  { %v2684_v27 = vmul.f32 0.5, %v2682_v23  ;;  %v2685_v29 = vmul.f32 %v2683_v21, %v2663_v5  ;;  %v5839_v5 = vld [vmem:[#allocation5 + $0x248] ss:$24 sps:$4 sm:$0xff]  }
 0xcb1   :  { %v2686_v30 = vmul.f32 %v2684_v27, %v2666_v9  ;;  %v5842_v9 = vld [vmem:[#allocation5 + $0x270] ss:$24 sps:$4 sm:$0xff]  }
 0xcb3   :  { %v2687_v58 = vpack.c.bf16 %v2686_v30, %v2685_v29 }
 0xcb5   :  { %5452 = vmatmul.mubr.bf16.vlgmr.msra.gmra.mrb[68].mxu1 %v2687_v58 }
 0xcb6   :  { %3203 = vmatprep.mubr.bf16.mxu1 %v6088_v0  ;;  %3172 = vmatpush1.bf16.msra.mxu1 %v5815_v50 }
 0xd88   :  { %v2790_v32 = vpop.f32.mrb[68].mxu1 }
 0xd89   :  { %v2791_v35 = vadd.f32 %v2790_v32, %v2707_v37  ;;  %v5453_v39 = vpop.f32.mrb[69].mxu1 }
 0xd8a   :  { %v2793_v41 = vpop.f32.mrb[70].mxu1 }
 0xd8b   :  { %v6533_v42 = vadd.f32 %v2791_v35, %v6513_v55  ;;  %v2794_v43 = vadd.f32 %v2793_v41, %v2707_v37  ;;  %v5454_v44 = vpop.f32.mrb[71].mxu1  ;;  %v5818_v55 = vld [vmem:[#allocation5 + $0x1b0] ss:$24 sps:$4 sm:$0xff]  }
 0xd8c   :  { %3131 = vmatpush1.bf16.msra.mxu0 %v5818_v55 }
 0xd8d   :  { %v6536_v45 = vadd.f32 %v2794_v43, %v6515_v2  ;;  %2799 = vadd.xlane.f32.xlu1 %v6533_v42  ;;  %v2805_v46 = vmul.f32 %v6533_v42, %v6533_v42  ;;  %v5823_v2 = vld [vmem:[#allocation5 + $0x1bc] ss:$24 sps:$4 sm:$0xff]   ;;  %3132 = vmatprep.subr.bf16.mxu0 %v5826_v16 }
 0xd8e   :  { %3173 = vmatprep.subr.bf16.mxu1 %v5823_v2 }
 0xd8f   :  { %2801 = vadd.xlane.f32.xlu0 %v6536_v45  ;;  %v2806_v52 = vmul.f32 %v6536_v45, %v6536_v45  ;;  %3174 = vmatpush1.bf16.msra.mxu1 %v5821_v33 }
 0xd90   :  { %3133 = vmatpush1.bf16.msra.mxu0 %v5824_v56  ;;  %3175 = vmatprep.subr.bf16.mxu1 %v5829_v57 }
 0xd91   :  { %2807 = vadd.xlane.f32.xlu1 %v2805_v46  ;;  %3134 = vmatprep.subr.bf16.mxu0 %v5832_v59  ;;  %v6548_v46 = vld [vmem:[%s6779_s4 + $0x10] sm:$0xff]  ;;  %v5865_v59 = vld [vmem:[#allocation5 + $0x1c4] ss:$24 sps:$4 sm:$0xff]  }
 0xd92   :  { %v2830_v47 = vrot.slane %v6548_v46, %v6320_v36  ;;  %v2836_v33 = vrot.slane %v6548_v46, %v6304_v18 }
 0xd93   :  { %2809 = vadd.xlane.f32.xlu0 %v2806_v52  ;;  %3176 = vmatpush1.bf16.msra.mxu1 %v5827_v40  ;;  %v5860_v40 = vld [vmem:[#allocation5 + $0x190] ss:$24 sps:$4 sm:$0xff]  }
 0xd94   :  { %3135 = vmatpush1.bf16.msra.mxu0 %v5830_v60  ;;  %3177 = vmatprep.subr.bf16.mxu1 %v5835_v61  ;;  %v5868_v60 = vld [vmem:[#allocation5 + $0x1f4] ss:$24 sps:$4 sm:$0xff]   ;;  %v5866_v61 = vld [vmem:[#allocation5 + $0x1f0] ss:$24 sps:$4 sm:$0xff]  }
 0xd95   :  { %3136 = vmatprep.subr.bf16.mxu0 %v5838_v4  ;;  %v5874_v4 = vld [vmem:[#allocation5 + $0x254] ss:$24 sps:$4 sm:$0xff]  }
 0xd97   :  { %3178 = vmatpush1.bf16.msra.mxu1 %v5833_v62  ;;  %v5871_v62 = vld [vmem:[#allocation5 + $0x224] ss:$24 sps:$4 sm:$0xff]  }
 0xd98   :  { %3179 = vmatprep.subr.bf16.mxu1 %v5841_v7  ;;  %3137 = vmatpush1.bf16.msra.mxu0 %v5836_v3  ;;  %v5869_v3 = vld [vmem:[#allocation5 + $0x220] ss:$24 sps:$4 sm:$0xff]   ;;  %v5877_v7 = vld [vmem:[#allocation5 + $0x284] ss:$24 sps:$4 sm:$0xff]  }
 0xd99   :  { %3138 = vmatprep.subr.bf16.mxu0 %v5844_v28  ;;  %v5875_v28 = vld [vmem:[#allocation5 + $0x280] ss:$24 sps:$4 sm:$0xff]  }
 0xd9b   :  { %3180 = vmatpush1.bf16.msra.mxu1 %v5839_v5  ;;  %v5872_v5 = vld [vmem:[#allocation5 + $0x250] ss:$24 sps:$4 sm:$0xff]  }
 0xd9c   :  { %3181 = vmatprep.subr.bf16.mxu1 %v5847_v8  ;;  %3139 = vmatpush1.bf16.msra.mxu0 %v5842_v9  ;;  %v5878_v8 = vld [vmem:[#allocation5 + $0x2b0] ss:$24 sps:$4 sm:$0xff]   ;;  %v5883_v9 = vld [vmem:[#allocation5 + $0x2e4] ss:$24 sps:$4 sm:$0xff]  }
 0xd9d   :  { %3140 = vmatprep.subr.bf16.mxu0 %v5850_v10  ;;  %v3266_v10 = vrot.slane %v6548_v46, %v6366_v22 }
 0xd9f   :  { %3182 = vmatpush1.bf16.msra.mxu1 %v5845_v34  ;;  %v5881_v34 = vld [vmem:[#allocation5 + $0x2e0] ss:$24 sps:$4 sm:$0xff]  }
 0xda0   :  { %3183 = vmatprep.subr.bf16.mxu1 %v5853_v11  ;;  %3141 = vmatpush1.bf16.msra.mxu0 %v5848_v31 }
 0xda1   :  { %3142 = vmatprep.subr.bf16.mxu0 %v5856_v24 }
 0xda3   :  { %3184 = vmatpush1.bf16.msra.mxu1 %v5851_v15  ;;  %v3272_v15 = vrot.slane %v6548_v46, %v6433_v63 }
 0xda4   :  { %3185 = vmatprep.subr.bf16.mxu1 %v5859_v25  ;;  %3143 = vmatpush1.bf16.msra.mxu0 %v5854_v26 }
 0xda5   :  { %3214 = vmatprep.subr.bf16.mxu0 %v5862_v17 }
 0xda7   :  { %3186 = vmatpush1.bf16.msra.mxu1 %v5857_v13  ;;  %v3501_v13 = vrot.slane %v6548_v46, %v6360_v12 }
 0xda8   :  { %5455 = vmatprep.subr.bf16.mxu1 %v6089_v1 }
 0xe1a   :  { %v2800_v14 = vpop.xlane.xlu1 %2799 }
 0xe1b   :  { %v2803_v20 = vmul.f32 0.03125, %v2800_v14 }
 0xe1c   :  { %v2802_v19 = vpop.xlane.xlu0 %2801 }
 0xe1d   :  { %v2804_v21 = vmul.f32 0.03125, %v2802_v19  ;;  %v2813_v27 = vmul.f32 %v2803_v20, %v2803_v20  ;;  %v2819_v52 = vsub.f32 %v6533_v42, %v2803_v20  ;;  %v3260_v20 = vrot.slane %v6548_v46, %v6338_v6 }
 0xe1e   :  { %v2808_v23 = vpop.xlane.xlu1 %2807 }
 0xe1f   :  { %v2811_v29 = vmul.f32 0.03125, %v2808_v23  ;;  %v2814_v58 = vmul.f32 %v2804_v21, %v2804_v21  ;;  %v2820_v49 = vsub.f32 %v6536_v45, %v2804_v21  ;;  %v5863_v45 = vld [vmem:[#allocation5 + $0x1c0] ss:$24 sps:$4 sm:$0xff]  }
 0xe20   :  { %v2810_v30 = vpop.xlane.xlu0 %2809 }
 0xe21   :  { %v2815_v37 = vsub.f32 %v2811_v29, %v2813_v27  ;;  %v2812_v32 = vmul.f32 0.03125, %v2810_v30 }
 0xe23   :  { %v2817_v35 = vmax.f32 %v2815_v37, 0.0  ;;  %v2816_v39 = vsub.f32 %v2812_v32, %v2814_v58 }
 0xe25   :  { %v2821_v41 = vadd.f32 1e-12, %v2817_v35  ;;  %v2818_v43 = vmax.f32 %v2816_v39, 0.0 }
 0xe27   :  { %5960 = vrsqrt.f32 %v2821_v41  ;;  %v2822_v44 = vadd.f32 1e-12, %v2818_v43 }
 0xe29   :  { %5962 = vrsqrt.f32 %v2822_v44 }
 0xe31   :  { %v5961_v48 = vpop.eup %5960 }
 0xe32   :  { %v2825_v50 = vmul.f32 %v5961_v48, %v2819_v52  ;;  %v3507_v52 = vrot.slane %v6548_v46, %v6394_v54  ;;  %v3513_v48 = vrot.slane %v6548_v46, %v6384_v51 }
 0xe33   :  { %v5963_v53 = vpop.eup %5962 }
 0xe34   :  { %v2826_v55 = vmul.f32 %v5963_v53, %v2820_v49  ;;  %v2831_v2 = vmul.f32 %v2830_v47, %v2825_v50 }
 0xe36   :  { %v2832_v16 = vmul.f32 %v2830_v47, %v2826_v55  ;;  %v6556_v56 = vadd.f32 %v2836_v33, %v2831_v2 }
 0xe38   :  { %v6558_v57 = vadd.f32 %v2836_v33, %v2832_v16 }
 0xe3a   :  { %v2839_v42 = vpack.c.bf16 %v6558_v57, %v6556_v56 }
 0xe3c   :  { %3161 = vmatmul.mubr.bf16.vlgmr.msra.gmra.mrb[60].mxu0 %v2839_v42  ;;  %3204 = vmatmul.mubr.bf16.vlgmr.msra.gmra.mrb[72].mxu1 %v2839_v42 }
 0xe3d   :  { %3215 = vmatpush1.bf16.msra.mxu0 %v5860_v40  ;;  %3246 = vmatprep.mubr.bf16.mxu0 %v6088_v0  ;;  %v5880_v0 = vld [vmem:[#allocation5 + $0x2b4] ss:$24 sps:$4 sm:$0xff]  }
 0xe3e   :  { %3216 = vmatprep.subr.bf16.mxu0 %v5865_v59  ;;  %5457 = vmatprep.mubr.msk.bf16.mxu1 %vm6090_vm0, %v6089_v1 }
 0xe41   :  { %3217 = vmatpush1.bf16.msra.mxu0 %v5863_v45 }
 0xe42   :  { %3218 = vmatprep.subr.bf16.mxu0 %v5868_v60 }
 0xe45   :  { %3219 = vmatpush1.bf16.msra.mxu0 %v5866_v61 }
 0xe46   :  { %3220 = vmatprep.subr.bf16.mxu0 %v5871_v62 }
 0xe49   :  { %3221 = vmatpush1.bf16.msra.mxu0 %v5869_v3 }
 0xe4a   :  { %3222 = vmatprep.subr.bf16.mxu0 %v5874_v4 }
 0xe4d   :  { %3223 = vmatpush1.bf16.msra.mxu0 %v5872_v5  ;;  %v6008_v5 = vld [vmem:[%s6776_s1] ss:$0 sm:$0xff] }
 0xe4e   :  { %3224 = vmatprep.subr.bf16.mxu0 %v5877_v7 }
 0xe51   :  { %3225 = vmatpush1.bf16.msra.mxu0 %v5875_v28 }
 0xe52   :  { %3226 = vmatprep.subr.bf16.mxu0 %v5880_v0 }
 0xe55   :  { %3227 = vmatpush1.bf16.msra.mxu0 %v5878_v8 }
 0xe56   :  { %3228 = vmatprep.subr.bf16.mxu0 %v5883_v9 }
 0xe59   :  { %3229 = vmatpush1.bf16.msra.mxu0 %v5881_v34 }
 0xe5a   :  { %5479 = vmatprep.subr.bf16.mxu0 %v6089_v1 }
 0xe5c   :  { %3247 = vmatmul.mubr.bf16.vlgmr.msra.gmra.mrb[64].mxu0 %v2839_v42 }
 0xe5d   :  { %5481 = vmatprep.mubr.msk.bf16.mxu0 %vm6090_vm0, %v6089_v1 }
 0xf0f   :  { %v3162_v11 = vpop.f32.mrb[60].mxu0  ;;  %v3205_v31 = vpop.f32.mrb[72].mxu1 }
 0xf10   :  { %v3164_v24 = vpop.f32.mrb[61].mxu0  ;;  %v3207_v25 = vpop.f32.mrb[73].mxu1  ;;  %v3261_v30 = vadd.f32 %v3260_v20, %v3162_v11  ;;  %v3273_v35 = vadd.f32 %v3272_v15, %v3205_v31  ;;  %v6608_v11 = vld [vmem:[%s6776_s1 + $0x1] ss:$0 sm:$0xff] }
 0xf11   :  { %v3267_v26 = vadd.f32 %v3266_v10, %v3164_v24  ;;  %v3166_v17 = vpop.f32.mrb[62].mxu0  ;;  %v3209_v14 = vpop.f32.mrb[74].mxu1  ;;  %v3502_v42 = vadd.f32 %v3501_v13, %v3207_v25 }
 0xf12   :  { %v6576_v19 = vadd.f32 %v3272_v15, %v3209_v14  ;;  %v3168_v21 = vpop.f32.mrb[63].mxu0  ;;  %v3211_v23 = vpop.f32.mrb[75].mxu1  ;;  %v3275_v37 = vpack.c.bf16 %v3261_v30, %v3261_v30  ;;  %v3262_v39 = vadd.f32 %v3260_v20, %v3166_v17  ;;  %v3279_v41 = vpack.c.bf16 %v3273_v35, %v3273_v35 }
 0xf13   :  { %v3277_v27 = vpack.c.bf16 %v3267_v26, %v3267_v26  ;;  %v6578_v29 = vadd.f32 %v3501_v13, %v3211_v23  ;;  %v3268_v58 = vadd.f32 %v3266_v10, %v3168_v21  ;;  %v3516_v45 = vpack.c.bf16 %v3502_v42, %v3502_v42 }
 0xf14   :  { %v3276_v43 = vpack.c.bf16 %v3262_v39, %v3262_v39  ;;  %v3393_v44 = vsel %vm1985_vm13, %v3279_v41, 0 }
 0xf15   :  { %5456 = vmatpush3.bf16.xpose.msra.mxu1 %v3277_v27  ;;  %v3278_v32 = vpack.c.bf16 %v3268_v58, %v3268_v58 }
 0xf16   :  { %5461 = vmatprep.subr.bf16.mxu1 %v6089_v1 }
 0xf1c   :  { %5458 = vmatmul.mubr.bf16.vlgmr.msra.gmra.mrb[76].mxu1 %v3275_v37 }
 0xf1d   :  { %5462 = vmatpush3.bf16.xpose.msra.mxu1 %v3278_v32  ;;  %5463 = vmatprep.mubr.msk.bf16.mxu1 %vm6090_vm0, %v6089_v1 }
 0xf1e   :  { %5467 = vmatprep.subr.bf16.mxu1 %v6089_v1 }
 0xf24   :  { %5464 = vmatmul.mubr.bf16.vlgmr.msra.gmra.mrb[80].mxu1 %v3276_v43 }
 0xf25   :  { %5468 = vmatpush3.bf16.msra.mxu1 %v3393_v44  ;;  %5469 = vmatprep.mubr.msk.bf16.mxu1 %vm6090_vm0, %v6089_v1 }
 0xf26   :  { %5473 = vmatprep.subr.bf16.mxu1 %v6089_v1 }
 0xf2f   :  { %v3248_v47 = vpop.f32.mrb[64].mxu0 }
 0xf30   :  { %v3508_v49 = vadd.f32 %v3507_v52, %v3248_v47  ;;  %v3250_v50 = vpop.f32.mrb[65].mxu0 }
 0xf31   :  { %v3252_v53 = vpop.f32.mrb[66].mxu0  ;;  %v3514_v16 = vadd.f32 %v3513_v48, %v3250_v50  ;;  %v3280_v50 = vpack.c.bf16 %v6576_v19, %v6576_v19 }
 0xf32   :  { %v3518_v55 = vpack.c.bf16 %v3508_v49, %v3508_v49  ;;  %v6592_v2 = vadd.f32 %v3507_v52, %v3252_v53  ;;  %v3254_v33 = vpop.f32.mrb[67].mxu0 }
 0xf33   :  { %v6594_v40 = vadd.f32 %v3513_v48, %v3254_v33  ;;  %v3520_v59 = vpack.c.bf16 %v3514_v16, %v3514_v16  ;;  %v3439_v33 = vsel %vm1985_vm13, %v3280_v50, 0  ;;  %v5884_v50 = vld [vmem:[#allocation2 + $0x340] sm:$0xff]  }
 0xf34   :  { %5480 = vmatpush3.bf16.xpose.msra.mxu0 %v3518_v55  ;;  %v3519_v19 = vpack.c.bf16 %v6592_v2, %v6592_v2 }
 0xf35   :  { %5491 = vmatprep.subr.bf16.mxu0 %v6089_v1  ;;  %v3634_v60 = vsel %vm1985_vm13, %v3520_v59, 0 }
 0xf3b   :  { %5482 = vmatmul.mubr.bf16.vlgmr.msra.gmra.mrb[68].mxu0 %v3516_v45 }
 0xf3c   :  { %5492 = vmatpush3.bf16.msra.mxu0 %v3634_v60  ;;  %5493 = vmatprep.mubr.msk.bf16.mxu0 %vm6090_vm0, %v6089_v1 }
 0xf3d   :  { %5503 = vmatprep.subr.bf16.mxu0 %v6089_v1 }
 0xfef   :  { %v3315_v46 = vpop.f32.mrb[76].mxu1 }
 0xff0   :  { %v3361_v61 = vmul.f32 0.25, %v3315_v46  ;;  %v5459_v62 = vpop.f32.mrb[77].mxu1  ;;  %v3521_v46 = vpack.c.bf16 %v6594_v40, %v6594_v40 }
 0xff1   :  { %v3318_v3 = vpop.f32.mrb[78].mxu1 }
 0xff2   :  { %v5460_v4 = vpop.f32.mrb[79].mxu1  ;;  %v3363_v7 = vadd.f32 %v6008_v5, %v3361_v61  ;;  %v3517_v61 = vpack.c.bf16 %v6578_v29, %v6578_v29  ;;  %v3680_v62 = vsel %vm1985_vm13, %v3521_v46, 0 }
 0xff4   :  { %v3365_v28 = vsel %vm1957_vm14, %v3363_v7, -inf }
 0xff5   :  { %3366 = vmax.xlane.f32.xlu1 %v3365_v28 }
 0xff7   :  { %v3355_v0 = vpop.f32.mrb[80].mxu1 }
 0xff8   :  { %v3362_v8 = vmul.f32 0.25, %v3355_v0  ;;  %v5465_v9 = vpop.f32.mrb[81].mxu1 }
 0xff9   :  { %v3358_v34 = vpop.f32.mrb[82].mxu1 }
 0xffa   :  { %v5466_v10 = vpop.f32.mrb[83].mxu1  ;;  %v3364_v31 = vadd.f32 %v6608_v11, %v3362_v8 }
 0xffc   :  { %v3368_v15 = vsel %vm1957_vm14, %v3364_v31, -inf }
 0xffd   :  { %3369 = vmax.xlane.f32.xlu0 %v3368_v15 }
0x100e   :  { %v3556_v24 = vpop.f32.mrb[68].mxu0 }
0x100f   :  { %v5483_v25 = vpop.f32.mrb[69].mxu0  ;;  %v3602_v30 = vmul.f32 0.25, %v3556_v24 }
0x1010   :  { %v3559_v26 = vpop.f32.mrb[70].mxu0 }
0x1011   :  { %v5484_v13 = vpop.f32.mrb[71].mxu0  ;;  %v3604_v32 = vadd.f32 %v6008_v5, %v3602_v30 }
0x1013   :  { %v3606_v35 = vsel %vm1957_vm14, %v3604_v32, -inf }
0x1082   :  { %v3367_v17 = vpop.xlane.xlu1 %3366 }
0x1083   :  { %v3371_v14 = vsub.f32 %v3363_v7, %v3367_v17 }
0x1085   :  { %v3373_v20 = vmul.f32 1.442695, %v3371_v14 }
0x1087   :  { %5964 = vpow2.f32 %v3373_v20 }
0x108a   :  { %v3370_v21 = vpop.xlane.xlu0 %3369 }
0x108b   :  { %v3372_v23 = vsub.f32 %v3364_v31, %v3370_v21 }
0x108d   :  { %v3375_v27 = vmul.f32 1.442695, %v3372_v23 }
0x108f   :  { %5966 = vpow2.f32 %v3375_v27 }
0x1091   :  { %v5965_v58 = vpop.eup %5964 }
0x1092   :  { %v3377_v37 = vsel %vm1957_vm14, %v5965_v58, 0.0 }
0x1093   :  { %3378 = vadd.xlane.f32.xlu1 %v3377_v37 }
0x1097   :  { %3607 = vmax.xlane.f32.xlu1 %v3606_v35  ;;  %v5892_v35 = vld [vmem:[#allocation2 + $0x380] sm:$0xff]  }
0x1099   :  { %v5967_v39 = vpop.eup %5966 }
0x109a   :  { %v3380_v41 = vsel %vm1957_vm14, %v5967_v39, 0.0 }
0x109b   :  { %3381 = vadd.xlane.f32.xlu0 %v3380_v41  ;;  %v5895_v41 = vld [vmem:[#allocation2 + $0x398] sm:$0xff]  }
0x1120   :  { %v3379_v43 = vpop.xlane.xlu1 %3378 }
0x1121   :  { %5968 = vrcp.f32 %v3379_v43  ;;  %v5896_v43 = vld [vmem:[#allocation2 + $0x3a0] sm:$0xff]  }
0x1124   :  { %v3608_v44 = vpop.xlane.xlu1 %3607 }
0x1125   :  { %v3612_v52 = vsub.f32 %v3604_v32, %v3608_v44  ;;  %v5897_v44 = vld [vmem:[#allocation2 + $0x3a8] sm:$0xff]  }
0x1127   :  { %v3614_v47 = vmul.f32 1.442695, %v3612_v52  ;;  %v5898_v52 = vld [vmem:[#allocation2 + $0x3b0] sm:$0xff]  }
0x1128   :  { %v3382_v48 = vpop.xlane.xlu0 %3381 }
0x1129   :  { %5970 = vpow2.f32 %v3614_v47 }
0x112a   :  { %5972 = vrcp.f32 %v3382_v48 }
0x112b   :  { %v5969_v49 = vpop.eup %5968 }
0x112c   :  { %v3385_v53 = vmul.f32 %v5969_v49, %v5965_v58 }
0x112e   :  { %v3387_v55 = vpack.c.bf16 %v3385_v53, %v3385_v53 }
0x1130   :  { %5470 = vmatmul.mubr.msk.bf16.vlgmr.msra.gmra.mrb[84].mxu1 %vm1957_vm14, %v3387_v55  ;;  %v5885_v55 = vld [vmem:[#allocation2 + $0x348] sm:$0xff]  }
0x1131   :  { %5474 = vmatpush3.bf16.msra.mxu1 %v3439_v33  ;;  %5475 = vmatprep.mubr.msk.bf16.mxu1 %vm6090_vm0, %v6089_v1  ;;  %v5886_v33 = vld [vmem:[#allocation2 + $0x350] sm:$0xff]  }
0x1132   :  { %5485 = vmatprep.subr.bf16.mxu1 %v6089_v1 }
0x1133   :  { %v5971_v16 = vpop.eup %5970 }
0x1134   :  { %v5973_v42 = vpop.eup %5972  ;;  %v3618_v59 = vsel %vm1957_vm14, %v5971_v16, 0.0 }
0x1135   :  { %v3386_v45 = vmul.f32 %v5973_v42, %v5967_v39  ;;  %3619 = vadd.xlane.f32.xlu1 %v3618_v59  ;;  %v5893_v39 = vld [vmem:[#allocation2 + $0x388] sm:$0xff]   ;;  %v5888_v42 = vld [vmem:[#allocation2 + $0x360] sm:$0xff]  }
0x1136   :  { %v5889_v59 = vld [vmem:[#allocation2 + $0x368] sm:$0xff]  }
0x1137   :  { %v3388_v60 = vpack.c.bf16 %v3386_v45, %v3386_v45  ;;  %v5890_v45 = vld [vmem:[#allocation2 + $0x370] sm:$0xff]  }
0x1139   :  { %5476 = vmatmul.mubr.msk.bf16.vlgmr.msra.gmra.mrb[88].mxu1 %vm1957_vm14, %v3388_v60  ;;  %v5891_v60 = vld [vmem:[#allocation2 + $0x378] sm:$0xff]  }
0x113a   :  { %5486 = vmatpush3.bf16.xpose.msra.mxu1 %v3519_v19  ;;  %5487 = vmatprep.mubr.msk.bf16.mxu1 %vm6090_vm0, %v6089_v1  ;;  %v5899_v19 = vld [vmem:[#allocation2 + $0x3b8] sm:$0xff]  }
0x113b   :  { %5497 = vmatprep.subr.bf16.mxu1 %v6089_v1 }
0x1141   :  { %5488 = vmatmul.mubr.bf16.vlgmr.msra.gmra.mrb[92].mxu1 %v3517_v61 }
0x1142   :  { %5498 = vmatpush3.bf16.msra.mxu1 %v3680_v62  ;;  %5499 = vmatprep.mubr.msk.bf16.mxu1 %vm6090_vm0, %v6089_v1 }
0x1143   :  { %5523 = vmatprep.subr.bf16.mxu1 %v6089_v1 }
0x11c2   :  { %v3620_v2 = vpop.xlane.xlu1 %3619 }
0x11c3   :  { %5974 = vrcp.f32 %v3620_v2 }
0x11cd   :  { %v5975_v3 = vpop.eup %5974 }
0x11ce   :  { %v3626_v4 = vmul.f32 %v5975_v3, %v5971_v16  ;;  %v5887_v16 = vld [vmem:[#allocation2 + $0x358] sm:$0xff]  }
0x11d0   :  { %v3628_v5 = vpack.c.bf16 %v3626_v4, %v3626_v4 }
0x11d2   :  { %5494 = vmatmul.mubr.msk.bf16.vlgmr.msra.gmra.mrb[72].mxu0 %vm1957_vm14, %v3628_v5 }
0x11d3   :  { %5519 = vmatprep.mubr.msk.bf16.mxu0 %vm6090_vm0, %v6089_v1  ;;  %5504 = vmatpush3.bf16.msra.mxu0 %v5892_v35 }
0x11d4   :  { %5505 = vmatprep.subr.bf16.mxu0 %v6089_v1 }
0x11d7   :  { %5506 = vmatpush3.bf16.msra.mxu0 %v5893_v39 }
0x11d8   :  { %5507 = vmatprep.subr.bf16.mxu0 %v6089_v1 }
0x1203   :  { %v6640_v29 = vpop.f32.mrb[84].mxu1 }
0x1204   :  { %v5471_v40 = vpop.f32.mrb[85].mxu1 }
0x1205   :  { %v3432_v7 = vpop.f32.mrb[86].mxu1 }
0x1206   :  { %v5472_v28 = vpop.f32.mrb[87].mxu1  ;;  %v6681_v7 = vld [vmem:[%s6779_s4 + $0x18] sm:$0xff] }
0x1207   :  { %v3920_v28 = vrot.slane %v6681_v7, %v6320_v36 }
0x120c   :  { %v6642_v0 = vpop.f32.mrb[88].mxu1 }
0x120d   :  { %v3481_v8 = vpack.c.bf16 %v6642_v0, %v6640_v29  ;;  %v5477_v9 = vpop.f32.mrb[89].mxu1 }
0x120e   :  { %v3478_v34 = vpop.f32.mrb[90].mxu1 }
0x120f   :  { %v5478_v10 = vpop.f32.mrb[91].mxu1 }
0x1214   :  { %v3596_v31 = vpop.f32.mrb[92].mxu1 }
0x1215   :  { %v3603_v15 = vmul.f32 0.25, %v3596_v31  ;;  %v5489_v24 = vpop.f32.mrb[93].mxu1 }
0x1216   :  { %v3599_v25 = vpop.f32.mrb[94].mxu1 }
0x1217   :  { %v5490_v26 = vpop.f32.mrb[95].mxu1  ;;  %v3605_v13 = vadd.f32 %v6608_v11, %v3603_v15  ;;  %v5894_v11 = vld [vmem:[#allocation2 + $0x390] sm:$0xff]  }
0x1218   :  { %5508 = vmatpush3.bf16.msra.mxu0 %v5894_v11 }
0x1219   :  { %v3609_v17 = vsel %vm1957_vm14, %v3605_v13, -inf  ;;  %5509 = vmatprep.subr.bf16.mxu0 %v6089_v1 }
0x121a   :  { %3610 = vmax.xlane.f32.xlu0 %v3609_v17 }
0x121c   :  { %5510 = vmatpush3.bf16.msra.mxu0 %v5895_v41 }
0x121d   :  { %5511 = vmatprep.subr.bf16.mxu0 %v6089_v1 }
0x1220   :  { %5512 = vmatpush3.bf16.msra.mxu0 %v5896_v43 }
0x1221   :  { %5513 = vmatprep.subr.bf16.mxu0 %v6089_v1 }
0x1224   :  { %5514 = vmatpush3.bf16.msra.mxu0 %v5897_v44 }
0x1225   :  { %5515 = vmatprep.subr.bf16.mxu0 %v6089_v1 }
0x1228   :  { %5516 = vmatpush3.bf16.msra.mxu0 %v5898_v52 }
0x1229   :  { %5517 = vmatprep.subr.bf16.mxu0 %v6089_v1 }
0x122c   :  { %5518 = vmatpush3.bf16.msra.mxu0 %v5899_v19 }
0x122d   :  { %5543 = vmatprep.subr.bf16.mxu0 %v6089_v1 }
0x12a5   :  { %v6648_v14 = vpop.f32.mrb[72].mxu0 }
0x12a6   :  { %v5495_v20 = vpop.f32.mrb[73].mxu0 }
0x12a7   :  { %v3611_v21 = vpop.xlane.xlu0 %3610  ;;  %v3673_v23 = vpop.f32.mrb[74].mxu0  ;;  %v5901_v20 = vld [vmem:[#allocation2 + $0x3c8] sm:$0xff]  }
0x12a8   :  { %v3613_v27 = vsub.f32 %v3605_v13, %v3611_v21  ;;  %v5496_v30 = vpop.f32.mrb[75].mxu0  ;;  %v5902_v21 = vld [vmem:[#allocation2 + $0x3d0] sm:$0xff]   ;;  %v5905_v23 = vld [vmem:[#allocation2 + $0x3e8] sm:$0xff]  }
0x12a9   :  { %v5907_v30 = vld [vmem:[#allocation2 + $0x3f8] sm:$0xff]  }
0x12aa   :  { %v3616_v58 = vmul.f32 1.442695, %v3613_v27  ;;  %v5906_v27 = vld [vmem:[#allocation2 + $0x3f0] sm:$0xff]  }
0x12ac   :  { %5976 = vpow2.f32 %v3616_v58 }
0x12b6   :  { %v5977_v37 = vpop.eup %5976 }
0x12b7   :  { %v3621_v32 = vsel %vm1957_vm14, %v5977_v37, 0.0 }
0x12b8   :  { %3622 = vadd.xlane.f32.xlu0 %v3621_v32 }
0x1345   :  { %v3623_v47 = vpop.xlane.xlu0 %3622 }
0x1346   :  { %5978 = vrcp.f32 %v3623_v47 }
0x1350   :  { %v5979_v48 = vpop.eup %5978 }
0x1351   :  { %v3627_v49 = vmul.f32 %v5979_v48, %v5977_v37 }
0x1353   :  { %v3629_v53 = vpack.c.bf16 %v3627_v49, %v3627_v49 }
0x1355   :  { %5500 = vmatmul.mubr.msk.bf16.vlgmr.msra.gmra.mrb[96].mxu1 %vm1957_vm14, %v3629_v53 }
0x1356   :  { %5524 = vmatpush3.bf16.msra.mxu1 %v5884_v50  ;;  %5539 = vmatprep.mubr.msk.bf16.mxu1 %vm6090_vm0, %v6089_v1 }
0x1357   :  { %5525 = vmatprep.subr.bf16.mxu1 %v6089_v1 }
0x135a   :  { %5526 = vmatpush3.bf16.msra.mxu1 %v5885_v55 }
0x135b   :  { %5527 = vmatprep.subr.bf16.mxu1 %v6089_v1 }
0x135e   :  { %5528 = vmatpush3.bf16.msra.mxu1 %v5886_v33 }
0x135f   :  { %5529 = vmatprep.subr.bf16.mxu1 %v6089_v1 }
0x1362   :  { %5530 = vmatpush3.bf16.msra.mxu1 %v5887_v16  ;;  %v3956_v16 = vrot.slane %v6681_v7, %v6304_v18 }
0x1363   :  { %5531 = vmatprep.subr.bf16.mxu1 %v6089_v1 }
0x1366   :  { %5532 = vmatpush3.bf16.msra.mxu1 %v5888_v42 }
0x1367   :  { %5533 = vmatprep.subr.bf16.mxu1 %v6089_v1 }
0x136a   :  { %5534 = vmatpush3.bf16.msra.mxu1 %v5889_v59 }
0x136b   :  { %5535 = vmatprep.subr.bf16.mxu1 %v6089_v1 }
0x136e   :  { %5536 = vmatpush3.bf16.msra.mxu1 %v5890_v45 }
0x136f   :  { %5537 = vmatprep.subr.bf16.mxu1 %v6089_v1 }
0x1372   :  { %5538 = vmatpush3.bf16.msra.mxu1 %v5891_v60 }
0x1373   :  { %5563 = vmatprep.subr.bf16.mxu1 %v6089_v1 }
0x1375   :  { %5540 = vmatmul.mubr.bf16.vlgmr.msra.gmra.mrb[100].mxu1 %v3481_v8 }
0x1376   :  { %5579 = vmatprep.mubr.msk.bf16.mxu1 %vm6090_vm0, %v6089_v1 }
0x1428   :  { %v3716_v46 = vpop.f32.mrb[96].mxu1 }
0x1429   :  { %v3722_v61 = vpack.c.bf16 %v3716_v46, %v6648_v14  ;;  %v5501_v62 = vpop.f32.mrb[97].mxu1  ;;  %v5900_v14 = vld [vmem:[#allocation2 + $0x3c0] sm:$0xff]  }
0x142a   :  { %v3719_v2 = vpop.f32.mrb[98].mxu1 }
0x142b   :  { %v5502_v3 = vpop.f32.mrb[99].mxu1  ;;  %5520 = vmatmul.mubr.bf16.vlgmr.msra.gmra.mrb[76].mxu0 %v3722_v61  ;;  %v3962_v61 = vrot.slane %v6681_v7, %v6338_v6 }
0x142c   :  { %5559 = vmatprep.mubr.msk.bf16.mxu0 %vm6090_vm0, %v6089_v1  ;;  %5544 = vmatpush3.bf16.msra.mxu0 %v5900_v14 }
0x142d   :  { %5545 = vmatprep.subr.bf16.mxu0 %v6089_v1 }
0x1430   :  { %5546 = vmatpush3.bf16.msra.mxu0 %v5901_v20 }
0x1431   :  { %5547 = vmatprep.subr.bf16.mxu0 %v6089_v1 }
0x1434   :  { %5548 = vmatpush3.bf16.msra.mxu0 %v5902_v21 }
0x1435   :  { %5549 = vmatprep.subr.bf16.mxu0 %v6089_v1 }
0x1448   :  { %v3910_v4 = vpop.f32.mrb[100].mxu1 }
0x1449   :  { %v5541_v5 = vpop.f32.mrb[101].mxu1 }
0x144a   :  { %v3913_v29 = vpop.f32.mrb[102].mxu1  ;;  %v5908_v5 = vld [vmem:[#allocation2 + $0x400] sm:$0xff]  }
0x144b   :  { %v5542_v40 = vpop.f32.mrb[103].mxu1  ;;  %5564 = vmatpush3.bf16.msra.mxu1 %v5908_v5 }
0x144c   :  { %5565 = vmatprep.subr.bf16.mxu1 %v6089_v1  ;;  %v5910_v40 = vld [vmem:[#allocation2 + $0x410] sm:$0xff]  }
0x14fe   :  { %v3821_v0 = vpop.f32.mrb[76].mxu0 }
0x14ff   :  { %v3911_v8 = vadd.f32 %v3910_v4, %v3821_v0  ;;  %v5521_v9 = vpop.f32.mrb[77].mxu0  ;;  %v5912_v0 = vld [vmem:[#allocation2 + $0x420] sm:$0xff]  }
0x1500   :  { %v3824_v34 = vpop.f32.mrb[78].mxu0  ;;  %v5914_v9 = vld [vmem:[#allocation2 + $0x430] sm:$0xff]  }
0x1501   :  { %v3921_v10 = vadd.f32 %v3920_v28, %v3911_v8  ;;  %v3914_v31 = vadd.f32 %v3913_v29, %v3824_v34  ;;  %v5522_v15 = vpop.f32.mrb[79].mxu0  ;;  %v5909_v29 = vld [vmem:[#allocation2 + $0x408] sm:$0xff]   ;;  %v5915_v34 = vld [vmem:[#allocation2 + $0x438] sm:$0xff]  }
0x1502   :  { %5566 = vmatpush3.bf16.msra.mxu1 %v5909_v29  ;;  %v5913_v8 = vld [vmem:[#allocation2 + $0x428] sm:$0xff]  }
0x1503   :  { %v3922_v24 = vadd.f32 %v3920_v28, %v3914_v31  ;;  %v3923_v25 = vadd.f32 %v3921_v10, %v6556_v56  ;;  %v5903_v56 = vld [vmem:[#allocation2 + $0x3d8] sm:$0xff]   ;;  %5567 = vmatprep.subr.bf16.mxu1 %v6089_v1  ;;  %v3985_v10 = vrot.slane %v6681_v7, %v6360_v12 }
0x1504   :  { %5550 = vmatpush3.bf16.msra.mxu0 %v5903_v56  ;;  %v5911_v28 = vld [vmem:[#allocation2 + $0x418] sm:$0xff]  }
0x1505   :  { %3925 = vadd.xlane.f32.xlu1 %v3923_v25  ;;  %v3924_v26 = vadd.f32 %v3922_v24, %v6558_v57  ;;  %v3931_v13 = vmul.f32 %v3923_v25, %v3923_v25  ;;  %v5904_v57 = vld [vmem:[#allocation2 + $0x3e0] sm:$0xff]   ;;  %5551 = vmatprep.subr.bf16.mxu0 %v6089_v1 }
0x1506   :  { %5568 = vmatpush3.bf16.msra.mxu1 %v5910_v40 }
0x1507   :  { %3927 = vadd.xlane.f32.xlu0 %v3924_v26  ;;  %v3932_v17 = vmul.f32 %v3924_v26, %v3924_v26  ;;  %5569 = vmatprep.subr.bf16.mxu1 %v6089_v1 }
0x1508   :  { %5552 = vmatpush3.bf16.msra.mxu0 %v5904_v57 }
0x1509   :  { %3933 = vadd.xlane.f32.xlu1 %v3931_v13  ;;  %5553 = vmatprep.subr.bf16.mxu0 %v6089_v1 }
0x150a   :  { %5570 = vmatpush3.bf16.msra.mxu1 %v5911_v28 }
0x150b   :  { %3935 = vadd.xlane.f32.xlu0 %v3932_v17  ;;  %5571 = vmatprep.subr.bf16.mxu1 %v6089_v1 }
0x150c   :  { %5554 = vmatpush3.bf16.msra.mxu0 %v5905_v23 }
0x150d   :  { %5555 = vmatprep.subr.bf16.mxu0 %v6089_v1 }
0x150e   :  { %5572 = vmatpush3.bf16.msra.mxu1 %v5912_v0 }
0x150f   :  { %5573 = vmatprep.subr.bf16.mxu1 %v6089_v1 }
0x1510   :  { %5556 = vmatpush3.bf16.msra.mxu0 %v5906_v27 }
0x1511   :  { %5557 = vmatprep.subr.bf16.mxu0 %v6089_v1 }
0x1512   :  { %5574 = vmatpush3.bf16.msra.mxu1 %v5913_v8 }
0x1513   :  { %5575 = vmatprep.subr.bf16.mxu1 %v6089_v1 }
0x1514   :  { %5558 = vmatpush3.bf16.msra.mxu0 %v5907_v30 }
0x1515   :  { %5583 = vmatprep.subr.bf16.mxu0 %v6089_v1 }
0x1516   :  { %5576 = vmatpush3.bf16.msra.mxu1 %v5914_v9 }
0x1517   :  { %5577 = vmatprep.subr.bf16.mxu1 %v6089_v1 }
0x151a   :  { %5578 = vmatpush3.bf16.msra.mxu1 %v5915_v34 }
0x151b   :  { %5603 = vmatprep.subr.bf16.mxu1 %v6089_v1 }
0x1592   :  { %v3926_v58 = vpop.xlane.xlu1 %3925 }
0x1593   :  { %v3929_v37 = vmul.f32 0.03125, %v3926_v58 }
0x1594   :  { %v3928_v32 = vpop.xlane.xlu0 %3927 }
0x1595   :  { %v3930_v35 = vmul.f32 0.03125, %v3928_v32  ;;  %v3939_v11 = vmul.f32 %v3929_v37, %v3929_v37  ;;  %v3945_v33 = vsub.f32 %v3923_v25, %v3929_v37 }
0x1596   :  { %v3934_v39 = vpop.xlane.xlu1 %3933 }
0x1597   :  { %v3937_v41 = vmul.f32 0.03125, %v3934_v39  ;;  %v3940_v44 = vmul.f32 %v3930_v35, %v3930_v35  ;;  %v3946_v59 = vsub.f32 %v3924_v26, %v3930_v35 }
0x1598   :  { %v3936_v43 = vpop.xlane.xlu0 %3935 }
0x1599   :  { %v3941_v52 = vsub.f32 %v3937_v41, %v3939_v11  ;;  %v3938_v47 = vmul.f32 0.03125, %v3936_v43 }
0x159b   :  { %v3943_v48 = vmax.f32 %v3941_v52, 0.0  ;;  %v3942_v49 = vsub.f32 %v3938_v47, %v3940_v44  ;;  %v4113_v52 = vrot.slane %v6681_v7, %v6366_v22  ;;  %v5917_v22 = vld [vmem:[#allocation2 + $0x448] sm:$0xff]  }
0x159d   :  { %v3947_v50 = vadd.f32 1e-12, %v3943_v48  ;;  %v3944_v53 = vmax.f32 %v3942_v49, 0.0 }
0x159f   :  { %5980 = vrsqrt.f32 %v3947_v50  ;;  %v3948_v55 = vadd.f32 1e-12, %v3944_v53 }
0x15a1   :  { %5982 = vrsqrt.f32 %v3948_v55 }
0x15a9   :  { %v5981_v42 = vpop.eup %5980 }
0x15aa   :  { %v3951_v45 = vmul.f32 %v5981_v42, %v3945_v33 }
0x15ab   :  { %v5983_v60 = vpop.eup %5982 }
0x15ac   :  { %v3952_v19 = vmul.f32 %v5983_v60, %v3946_v59  ;;  %v3957_v46 = vmul.f32 %v3956_v16, %v3951_v45  ;;  %v5916_v45 = vld [vmem:[#allocation2 + $0x440] sm:$0xff]   ;;  %v5918_v60 = vld [vmem:[#allocation2 + $0x450] sm:$0xff]  }
0x15ae   :  { %v3958_v62 = vmul.f32 %v3956_v16, %v3952_v19  ;;  %v6699_v2 = vadd.f32 %v3962_v61, %v3957_v46  ;;  %v5919_v19 = vld [vmem:[#allocation2 + $0x458] sm:$0xff]   ;;  %v5920_v46 = vld [vmem:[#allocation2 + $0x460] sm:$0xff]  }
0x15b0   :  { %v6701_v3 = vadd.f32 %v3962_v61, %v3958_v62  ;;  %v5921_v61 = vld [vmem:[#allocation2 + $0x468] sm:$0xff]   ;;  %v5922_v62 = vld [vmem:[#allocation2 + $0x470] sm:$0xff]  }
0x15b2   :  { %v3965_v4 = vpack.c.bf16 %v6701_v3, %v6699_v2 }
0x15b4   :  { %5560 = vmatmul.mubr.bf16.vlgmr.msra.gmra.mrb[80].mxu0 %v3965_v4 }
0x15b5   :  { %5599 = vmatprep.mubr.msk.bf16.mxu0 %vm6090_vm0, %v6089_v1  ;;  %5584 = vmatpush3.bf16.msra.mxu0 %v5916_v45 }
0x15b6   :  { %5585 = vmatprep.subr.bf16.mxu0 %v6089_v1 }
0x15b9   :  { %5586 = vmatpush3.bf16.msra.mxu0 %v5917_v22 }
0x15ba   :  { %5587 = vmatprep.subr.bf16.mxu0 %v6089_v1 }
0x15bd   :  { %5588 = vmatpush3.bf16.msra.mxu0 %v5918_v60 }
0x15be   :  { %5589 = vmatprep.subr.bf16.mxu0 %v6089_v1 }
0x15c1   :  { %5590 = vmatpush3.bf16.msra.mxu0 %v5919_v19 }
0x15c2   :  { %5591 = vmatprep.subr.bf16.mxu0 %v6089_v1 }
0x15c5   :  { %5592 = vmatpush3.bf16.msra.mxu0 %v5920_v46 }
0x15c6   :  { %5593 = vmatprep.subr.bf16.mxu0 %v6089_v1 }
0x15c9   :  { %5594 = vmatpush3.bf16.msra.mxu0 %v5921_v61  ;;  %v5924_v61 = vld [vmem:[#allocation2 + $0x480] sm:$0xff]  }
0x15ca   :  { %5595 = vmatprep.subr.bf16.mxu0 %v6089_v1 }
0x15cd   :  { %5596 = vmatpush3.bf16.msra.mxu0 %v5922_v62  ;;  %v5925_v62 = vld [vmem:[#allocation2 + $0x488] sm:$0xff]  }
0x15ce   :  { %5597 = vmatprep.subr.bf16.mxu0 %v6089_v1 }
0x1687   :  { %v4068_v31 = vpop.f32.mrb[80].mxu0 }
0x1688   :  { %v4069_v15 = vadd.f32 %v4068_v31, %v3985_v10  ;;  %v5561_v24 = vpop.f32.mrb[81].mxu0 }
0x1689   :  { %v4071_v25 = vpop.f32.mrb[82].mxu0 }
0x168a   :  { %v4075_v26 = vmul.f32 %v4069_v15, %v4069_v15  ;;  %v4072_v13 = vadd.f32 %v4071_v25, %v3985_v10  ;;  %v5562_v17 = vpop.f32.mrb[83].mxu0 }
0x168b   :  { %v4236_v17 = vrot.slane %v6681_v7, %v6394_v54 }
0x168c   :  { %v4077_v14 = vmul.f32 %v4075_v26, %v4069_v15  ;;  %v4076_v20 = vmul.f32 %v4072_v13, %v4072_v13 }
0x168e   :  { %v4079_v21 = vmul.f32 0.044715, %v4077_v14  ;;  %v4078_v56 = vmul.f32 %v4076_v20, %v4072_v13 }
0x1690   :  { %v4081_v57 = vadd.f32 %v4079_v21, %v4069_v15  ;;  %v4080_v23 = vmul.f32 0.044715, %v4078_v56 }
0x1692   :  { %v4083_v27 = vmul.f32 0.7978846, %v4081_v57  ;;  %v4082_v30 = vadd.f32 %v4080_v23, %v4072_v13 }
0x1694   :  { %5984 = vtanh.f32 %v4083_v27  ;;  %v4084_v58 = vmul.f32 0.7978846, %v4082_v30  ;;  %v4242_v27 = vrot.slane %v6681_v7, %v6433_v63 }
0x1696   :  { %5986 = vtanh.f32 %v4084_v58 }
0x169e   :  { %v5985_v37 = vpop.eup %5984 }
0x169f   :  { %v4087_v12 = vadd.f32 1.0, %v5985_v37 }
0x16a0   :  { %v5987_v32 = vpop.eup %5986 }
0x16a1   :  { %v4089_v35 = vmul.f32 0.5, %v4087_v12  ;;  %v4088_v39 = vadd.f32 1.0, %v5987_v32  ;;  %v4265_v32 = vrot.slane %v6681_v7, %v6384_v51 }
0x16a3   :  { %v4090_v11 = vmul.f32 0.5, %v4088_v39  ;;  %v4091_v41 = vmul.f32 %v4089_v35, %v4069_v15 }
0x16a5   :  { %v4092_v43 = vmul.f32 %v4090_v11, %v4072_v13 }
0x16a7   :  { %v4093_v44 = vpack.c.bf16 %v4092_v43, %v4091_v41 }
0x16a9   :  { %5580 = vmatmul.mubr.bf16.vlgmr.msra.gmra.mrb[104].mxu1 %v4093_v44 }
0x16aa   :  { %5619 = vmatprep.mubr.msk.bf16.mxu1 %vm6090_vm0, %v6089_v1  ;;  %5604 = vmatpush3.bf16.msra.mxu1 %v5924_v61 }
0x16ab   :  { %5605 = vmatprep.subr.bf16.mxu1 %v6089_v1 }
0x16ae   :  { %5606 = vmatpush3.bf16.msra.mxu1 %v5925_v62 }
0x16af   :  { %5607 = vmatprep.subr.bf16.mxu1 %v6089_v1 }
0x177c   :  { %v4196_v47 = vpop.f32.mrb[104].mxu1 }
0x177d   :  { %v4197_v48 = vadd.f32 %v4196_v47, %v4113_v52  ;;  %v5581_v49 = vpop.f32.mrb[105].mxu1 }
0x177e   :  { %v4199_v50 = vpop.f32.mrb[106].mxu1 }
0x177f   :  { %v4203_v53 = vadd.f32 %v4197_v48, %v6699_v2  ;;  %v4200_v55 = vadd.f32 %v4199_v50, %v4113_v52  ;;  %v5582_v33 = vpop.f32.mrb[107].mxu1  ;;  %v5923_v2 = vld [vmem:[#allocation2 + $0x478] sm:$0xff]  }
0x1780   :  { %5598 = vmatpush3.bf16.msra.mxu0 %v5923_v2  ;;  %v5926_v2 = vld [vmem:[#allocation2 + $0x490] sm:$0xff]  }
0x1781   :  { %v4204_v16 = vadd.f32 %v4200_v55, %v6701_v3  ;;  %4205 = vadd.xlane.f32.xlu1 %v4203_v53  ;;  %v4211_v42 = vmul.f32 %v4203_v53, %v4203_v53  ;;  %5608 = vmatpush3.bf16.msra.mxu1 %v5926_v2 }
0x1782   :  { %5609 = vmatprep.subr.bf16.mxu1 %v6089_v1 }
0x1783   :  { %4207 = vadd.xlane.f32.xlu0 %v4204_v16  ;;  %v4212_v59 = vmul.f32 %v4204_v16, %v4204_v16 }
0x1785   :  { %4213 = vadd.xlane.f32.xlu1 %v4211_v42 }
0x1787   :  { %4215 = vadd.xlane.f32.xlu0 %v4212_v59 }
0x180e   :  { %v4206_v3 = vpop.xlane.xlu1 %4205 }
0x180f   :  { %v4209_v4 = vmul.f32 0.03125, %v4206_v3  ;;  %v5927_v3 = vld [vmem:[#allocation2 + $0x498] sm:$0xff]  }
0x1810   :  { %v4208_v5 = vpop.xlane.xlu0 %4207  ;;  %5610 = vmatpush3.bf16.msra.mxu1 %v5927_v3 }
0x1811   :  { %v4210_v29 = vmul.f32 0.03125, %v4208_v5  ;;  %v4219_v28 = vmul.f32 %v4209_v4, %v4209_v4  ;;  %v4225_v13 = vsub.f32 %v4203_v53, %v4209_v4  ;;  %v5928_v4 = vld [vmem:[#allocation2 + $0x4a0] sm:$0xff]   ;;  %5611 = vmatprep.subr.bf16.mxu1 %v6089_v1  ;;  %v5929_v5 = vld [vmem:[#allocation2 + $0x4a8] sm:$0xff]  }
0x1812   :  { %v4214_v40 = vpop.xlane.xlu1 %4213 }
0x1813   :  { %v4217_v0 = vmul.f32 0.03125, %v4214_v40  ;;  %v4220_v9 = vmul.f32 %v4210_v29, %v4210_v29  ;;  %v4226_v20 = vsub.f32 %v4204_v16, %v4210_v29  ;;  %v5930_v29 = vld [vmem:[#allocation2 + $0x4b0] sm:$0xff]   ;;  %v5931_v40 = vld [vmem:[#allocation2 + $0x4b8] sm:$0xff]  }
0x1814   :  { %v4216_v8 = vpop.xlane.xlu0 %4215  ;;  %5612 = vmatpush3.bf16.msra.mxu1 %v5928_v4 }
0x1815   :  { %v4221_v34 = vsub.f32 %v4217_v0, %v4219_v28  ;;  %v4218_v10 = vmul.f32 0.03125, %v4216_v8  ;;  %5613 = vmatprep.subr.bf16.mxu1 %v6089_v1 }
0x1817   :  { %v4223_v31 = vmax.f32 %v4221_v34, 0.0  ;;  %v4222_v15 = vsub.f32 %v4218_v10, %v4220_v9 }
0x1818   :  { %5614 = vmatpush3.bf16.msra.mxu1 %v5929_v5 }
0x1819   :  { %v4227_v24 = vadd.f32 1e-12, %v4223_v31  ;;  %v4224_v25 = vmax.f32 %v4222_v15, 0.0  ;;  %5615 = vmatprep.subr.bf16.mxu1 %v6089_v1 }
0x181b   :  { %5988 = vrsqrt.f32 %v4227_v24  ;;  %v4228_v26 = vadd.f32 1e-12, %v4224_v25 }
0x181c   :  { %5616 = vmatpush3.bf16.msra.mxu1 %v5930_v29 }
0x181d   :  { %5990 = vrsqrt.f32 %v4228_v26  ;;  %5617 = vmatprep.subr.bf16.mxu1 %v6089_v1  ;;  %v56_v1 = vld [vmem:[%s6779_s4 + $0x20] sm:$0xff] }
0x1820   :  { %5618 = vmatpush3.bf16.msra.mxu1 %v5931_v40 }
0x1825   :  { %v5989_v14 = vpop.eup %5988 }
0x1826   :  { %v4231_v21 = vmul.f32 %v5989_v14, %v4225_v13 }
0x1827   :  { %v5991_v56 = vpop.eup %5990 }
0x1828   :  { %v4232_v57 = vmul.f32 %v5991_v56, %v4226_v20  ;;  %v4237_v23 = vmul.f32 %v4236_v17, %v4231_v21 }
0x182a   :  { %v4238_v30 = vmul.f32 %v4236_v17, %v4232_v57  ;;  %v4243_v58 = vadd.f32 %v4242_v27, %v4237_v23  ;;  %v4404_v57 = vrot.slane %v56_v1, %v6320_v36 }
0x182c   :  { %v4244_v37 = vadd.f32 %v4242_v27, %v4238_v30 }
0x182e   :  { %v4245_v12 = vpack.c.bf16 %v4244_v37, %v4243_v58 }
0x1830   :  { %5600 = vmatmul.mubr.bf16.vlgmr.msra.gmra.mrb[84].mxu0 %v4245_v12 }
0x1903   :  { %v4348_v35 = vpop.f32.mrb[84].mxu0 }
0x1904   :  { %v4349_v39 = vadd.f32 %v4348_v35, %v4265_v32  ;;  %v5601_v54 = vpop.f32.mrb[85].mxu0 }
0x1905   :  { %v4351_v11 = vpop.f32.mrb[86].mxu0 }
0x1906   :  { %v4355_v41 = vmul.f32 %v4349_v39, %v4349_v39  ;;  %v4352_v43 = vadd.f32 %v4351_v11, %v4265_v32  ;;  %v5602_v44 = vpop.f32.mrb[87].mxu0  ;;  %v4410_v32 = vrot.slane %v56_v1, %v6304_v18  ;;  %v61_v18 = vld [vmem:[%s6775_s0 + $0x10] sm:$0xff] }
0x1908   :  { %v4357_v52 = vmul.f32 %v4355_v41, %v4349_v39  ;;  %v4356_v47 = vmul.f32 %v4352_v43, %v4352_v43  ;;  %v4433_v41 = vrot.slane %v56_v1, %v6338_v6  ;;  %v62_v6 = vld [vmem:[%s6775_s0 + $0x18] sm:$0xff]  ;;  %s6092_s0 = smov [#allocation7]  }
0x190a   :  { %v4359_v48 = vmul.f32 0.044715, %v4357_v52  ;;  %v4358_v49 = vmul.f32 %v4356_v47, %v4352_v43 }
0x190c   :  { %v4361_v63 = vadd.f32 %v4359_v48, %v4349_v39  ;;  %v4360_v50 = vmul.f32 0.044715, %v4358_v49 }
0x190e   :  { %v4363_v53 = vmul.f32 0.7978846, %v4361_v63  ;;  %v4362_v55 = vadd.f32 %v4360_v50, %v4352_v43 }
0x1910   :  { %v4364_v33 = vmul.f32 0.7978846, %v4362_v55  ;;  %5992 = vtanh.f32 %v4363_v53 }
0x1912   :  { %5994 = vtanh.f32 %v4364_v33 }
0x191a   :  { %v5993_v16 = vpop.eup %5992 }
0x191b   :  { %v4367_v51 = vadd.f32 1.0, %v5993_v16 }
0x191c   :  { %v5995_v7 = vpop.eup %5994 }
0x191d   :  { %v4369_v42 = vmul.f32 0.5, %v4367_v51  ;;  %v4368_v59 = vadd.f32 1.0, %v5995_v7 }
0x191f   :  { %v4371_v45 = vmul.f32 %v4369_v42, %v4349_v39  ;;  %v4370_v22 = vmul.f32 0.5, %v4368_v59 }
0x1921   :  { %4373 = vadd.xlane.f32.xlu1 %v4371_v45  ;;  %v4372_v60 = vmul.f32 %v4370_v22, %v4352_v43  ;;  %v4379_v19 = vmul.f32 %v4371_v45, %v4371_v45 }
0x1923   :  { %4375 = vadd.xlane.f32.xlu0 %v4372_v60  ;;  %v4380_v46 = vmul.f32 %v4372_v60, %v4372_v60 }
0x1925   :  { %4381 = vadd.xlane.f32.xlu1 %v4379_v19 }
0x1927   :  { %4383 = vadd.xlane.f32.xlu0 %v4380_v46 }
0x19ae   :  { %v4374_v28 = vpop.xlane.xlu1 %4373 }
0x19af   :  { %v4377_v0 = vmul.f32 0.03125, %v4374_v28 }
0x19b0   :  { %v4376_v8 = vpop.xlane.xlu0 %4375 }
0x19b1   :  { %v4378_v9 = vmul.f32 0.03125, %v4376_v8  ;;  %v4387_v10 = vmul.f32 %v4377_v0, %v4377_v0  ;;  %v4393_v56 = vsub.f32 %v4371_v45, %v4377_v0 }
0x19b2   :  { %v4382_v34 = vpop.xlane.xlu1 %4381 }
0x19b3   :  { %v4385_v31 = vmul.f32 0.03125, %v4382_v34  ;;  %v4388_v24 = vmul.f32 %v4378_v9, %v4378_v9  ;;  %v4394_v27 = vsub.f32 %v4372_v60, %v4378_v9 }
0x19b4   :  { %v4384_v15 = vpop.xlane.xlu0 %4383 }
0x19b5   :  { %v4389_v25 = vsub.f32 %v4385_v31, %v4387_v10  ;;  %v4386_v26 = vmul.f32 0.03125, %v4384_v15 }
0x19b7   :  { %v4391_v13 = vmax.f32 %v4389_v25, 0.0  ;;  %v4390_v17 = vsub.f32 %v4386_v26, %v4388_v24 }
0x19b9   :  { %v4395_v14 = vadd.f32 1e-12, %v4391_v13  ;;  %v4392_v20 = vmax.f32 %v4390_v17, 0.0 }
0x19bb   :  { %5996 = vrsqrt.f32 %v4395_v14  ;;  %v4396_v21 = vadd.f32 1e-12, %v4392_v20 }
0x19bd   :  { %5998 = vrsqrt.f32 %v4396_v21 }
0x19c5   :  { %v5997_v23 = vpop.eup %5996 }
0x19c6   :  { %v4399_v30 = vmul.f32 %v5997_v23, %v4393_v56 }
0x19c7   :  { %v5999_v58 = vpop.eup %5998 }
0x19c8   :  { %v4400_v37 = vmul.f32 %v5999_v58, %v4394_v27  ;;  %v4405_v12 = vmul.f32 %v4404_v57, %v4399_v30 }
0x19ca   :  { %v4406_v35 = vmul.f32 %v4404_v57, %v4400_v37  ;;  %v4411_v39 = vadd.f32 %v4410_v32, %v4405_v12 }
0x19cc   :  { %v4412_v54 = vadd.f32 %v4410_v32, %v4406_v35 }
0x19ce   :  { %v4413_v11 = vpack.c.bf16 %v4412_v54, %v4411_v39 }
0x19d0   :  { %5620 = vmatmul.mubr.bf16.vlgmr.msra.gmra.mrb[108].mxu1 %v4413_v11 }
0x1aa3   :  { %v4516_v43 = vpop.f32.mrb[108].mxu1 }
0x1aa4   :  { %v4517_v44 = vadd.f32 %v4516_v43, %v4433_v41  ;;  %v5621_v52 = vpop.f32.mrb[109].mxu1 }
0x1aa5   :  { %v4519_v47 = vpop.f32.mrb[110].mxu1 }
0x1aa6   :  { %4523 = vst [vmem:[%s6780_s5] sm:$0xff] %v4517_v44  ;;  %v4520_v36 = vadd.f32 %v4519_v47, %v4433_v41  ;;  %4525 = vmax.xlane.f32.xlu1 %v4517_v44  ;;  %v5622_v48 = vpop.f32.mrb[111].mxu1 }
0x1aa8   :  { %4524 = vst [vmem:[%s6780_s5 + $0x8] sm:$0xff] %v4520_v36  ;;  %4527 = vmax.xlane.f32.xlu0 %v4520_v36  ;;  %s4579_s5 = sshll.u32 %s6092_s0, 4  ;;  %s4580_s5 = int_to_ptr.vmem [resolvable:$true] %s4579_s5 }
0x1aa9   :  { %s6054_s11 = scalar_lea.vmem %s4580_s5, 16  ;;  %s6058_s12 = scalar_lea.vmem %s4580_s5, 32 }
0x1aaa   :  { %p6055_p2 = scmp.ne.s32.totalorder %s4580_s5, %s6054_s11  ;;  %p6059_p3 = scmp.lt.s32.totalorder %s4580_s5, %s4580_s5 }
0x1aab   :  { %p6060_p4 = scmp.lt.s32.totalorder %s6058_s12, %s6054_s11 }
0x1aad   :  { %p6061_p5 = por %p6060_p4, %p6059_p3 }
0x1aaf   :  { %p6062_p6 = pnand %p6061_p5, %p6055_p2 }
0x1ab7   :  { %4546 = vperm.xlu1 %5635, %v61_v18  }
0x1abe   :  { %4549 = vperm.xlu0 %5634, %v62_v6  }
0x1b33   :  { %v4526_v49 = vpop.xlane.xlu1 %4525 }
0x1b34   :  { %v4529_v63 = vsub.f32 %v4517_v44, %v4526_v49 }
0x1b35   :  { %v4528_v50 = vpop.xlane.xlu0 %4527 }
0x1b36   :  { %v4531_v53 = vmul.f32 1.442695, %v4529_v63  ;;  %v4530_v55 = vsub.f32 %v4520_v36, %v4528_v50 }
0x1b37   :  { %v4547_v16 = vpop.permute.xlu1 %4546 }
0x1b38   :  { %6000 = vpow2.f32 %v4531_v53  ;;  %v4533_v33 = vmul.f32 1.442695, %v4530_v55  ;;  %vm4551_vm0 = vcmp.eq.s32.totalorder %v6230_v38, %v4547_v16 }
0x1b39   :  { %v4553_v59 = vsel %vm4551_vm0, %v4517_v44, 0.0 }
0x1b3a   :  { %6002 = vpow2.f32 %v4533_v33 }
0x1b3d   :  { %v4550_v7 = vpop.permute.xlu0 %4549 }
0x1b3e   :  { %vm4552_vm15 = vcmp.eq.s32.totalorder %v6230_v38, %v4550_v7 }
0x1b3f   :  { %v4554_v45 = vsel %vm4552_vm15, %v4520_v36, 0.0 }
0x1b42   :  { %v6001_v51 = vpop.eup %6000 }
0x1b43   :  { %4535 = vadd.xlane.f32.xlu1 %v6001_v51 }
0x1b44   :  { %v6003_v42 = vpop.eup %6002 }
0x1b45   :  { %4537 = vadd.xlane.f32.xlu0 %v6003_v42 }
0x1b47   :  { %4555 = vadd.xlane.f32.xlu1 %v4553_v59 }
0x1b49   :  { %4557 = vadd.xlane.f32.xlu0 %v4554_v45 }
0x1bd0   :  { %v4536_v22 = vpop.xlane.xlu1 %4535 }
0x1bd1   :  { %6004 = vlog2.f32 %v4536_v22 }
0x1bd2   :  { %v4538_v60 = vpop.xlane.xlu0 %4537 }
0x1bd3   :  { %6006 = vlog2.f32 %v4538_v60 }
0x1bd4   :  { %v4556_v4 = vpop.xlane.xlu1 %4555 }
0x1bd6   :  { %v4558_v5 = vpop.xlane.xlu0 %4557 }
0x1bdb   :  { %v6005_v19 = vpop.eup %6004 }
0x1bdc   :  { %v4540_v46 = vmul.f32 0.6931472, %v6005_v19 }
0x1bdd   :  { %v6007_v61 = vpop.eup %6006 }
0x1bde   :  { %v4542_v62 = vmul.f32 0.6931472, %v6007_v61  ;;  %v4543_v2 = vadd.f32 %v4540_v46, %v4526_v49 }
0x1be0   :  { %v4544_v3 = vadd.f32 %v4542_v62, %v4528_v50  ;;  %v4559_v29 = vsub.f32 %v4543_v2, %v4556_v4 }
0x1be2   :  { %v4560_v40 = vsub.f32 %v4544_v3, %v4558_v5 }
0x1be4   :  { %v4561_v38 = vadd.f32 %v4560_v40, %v4559_v29 }
0x1be6   :  { %v4562_v28 = vrot.slane %v4561_v38, 4 }
0x1be8   :  { %v4563_v0 = vadd.f32 %v4562_v28, %v4561_v38 }
0x1bea   :  { %v4564_v8 = vrot.slane %v4563_v0, 2 }
0x1bec   :  { %v4565_v9 = vadd.f32 %v4564_v8, %v4563_v0 }
0x1bee   :  { %v4566_v34 = vrot.slane %v4565_v9, 1 }
0x1bf0   :  { %v4567_v10 = vadd.f32 %v4566_v34, %v4565_v9 }
0x1bf2   :  { %v4568_v31 = vmul.f32 0.0625, %v4567_v10 }
0x1bf4   :  { %4570 = vst.msk [vmem:[#allocation7] sm:$0x1] %vm4569_vm1, %v4568_v31 }
0x1bf5   :  { %6065 = shalt.err (!%p6062_p6)
}
0x1bf6   :  { %s6066_s15 = scalar_lea.hbm %s6781_s6, 16 }
0x1bf7   :  { %p6067_p7 = scmp.ne.s32.totalorder %s6781_s6, %s6066_s15  ;;  %p6070_p8 = scmp.lt.u32.totalorder %s6066_s15, %s6781_s6 }
0x1bf9   :  { %p6072_p9 = pnand %p6070_p8, %p6067_p7 }
0x1bfb   :  { %6075 = shalt.err (!%p6072_p9)
}
0x1bfc   :  { %4582 = dma.vmem_to_hbm [thread:$0]  %s4580_s5, 16, %s6781_s6, [#allocation4]  }
0x1bfd   :  { %6080 = dma.done.wait [#allocation4], 16  }
0x1bfe   :  { %6081 = vsyncadd [#allocation4], 4294967280 }
0x1bff   :  { %4588 = vsyncpa [#allocation3], 1 }
0x1c00   :  { %4589 = vsyncpa [#allocation6], 1 }
0x1c01   :  { %4590 = vsyncpa [#allocation4], 1 }

</bundles_post_ra>
